<compile_context>
chip_gen: v6e
topology: v6e:2x2x1
jax: 0.10.0
libtpu: 0.0.40
codegen_flags: <defaults>
</compile_context>

<pallas_src>
import jax
import jax.numpy as jnp
from jax.experimental import pallas as pl
from jax.experimental.pallas import tpu as pltpu

# Model dims (hard-coded in the PyTorch module).
L = 1454          # feature dim
D = 256           # attention hidden dim
K = 1             # attention heads
H1 = L * K // 2   # 727
H2 = L * K // 4   # 363
NCLS = 2

# Lane-aligned classifier hidden dims (weights padded ONCE at parameter prep;
# padding with zeros leaves the math unchanged).
H1P = 768         # 6 * 128
H2P = 384         # 3 * 128

TB_MAX = 128      # classifier GEMM rows per step (raise to 256 on v6e via tb=...)


# ----------------------------------------------------------------------------
# Fused kernel: grid = (ceil(B / TB),), TB bags per grid step.
# ----------------------------------------------------------------------------
def _fused_mil_kernel(h_ref, aw1_ref, ab1_ref, aw2_ref, ab2_ref,
                      cw1_ref, cb1_ref, cw2_ref, cb2_ref, cw3_ref, cb3_ref,
                      m_ref, a_ref, y_ref):
    TB, N, Lf = h_ref.shape
    h = h_ref[...]                                     # (TB, N, L) f32

    # Exact empty-instance test on the f32 features (== the PyTorch
    # `torch.sum(H[b, i, :]) == 0` loops).  Per-row lane reduce -> (TB, N).
    empty = jnp.sum(h, axis=2) == 0.0

    # -- attention MLP: Linear(L, D) -> tanh -> Linear(D, K=1) ----------------
    hf = h.astype(jnp.bfloat16).reshape(TB * N, Lf)    # MXU feed, f32 accumulate
    z = jnp.tanh(jnp.dot(hf, aw1_ref[...],
                         preferred_element_type=jnp.float32) + ab1_ref[...])   # (TB*N, D)
    # Linear(D, 1): one output column -> VPU mul + lane reduce, not the MXU.
    logits = jnp.sum(z.reshape(TB, N, D) * aw2_ref[...], axis=2) + ab2_ref[...]  # (TB, N)

    # -- masked softmax over the instance axis + renorm (all on dense (TB, N)) -
    logits = jnp.where(empty, 0.0, logits)             # pre-softmax zeroing
    mx = jnp.max(logits, axis=1, keepdims=True)
    e = jnp.exp(logits - mx)
    a = e / jnp.sum(e, axis=1, keepdims=True)          # softmax over instances
    a = jnp.where(empty, 0.0, a)                       # post-softmax zeroing
    # torch.div(A[b], torch.sum(A[b] + 1e-9)) is per-bag in the module.
    a = a / jnp.sum(a + 1e-9, axis=1, keepdims=True)
    a_ref[...] = a                                     # lane-dense (TB, N) store

    # -- attention pooling: M[b] = A[b] @ H[b] ---------------------------------
    # N is tiny (sublane axis) -> VPU mul + sublane reduce.  If bags ever reach
    # N >= 128 instances, switch this to an MXU batched matvec (bn,bnl->bl).
    m = jnp.sum(a[:, :, None] * h, axis=1)             # (TB, L) f32
    m_ref[...] = m

    # -- fused classifier MLP ---------------------------------------------------
    # TODO(synk): nn.Dropout(0.2) is identity at inference; no dropout RNG here.
    h1 = jnp.maximum(
        jnp.dot(m.astype(jnp.bfloat16), cw1_ref[...],
                preferred_element_type=jnp.float32) + cb1_ref[...], 0.0)        # (TB, H1P)
    h2 = jnp.maximum(
        jnp.dot(h1.astype(jnp.bfloat16), cw2_ref[...],
                preferred_element_type=jnp.float32) + cb2_ref[...], 0.0)        # (TB, H2P)
    lc = jnp.dot(h2, cw3_ref[...], preferred_element_type=jnp.float32) + cb3_ref[...]
    mc = jnp.max(lc, axis=1, keepdims=True)
    ec = jnp.exp(lc - mc)
    y_ref[...] = ec / jnp.sum(ec, axis=1, keepdims=True)   # softmax(dim=1)


def _choose_tb(B, N, Lf):
    """Bags per grid step.

    * Target ~TB_MAX classifier-GEMM rows per step while keeping the
      double-buffered f32 H tile under ~16 MiB of VMEM.
    * Multi-step tb must be a multiple of 8 (tb is the sublane dim of the 2-D
      output blocks); a single-step tb may equal B exactly.
    * Prefer >= 2 grid steps when B >= 16 so ("parallel",) can use both v7x
      TensorCores; the kernel is HBM-bound, so this is ~free on 1-TC chips.
    """
    # TODO(synk): bags with very large N*L need an instance-axis grid dimension
    # (reduction tiling); not implemented -- MIL bags here are small.
    vmem_cap = max(8, (16 * 1024 * 1024) // (2 * 4 * N * Lf))
    cap = min(TB_MAX, vmem_cap)
    if B < 16:
        return B                       # single step; block dim == full batch dim
    return min(cap, ((B + 1) // 2 + 7) // 8 * 8)


def attention_mil_forward(Hin, pp, tb=None):
    """Forward pass.  `pp` are the padded / bf16 params from pad_params()."""
    B, N, Lf = Hin.shape
    assert Lf == L
    if tb is None:
        tb = _choose_tb(B, N, Lf)
    n_steps = pl.cdiv(B, tb)
    # No batch / feature padding of H: the last (possibly partial) block relies
    # on Pallas' bounds handling -- out-of-range reads land in unused rows whose
    # results are dropped on the out-of-range writeback; every op is per-bag /
    # per-row, so valid bags are never contaminated.

    m, a, y = pl.pallas_call(
        _fused_mil_kernel,
        grid=(n_steps,),
        in_specs=[
            pl.BlockSpec((tb, N, L), lambda i: (i, 0, 0)),      # H tile (f32, ragged L)
            pl.BlockSpec((L, D), lambda i: (0, 0),
                         pipeline_mode=pl.Buffered(1)),         # attn W1 (bf16)
            pl.BlockSpec((1, D), lambda i: (0, 0)),             # attn b1
            pl.BlockSpec((1, D), lambda i: (0, 0)),             # attn W2 row
            pl.BlockSpec((1, 1), lambda i: (0, 0)),             # attn b2
            pl.BlockSpec((L, H1P), lambda i: (0, 0),
                         pipeline_mode=pl.Buffered(1)),         # cls W1 (bf16)
            pl.BlockSpec((1, H1P), lambda i: (0, 0)),           # cls b1
            pl.BlockSpec((H1P, H2P), lambda i: (0, 0),
                         pipeline_mode=pl.Buffered(1)),         # cls W2 (bf16)
            pl.BlockSpec((1, H2P), lambda i: (0, 0)),           # cls b2
            pl.BlockSpec((H2P, NCLS), lambda i: (0, 0)),        # cls W3
            pl.BlockSpec((1, NCLS), lambda i: (0, 0)),          # cls b3
        ],
        out_specs=[
            pl.BlockSpec((tb, L), lambda i: (i, 0)),            # M, unpadded (B, 1454)
            pl.BlockSpec((tb, N), lambda i: (i, 0)),            # A, 2-D lane-dense
            pl.BlockSpec((tb, NCLS), lambda i: (i, 0)),         # Y_prob
        ],
        out_shape=(
            jax.ShapeDtypeStruct((B, L), jnp.float32),
            jax.ShapeDtypeStruct((B, N), jnp.float32),
            jax.ShapeDtypeStruct((B, NCLS), jnp.float32),
        ),
        compiler_params=pltpu.CompilerParams(
            dimension_semantics=("parallel",),
            # ~22 MiB footprint at tb=128, N=8; stay well under v7x's 64 MiB
            # physical VMEM (and above v5e's 16 MiB scoped default).
            vmem_limit_bytes=40 * 1024 * 1024,
        ),
    )(Hin, pp["aw1"], pp["ab1"], pp["aw2"], pp["ab2"],
      pp["cw1"], pp["cb1"], pp["cw2"], pp["cb2"], pp["cw3"], pp["cb3"])

    # torch.transpose(A, 2, 1) layout: (B, 1, N).  expand_dims is metadata-only.
    return (y, m), a[:, None, :]


# ----------------------------------------------------------------------------
# Parameter prep: pad classifier hidden dims to lane-aligned sizes once (zeros,
# so the math is unchanged) and cast the big matrices to bf16 (f32 MXU accum).
# ----------------------------------------------------------------------------
def pad_params(p):
    return {
        "aw1": p["aw1"].astype(jnp.bfloat16),                            # (L, D)
        "ab1": p["ab1"],
        "aw2": p["aw2"],
        "ab2": p["ab2"],
        "cw1": jnp.pad(p["cw1"], ((0, 0), (0, H1P - H1))).astype(jnp.bfloat16),
        "cb1": jnp.pad(p["cb1"], ((0, 0), (0, H1P - H1))),
        "cw2": jnp.pad(p["cw2"], ((0, H1P - H1), (0, H2P - H2))).astype(jnp.bfloat16),
        "cb2": jnp.pad(p["cb2"], ((0, 0), (0, H2P - H2))),
        "cw3": jnp.pad(p["cw3"], ((0, H2P - H2), (0, 0))),
        "cb3": p["cb3"],
    }


# ----------------------------------------------------------------------------
# Pure-JAX reference (unpadded, f32) for correctness checking.
# ----------------------------------------------------------------------------
def ref_forward(H, p):
    z = jnp.tanh(H @ p["aw1"] + p["ab1"])                              # (B, N, D)
    logits = jnp.sum(z * p["aw2"][None], axis=-1) + p["ab2"][0, 0]     # (B, N)
    empty = jnp.sum(H, axis=-1) == 0.0
    logits = jnp.where(empty, 0.0, logits)
    a = jax.nn.softmax(logits, axis=-1)
    a = jnp.where(empty, 0.0, a)
    a = a / jnp.sum(a + 1e-9, axis=-1, keepdims=True)
    M = jnp.einsum("bn,bnl->bl", a, H)
    h1 = jax.nn.relu(M @ p["cw1"] + p["cb1"])
    h2 = jax.nn.relu(h1 @ p["cw2"] + p["cb2"])
    y = jax.nn.softmax(h2 @ p["cw3"] + p["cb3"], axis=1)
    return y, M, a[:, None, :]


def init_params(key):
    ks = jax.random.split(key, 10)

    def lin(k, fan_in, shape):
        bound = 1.0 / jnp.sqrt(fan_in)
        return jax.random.uniform(k, shape, jnp.float32, -bound, bound)

    return {
        # attention: Linear(L, D), Linear(D, K=1)   (weights stored (in, out))
        "aw1": lin(ks[0], L, (L, D)),
        "ab1": lin(ks[1], L, (1, D)),
        "aw2": lin(ks[2], D, (1, D)),      # PyTorch weight (K=1, D)
        "ab2": lin(ks[3], D, (1, 1)),
        # classifier: Linear(L, 727), Linear(727, 363), Linear(363, 2)
        "cw1": lin(ks[4], L, (L, H1)),
        "cb1": lin(ks[5], L, (1, H1)),
        "cw2": lin(ks[6], H1, (H1, H2)),
        "cb2": lin(ks[7], H1, (1, H2)),
        "cw3": lin(ks[8], H2, (H2, NCLS)),
        "cb3": lin(ks[9], H2, (1, NCLS)),
    }


if __name__ == "__main__":
    key = jax.random.PRNGKey(0)
    kp, kh1, kh2 = jax.random.split(key, 3)
    params = init_params(kp)
    pparams = pad_params(params)

    # --- test 1: tiny batch, single grid step, exercises the empty-instance mask
    Ba, Na = 2, 8
    Hin_a = jax.random.normal(kh1, (Ba, Na, L), jnp.float32)
    Hin_a = Hin_a.at[1, 3, :].set(0.0)           # all-zero instance -> mask path
    (Ya, Ma), Aa = attention_mil_forward(Hin_a, pparams)
    jax.block_until_ready((Ya, Ma, Aa))

    ya_r, ma_r, aa_r = ref_forward(Hin_a, params)
    assert Ya.shape == (Ba, NCLS) and Ma.shape == (Ba, L) and Aa.shape == (Ba, 1, Na)
    assert jnp.allclose(Ma, ma_r, rtol=2e-2, atol=2e-2)
    assert jnp.allclose(Aa, aa_r, rtol=2e-2, atol=2e-2)
    assert jnp.allclose(Ya, ya_r, rtol=2e-2, atol=2e-2)

    # --- test 2: multi-step grid with a ragged last block (B=20 -> tb=16, grid=2)
    Bb, Nb = 20, 8
    Hin_b = jax.random.normal(kh2, (Bb, Nb, L), jnp.float32)
    Hin_b = Hin_b.at[0, 0, :].set(0.0)
    Hin_b = Hin_b.at[17, 5, :].set(0.0)
    (Yb, Mb), Ab = attention_mil_forward(Hin_b, pparams)
    jax.block_until_ready((Yb, Mb, Ab))

    yb_r, mb_r, ab_r = ref_forward(Hin_b, params)
    assert Yb.shape == (Bb, NCLS) and Mb.shape == (Bb, L) and Ab.shape == (Bb, 1, Nb)
    assert jnp.allclose(Mb, mb_r, rtol=2e-2, atol=2e-2)
    assert jnp.allclose(Ab, ab_r, rtol=2e-2, atol=2e-2)
    assert jnp.allclose(Yb, yb_r, rtol=2e-2, atol=2e-2)

    print("KERNEL_OK")
</pallas_src>

<mosaic_0001>
module attributes {stable_mosaic.version = 11 : i64} {
  func.func @_fused_mil_kernel(%arg0: i32, %arg1: memref<2x8x1454xf32, #tpu.memory_space<vmem>>, %arg2: memref<1454x256xbf16, #tpu.memory_space<vmem>>, %arg3: memref<1x256xf32, #tpu.memory_space<vmem>>, %arg4: memref<1x256xf32, #tpu.memory_space<vmem>>, %arg5: memref<1x1xf32, #tpu.memory_space<vmem>>, %arg6: memref<1454x768xbf16, #tpu.memory_space<vmem>>, %arg7: memref<1x768xf32, #tpu.memory_space<vmem>>, %arg8: memref<768x384xbf16, #tpu.memory_space<vmem>>, %arg9: memref<1x384xf32, #tpu.memory_space<vmem>>, %arg10: memref<384x2xf32, #tpu.memory_space<vmem>>, %arg11: memref<1x2xf32, #tpu.memory_space<vmem>>, %arg12: memref<2x1454xf32, #tpu.memory_space<vmem>>, %arg13: memref<2x8xf32, #tpu.memory_space<vmem>>, %arg14: memref<2x2xf32, #tpu.memory_space<vmem>>) attributes {dimension_semantics = [#tpu.dimension_semantics<parallel>], iteration_bounds = array<i64: 1>, scalar_prefetch = 0 : i64, scratch_operands = 0 : i64, tpu.core_type = #tpu.core_type<tc>, window_params = [{transform_indices = @transform_0, window_bounds = array<i64: 2, 8, 1454>}, {pipeline_mode = #tpu.pipeline_mode<synchronous>, transform_indices = @transform_1, window_bounds = array<i64: 1454, 256>}, {pipeline_mode = #tpu.pipeline_mode<synchronous>, transform_indices = @transform_2, window_bounds = array<i64: 1, 256>}, {pipeline_mode = #tpu.pipeline_mode<synchronous>, transform_indices = @transform_3, window_bounds = array<i64: 1, 256>}, {pipeline_mode = #tpu.pipeline_mode<synchronous>, transform_indices = @transform_4, window_bounds = array<i64: 1, 1>}, {pipeline_mode = #tpu.pipeline_mode<synchronous>, transform_indices = @transform_5, window_bounds = array<i64: 1454, 768>}, {pipeline_mode = #tpu.pipeline_mode<synchronous>, transform_indices = @transform_6, window_bounds = array<i64: 1, 768>}, {pipeline_mode = #tpu.pipeline_mode<synchronous>, transform_indices = @transform_7, window_bounds = array<i64: 768, 384>}, {pipeline_mode = #tpu.pipeline_mode<synchronous>, transform_indices = @transform_8, window_bounds = array<i64: 1, 384>}, {pipeline_mode = #tpu.pipeline_mode<synchronous>, transform_indices = @transform_9, window_bounds = array<i64: 384, 2>}, {pipeline_mode = #tpu.pipeline_mode<synchronous>, transform_indices = @transform_10, window_bounds = array<i64: 1, 2>}, {transform_indices = @transform_11, window_bounds = array<i64: 2, 1454>}, {transform_indices = @transform_12, window_bounds = array<i64: 2, 8>}, {transform_indices = @transform_13, window_bounds = array<i64: 2, 2>}]} {
    %c0 = arith.constant 0 : index
    %c0_0 = arith.constant 0 : index
    %c0_1 = arith.constant 0 : index
    %0 = vector.load %arg1[%c0, %c0_0, %c0_1] : memref<2x8x1454xf32, #tpu.memory_space<vmem>>, vector<2x8x1454xf32>
    %cst = arith.constant dense<0.000000e+00> : vector<2x8xf32>
    %1 = vector.multi_reduction <add>, %0, %cst [2] : vector<2x8x1454xf32> to vector<2x8xf32>
    %cst_2 = arith.constant 0.000000e+00 : f32
    %2 = vector.broadcast %cst_2 : f32 to vector<2x8xf32>
    %3 = arith.cmpf oeq, %1, %2 : vector<2x8xf32>
    %4 = arith.truncf %0 : vector<2x8x1454xf32> to vector<2x8x1454xbf16>
    %5 = vector.shape_cast %4 : vector<2x8x1454xbf16> to vector<16x1454xbf16>
    %c0_3 = arith.constant 0 : index
    %c0_4 = arith.constant 0 : index
    %6 = vector.load %arg2[%c0_3, %c0_4] : memref<1454x256xbf16, #tpu.memory_space<vmem>>, vector<1454x256xbf16>
    %cst_5 = arith.constant dense<0.000000e+00> : vector<16x256xf32>
    %7 = tpu.matmul %5, %6, %cst_5 {dimension_numbers = #tpu.dot_dimension_numbers<[1], [0], [0], [1], [0, 0, 1, 1], [], []>} : vector<16x1454xbf16>, vector<1454x256xbf16>, vector<16x256xf32> -> vector<16x256xf32>
    %c0_6 = arith.constant 0 : index
    %c0_7 = arith.constant 0 : index
    %8 = vector.load %arg3[%c0_6, %c0_7] : memref<1x256xf32, #tpu.memory_space<vmem>>, vector<1x256xf32>
    %9 = vector.broadcast %8 : vector<1x256xf32> to vector<16x256xf32>
    %10 = arith.addf %7, %9 : vector<16x256xf32>
    %11 = math.tanh %10 : vector<16x256xf32>
    %12 = vector.shape_cast %11 : vector<16x256xf32> to vector<2x8x256xf32>
    %c0_8 = arith.constant 0 : index
    %c0_9 = arith.constant 0 : index
    %13 = vector.load %arg4[%c0_8, %c0_9] : memref<1x256xf32, #tpu.memory_space<vmem>>, vector<1x256xf32>
    %14 = vector.shape_cast %13 : vector<1x256xf32> to vector<1x1x256xf32>
    %15 = vector.broadcast %14 : vector<1x1x256xf32> to vector<2x8x256xf32>
    %16 = arith.mulf %12, %15 : vector<2x8x256xf32>
    %cst_10 = arith.constant dense<0.000000e+00> : vector<2x8xf32>
    %17 = vector.multi_reduction <add>, %16, %cst_10 [2] : vector<2x8x256xf32> to vector<2x8xf32>
    %c0_11 = arith.constant 0 : index
    %c0_12 = arith.constant 0 : index
    %18 = vector.load %arg5[%c0_11, %c0_12] : memref<1x1xf32, #tpu.memory_space<vmem>>, vector<1x1xf32>
    %19 = vector.broadcast %18 : vector<1x1xf32> to vector<2x8xf32>
    %20 = arith.addf %17, %19 : vector<2x8xf32>
    %cst_13 = arith.constant 0.000000e+00 : f32
    %21 = vector.broadcast %cst_13 : f32 to vector<2x8xf32>
    %22 = arith.select %3, %21, %20 : vector<2x8xi1>, vector<2x8xf32>
    %cst_14 = arith.constant dense<0xFF800000> : vector<2xf32>
    %23 = vector.multi_reduction <maximumf>, %22, %cst_14 [1] : vector<2x8xf32> to vector<2xf32>
    %24 = vector.shape_cast %23 : vector<2xf32> to vector<2x1xf32>
    %25 = vector.broadcast %24 : vector<2x1xf32> to vector<2x8xf32>
    %26 = arith.subf %22, %25 : vector<2x8xf32>
    %27 = math.exp %26 : vector<2x8xf32>
    %cst_15 = arith.constant dense<0.000000e+00> : vector<2xf32>
    %28 = vector.multi_reduction <add>, %27, %cst_15 [1] : vector<2x8xf32> to vector<2xf32>
    %29 = vector.shape_cast %28 : vector<2xf32> to vector<2x1xf32>
    %30 = vector.broadcast %29 : vector<2x1xf32> to vector<2x8xf32>
    %31 = arith.divf %27, %30 : vector<2x8xf32>
    %cst_16 = arith.constant 0.000000e+00 : f32
    %32 = vector.broadcast %cst_16 : f32 to vector<2x8xf32>
    %33 = arith.select %3, %32, %31 : vector<2x8xi1>, vector<2x8xf32>
    %cst_17 = arith.constant 9.99999971E-10 : f32
    %34 = vector.broadcast %cst_17 : f32 to vector<2x8xf32>
    %35 = arith.addf %33, %34 : vector<2x8xf32>
    %cst_18 = arith.constant dense<0.000000e+00> : vector<2xf32>
    %36 = vector.multi_reduction <add>, %35, %cst_18 [1] : vector<2x8xf32> to vector<2xf32>
    %37 = vector.shape_cast %36 : vector<2xf32> to vector<2x1xf32>
    %38 = vector.broadcast %37 : vector<2x1xf32> to vector<2x8xf32>
    %39 = arith.divf %33, %38 : vector<2x8xf32>
    %c0_19 = arith.constant 0 : index
    %c0_20 = arith.constant 0 : index
    %40 = vector.load %arg13[%c0_19, %c0_20] : memref<2x8xf32, #tpu.memory_space<vmem>>, vector<2x8xf32>
    tpu.vector_store %arg13[%c0_19, %c0_20], %39 {strides = array<i32>} : memref<2x8xf32, #tpu.memory_space<vmem>>, vector<2x8xf32>,
    %41 = vector.shape_cast %39 : vector<2x8xf32> to vector<2x8x1xf32>
    %42 = vector.broadcast %41 : vector<2x8x1xf32> to vector<2x8x1454xf32>
    %43 = arith.mulf %42, %0 : vector<2x8x1454xf32>
    %cst_21 = arith.constant dense<0.000000e+00> : vector<2x1454xf32>
    %44 = vector.multi_reduction <add>, %43, %cst_21 [1] : vector<2x8x1454xf32> to vector<2x1454xf32>
    %c0_22 = arith.constant 0 : index
    %c0_23 = arith.constant 0 : index
    %45 = vector.load %arg12[%c0_22, %c0_23] : memref<2x1454xf32, #tpu.memory_space<vmem>>, vector<2x1454xf32>
    tpu.vector_store %arg12[%c0_22, %c0_23], %44 {strides = array<i32>} : memref<2x1454xf32, #tpu.memory_space<vmem>>, vector<2x1454xf32>,
    %46 = arith.truncf %44 : vector<2x1454xf32> to vector<2x1454xbf16>
    %c0_24 = arith.constant 0 : index
    %c0_25 = arith.constant 0 : index
    %47 = vector.load %arg6[%c0_24, %c0_25] : memref<1454x768xbf16, #tpu.memory_space<vmem>>, vector<1454x768xbf16>
    %cst_26 = arith.constant dense<0.000000e+00> : vector<2x768xf32>
    %48 = tpu.matmul %46, %47, %cst_26 {dimension_numbers = #tpu.dot_dimension_numbers<[1], [0], [0], [1], [0, 0, 1, 1], [], []>} : vector<2x1454xbf16>, vector<1454x768xbf16>, vector<2x768xf32> -> vector<2x768xf32>
    %c0_27 = arith.constant 0 : index
    %c0_28 = arith.constant 0 : index
    %49 = vector.load %arg7[%c0_27, %c0_28] : memref<1x768xf32, #tpu.memory_space<vmem>>, vector<1x768xf32>
    %50 = vector.broadcast %49 : vector<1x768xf32> to vector<2x768xf32>
    %51 = arith.addf %48, %50 : vector<2x768xf32>
    %cst_29 = arith.constant 0.000000e+00 : f32
    %52 = vector.broadcast %cst_29 : f32 to vector<2x768xf32>
    %53 = arith.maximumf %51, %52 : vector<2x768xf32>
    %54 = arith.truncf %53 : vector<2x768xf32> to vector<2x768xbf16>
    %c0_30 = arith.constant 0 : index
    %c0_31 = arith.constant 0 : index
    %55 = vector.load %arg8[%c0_30, %c0_31] : memref<768x384xbf16, #tpu.memory_space<vmem>>, vector<768x384xbf16>
    %cst_32 = arith.constant dense<0.000000e+00> : vector<2x384xf32>
    %56 = tpu.matmul %54, %55, %cst_32 {dimension_numbers = #tpu.dot_dimension_numbers<[1], [0], [0], [1], [0, 0, 1, 1], [], []>} : vector<2x768xbf16>, vector<768x384xbf16>, vector<2x384xf32> -> vector<2x384xf32>
    %c0_33 = arith.constant 0 : index
    %c0_34 = arith.constant 0 : index
    %57 = vector.load %arg9[%c0_33, %c0_34] : memref<1x384xf32, #tpu.memory_space<vmem>>, vector<1x384xf32>
    %58 = vector.broadcast %57 : vector<1x384xf32> to vector<2x384xf32>
    %59 = arith.addf %56, %58 : vector<2x384xf32>
    %cst_35 = arith.constant 0.000000e+00 : f32
    %60 = vector.broadcast %cst_35 : f32 to vector<2x384xf32>
    %61 = arith.maximumf %59, %60 : vector<2x384xf32>
    %c0_36 = arith.constant 0 : index
    %c0_37 = arith.constant 0 : index
    %62 = vector.load %arg10[%c0_36, %c0_37] : memref<384x2xf32, #tpu.memory_space<vmem>>, vector<384x2xf32>
    %cst_38 = arith.constant dense<0.000000e+00> : vector<2x2xf32>
    %63 = tpu.matmul %61, %62, %cst_38 {dimension_numbers = #tpu.dot_dimension_numbers<[1], [0], [0], [1], [0, 0, 1, 1], [], []>} : vector<2x384xf32>, vector<384x2xf32>, vector<2x2xf32> -> vector<2x2xf32>
    %c0_39 = arith.constant 0 : index
    %c0_40 = arith.constant 0 : index
    %64 = vector.load %arg11[%c0_39, %c0_40] : memref<1x2xf32, #tpu.memory_space<vmem>>, vector<1x2xf32>
    %65 = vector.broadcast %64 : vector<1x2xf32> to vector<2x2xf32>
    %66 = arith.addf %63, %65 : vector<2x2xf32>
    %cst_41 = arith.constant dense<0xFF800000> : vector<2xf32>
    %67 = vector.multi_reduction <maximumf>, %66, %cst_41 [1] : vector<2x2xf32> to vector<2xf32>
    %68 = vector.shape_cast %67 : vector<2xf32> to vector<2x1xf32>
    %69 = vector.broadcast %68 : vector<2x1xf32> to vector<2x2xf32>
    %70 = arith.subf %66, %69 : vector<2x2xf32>
    %71 = math.exp %70 : vector<2x2xf32>
    %cst_42 = arith.constant dense<0.000000e+00> : vector<2xf32>
    %72 = vector.multi_reduction <add>, %71, %cst_42 [1] : vector<2x2xf32> to vector<2xf32>
    %73 = vector.shape_cast %72 : vector<2xf32> to vector<2x1xf32>
    %74 = vector.broadcast %73 : vector<2x1xf32> to vector<2x2xf32>
    %75 = arith.divf %71, %74 : vector<2x2xf32>
    %c0_43 = arith.constant 0 : index
    %c0_44 = arith.constant 0 : index
    %76 = vector.load %arg14[%c0_43, %c0_44] : memref<2x2xf32, #tpu.memory_space<vmem>>, vector<2x2xf32>
    tpu.vector_store %arg14[%c0_43, %c0_44], %75 {strides = array<i32>} : memref<2x2xf32, #tpu.memory_space<vmem>>, vector<2x2xf32>,
    return
  }
  func.func @transform_0(%arg0: i32) -> (i32, i32, i32) {
    %c0_i32 = arith.constant 0 : i32
    %c0_i32_0 = arith.constant 0 : i32
    %c0_i32_1 = arith.constant 0 : i32
    return %arg0, %c0_i32, %c0_i32_0 : i32, i32, i32
  }
  func.func @transform_1(%arg0: i32) -> (i32, i32) {
    %c0_i32 = arith.constant 0 : i32
    %c0_i32_0 = arith.constant 0 : i32
    %c0_i32_1 = arith.constant 0 : i32
    return %c0_i32, %c0_i32_0 : i32, i32
  }
  func.func @transform_2(%arg0: i32) -> (i32, i32) {
    %c0_i32 = arith.constant 0 : i32
    %c0_i32_0 = arith.constant 0 : i32
    %c0_i32_1 = arith.constant 0 : i32
    return %c0_i32, %c0_i32_0 : i32, i32
  }
  func.func @transform_3(%arg0: i32) -> (i32, i32) {
    %c0_i32 = arith.constant 0 : i32
    %c0_i32_0 = arith.constant 0 : i32
    %c0_i32_1 = arith.constant 0 : i32
    return %c0_i32, %c0_i32_0 : i32, i32
  }
  func.func @transform_4(%arg0: i32) -> (i32, i32) {
    %c0_i32 = arith.constant 0 : i32
    %c0_i32_0 = arith.constant 0 : i32
    %c0_i32_1 = arith.constant 0 : i32
    return %c0_i32, %c0_i32_0 : i32, i32
  }
  func.func @transform_5(%arg0: i32) -> (i32, i32) {
    %c0_i32 = arith.constant 0 : i32
    %c0_i32_0 = arith.constant 0 : i32
    %c0_i32_1 = arith.constant 0 : i32
    return %c0_i32, %c0_i32_0 : i32, i32
  }
  func.func @transform_6(%arg0: i32) -> (i32, i32) {
    %c0_i32 = arith.constant 0 : i32
    %c0_i32_0 = arith.constant 0 : i32
    %c0_i32_1 = arith.constant 0 : i32
    return %c0_i32, %c0_i32_0 : i32, i32
  }
  func.func @transform_7(%arg0: i32) -> (i32, i32) {
    %c0_i32 = arith.constant 0 : i32
    %c0_i32_0 = arith.constant 0 : i32
    %c0_i32_1 = arith.constant 0 : i32
    return %c0_i32, %c0_i32_0 : i32, i32
  }
  func.func @transform_8(%arg0: i32) -> (i32, i32) {
    %c0_i32 = arith.constant 0 : i32
    %c0_i32_0 = arith.constant 0 : i32
    %c0_i32_1 = arith.constant 0 : i32
    return %c0_i32, %c0_i32_0 : i32, i32
  }
  func.func @transform_9(%arg0: i32) -> (i32, i32) {
    %c0_i32 = arith.constant 0 : i32
    %c0_i32_0 = arith.constant 0 : i32
    %c0_i32_1 = arith.constant 0 : i32
    return %c0_i32, %c0_i32_0 : i32, i32
  }
  func.func @transform_10(%arg0: i32) -> (i32, i32) {
    %c0_i32 = arith.constant 0 : i32
    %c0_i32_0 = arith.constant 0 : i32
    %c0_i32_1 = arith.constant 0 : i32
    return %c0_i32, %c0_i32_0 : i32, i32
  }
  func.func @transform_11(%arg0: i32) -> (i32, i32) {
    %c0_i32 = arith.constant 0 : i32
    %c0_i32_0 = arith.constant 0 : i32
    return %arg0, %c0_i32 : i32, i32
  }
  func.func @transform_12(%arg0: i32) -> (i32, i32) {
    %c0_i32 = arith.constant 0 : i32
    %c0_i32_0 = arith.constant 0 : i32
    return %arg0, %c0_i32 : i32, i32
  }
  func.func @transform_13(%arg0: i32) -> (i32, i32) {
    %c0_i32 = arith.constant 0 : i32
    %c0_i32_0 = arith.constant 0 : i32
    return %arg0, %c0_i32 : i32, i32
  }
}

</mosaic_0001>

<bundles_post_ra>
// kernel: tpu_custom_call.1
= control target key start
LH: loop header
LB: loop body
LE: loop exit
PB: predicated region body
PF: predicated region fallthrough
CT: control target
= control target key end

     0   :  { %s11269_s0 = inlined_call_operand.hbm [shape: f32[2,8,1454], index: 0, kind: input, shape index: {}]   ;;  %s11270_s1 = inlined_call_operand.hbm [shape: bf16[1454,256], index: 1, kind: input, shape index: {}]   ;;  %s11271_s2 = inlined_call_operand.hbm [shape: f32[1,256], index: 2, kind: input, shape index: {}]   ;;  %s11272_s3 = inlined_call_operand.hbm [shape: f32[1,256], index: 3, kind: input, shape index: {}]   ;;  %s11273_s4 = inlined_call_operand.<no memory space> [shape: f32[1,1], index: 4, kind: input, shape index: {}]   ;;  %s11274_s5 = inlined_call_operand.hbm [shape: bf16[1454,768], index: 5, kind: input, shape index: {}]   ;;  %s11275_s6 = inlined_call_operand.hbm [shape: f32[1,768], index: 6, kind: input, shape index: {}]   ;;  %s11276_s7 = inlined_call_operand.hbm [shape: bf16[768,384], index: 7, kind: input, shape index: {}]   ;;  %s11277_s8 = inlined_call_operand.hbm [shape: f32[1,384], index: 8, kind: input, shape index: {}]   ;;  %s11278_s9 = inlined_call_operand.vmem [shape: f32[384,2], index: 9, kind: input, shape index: {}]   ;;  %s11279_s10 = inlined_call_operand.hbm [shape: f32[1,2], index: 10, kind: input, shape index: {}]   ;;  %s11280_s11 = inlined_call_operand.hbm [shape: f32[2,1454], index: 11, kind: output, shape index: {0}]   ;;  %s11281_s12 = inlined_call_operand.hbm [shape: f32[2,8], index: 12, kind: output, shape index: {1}]   ;;  %s11282_s13 = inlined_call_operand.hbm [shape: f32[2,2], index: 13, kind: output, shape index: {2}]  }
   0x1   :  { %v19_v0 = vstv %s11273_s4 }
   0x2   :  { %20 = vst [vmem:[#allocation2] sm:$0x1] %v19_v0 }
   0x3   :  { %21 = vsyncpa [#allocation4], 0 }
   0x4   :  { %22 = vsyncpa [#allocation7], 0 }
   0x5   :  { %23 = vsyncpa [#allocation10], 0 }
   0x6   :  { %24 = vsyncpa [#allocation13], 0 }
   0x7   :  { %25 = vsyncpa [#allocation16], 0 }
   0x8   :  { %26 = vsyncpa [#allocation5], 0 }
   0x9   :  { %27 = vsyncpa [#allocation20], 0  ;;  %s10535_s27 = smov [#allocation6]  }
   0xa   :  { %s45_s28 = sshll.u32 %s10535_s27, 4  ;;  %s46_s28 = int_to_ptr.vmem [resolvable:$true] %s45_s28 }
   0xb   :  { %s10289_s29 = scalar_lea.vmem %s46_s28, 23296  ;;  %p10294_p1 = scmp.lt.s32.totalorder %s46_s28, %s46_s28 }
   0xc   :  { %p10290_p0 = scmp.ne.s32.totalorder %s46_s28, %s10289_s29  ;;  %p10295_p2 = scmp.lt.s32.totalorder %s10289_s29, %s10289_s29 }
   0xe   :  { %p10296_p3 = por %p10295_p2, %p10294_p1 }
  0x10   :  { %p10297_p4 = pnand %p10296_p3, %p10290_p0 }
  0x12   :  { %10300 = shalt.err (!%p10297_p4)
}
  0x13   :  { %s10536_s30 = smov 128   ;;  %s10537_s4 = smov 8  }
  0x14   :  { %51 = dma.hbm_to_vmem [thread:$0]  %s11270_s1, 23296, %s46_s28, [#allocation7], %s10536_s30, %s10536_s30, %s10537_s4  }
  0x15   :  { %s10538_s16 = smov [#allocation9]   ;;  %s10539_s18 = smov [#allocation12]  }
  0x16   :  { %s68_s17 = sshll.u32 %s10538_s16, 4  ;;  %s92_s19 = sshll.u32 %s10539_s18, 4  ;;  %s69_s17 = int_to_ptr.vmem [resolvable:$true] %s68_s17  ;;  %s93_s19 = int_to_ptr.vmem [resolvable:$true] %s92_s19 }
  0x17   :  { %s10309_s20 = scalar_lea.vmem %s69_s17, 32  ;;  %p10314_p6 = scmp.lt.s32.totalorder %s69_s17, %s69_s17 }
  0x18   :  { %p10310_p5 = scmp.ne.s32.totalorder %s69_s17, %s10309_s20  ;;  %p10315_p7 = scmp.lt.s32.totalorder %s10309_s20, %s10309_s20 }
  0x1a   :  { %p10316_p8 = por %p10315_p7, %p10314_p6 }
  0x1c   :  { %p10317_p9 = pnand %p10316_p8, %p10310_p5 }
  0x1e   :  { %10320 = shalt.err (!%p10317_p9)
}
  0x1f   :  { %71 = dma.hbm_to_vmem [thread:$0]  %s11272_s3, 32, %s69_s17, [#allocation10]  }
  0x20   :  { %s10329_s23 = scalar_lea.vmem %s93_s19, 96  ;;  %p10334_p11 = scmp.lt.s32.totalorder %s93_s19, %s93_s19 }
  0x21   :  { %p10330_p10 = scmp.ne.s32.totalorder %s93_s19, %s10329_s23  ;;  %p10335_p12 = scmp.lt.s32.totalorder %s10329_s23, %s10329_s23 }
  0x23   :  { %p10336_p13 = por %p10335_p12, %p10334_p11 }
  0x25   :  { %p10337_p0 = pnand %p10336_p13, %p10330_p10 }
  0x27   :  { %10340 = shalt.err (!%p10337_p0)
}
  0x28   :  { %95 = dma.hbm_to_vmem [thread:$0]  %s11275_s6, 96, %s93_s19, [#allocation13]  }
  0x29   :  { %s10540_s25 = smov [#allocation15]   ;;  %s10541_s27 = smov [#allocation3]  }
  0x2a   :  { %s114_s26 = sshll.u32 %s10540_s25, 4  ;;  %s33_s28 = sshll.u32 %s10541_s27, 4  ;;  %s115_s26 = int_to_ptr.vmem [resolvable:$true] %s114_s26  ;;  %s34_s28 = int_to_ptr.vmem [resolvable:$true] %s33_s28 }
  0x2b   :  { %s10349_s29 = scalar_lea.vmem %s115_s26, 48  ;;  %s10353_s3 = scalar_lea.vmem %s115_s26, 64 }
  0x2c   :  { %p10350_p1 = scmp.ne.s32.totalorder %s115_s26, %s10349_s29  ;;  %p10354_p2 = scmp.lt.s32.totalorder %s115_s26, %s115_s26 }
  0x2d   :  { %p10355_p3 = scmp.lt.s32.totalorder %s10353_s3, %s10349_s29 }
  0x2f   :  { %p10356_p4 = por %p10355_p3, %p10354_p2 }
  0x31   :  { %p10357_p5 = pnand %p10356_p4, %p10350_p1 }
  0x33   :  { %10360 = shalt.err (!%p10357_p5)
}
  0x34   :  { %117 = dma.hbm_to_vmem [thread:$0]  %s11277_s8, 48, %s115_s26, [#allocation16]  }
  0x35   :  { %s10369_s14 = scalar_lea.vmem %s34_s28, 3072  ;;  %p10374_p7 = scmp.lt.s32.totalorder %s34_s28, %s34_s28 }
  0x36   :  { %p10370_p6 = scmp.ne.s32.totalorder %s34_s28, %s10369_s14  ;;  %p10375_p8 = scmp.lt.s32.totalorder %s10369_s14, %s10369_s14 }
  0x38   :  { %p10376_p9 = por %p10375_p8, %p10374_p7 }
  0x3a   :  { %p10377_p10 = pnand %p10376_p9, %p10370_p6 }
  0x3c   :  { %10380 = shalt.err (!%p10377_p10)
}
  0x3d   :  { %s10542_s6 = smov 1536   ;;  %s10543_s15 = smov 96  }
  0x3e   :  { %39 = dma.hbm_to_vmem [thread:$0]  %s11269_s0, 3072, %s34_s28, [#allocation4], %s10542_s6, %s10542_s6, %s10543_s15  }
  0x3f   :  { %s10544_s18 = smov [#allocation8]   ;;  %s10545_s20 = smov [#allocation11]  }
  0x40   :  { %s58_s19 = sshll.u32 %s10544_s18, 4  ;;  %s79_s21 = sshll.u32 %s10545_s20, 4  ;;  %s59_s19 = int_to_ptr.vmem [resolvable:$true] %s58_s19  ;;  %s80_s21 = int_to_ptr.vmem [resolvable:$true] %s79_s21 }
  0x41   :  { %s10389_s8 = scalar_lea.vmem %s59_s19, 32  ;;  %p10394_p12 = scmp.lt.s32.totalorder %s59_s19, %s59_s19 }
  0x42   :  { %p10390_p11 = scmp.ne.s32.totalorder %s59_s19, %s10389_s8  ;;  %p10395_p13 = scmp.lt.s32.totalorder %s10389_s8, %s10389_s8 }
  0x44   :  { %p10396_p0 = por %p10395_p13, %p10394_p12 }
  0x46   :  { %p10397_p1 = pnand %p10396_p0, %p10390_p11 }
  0x48   :  { %10400 = shalt.err (!%p10397_p1)
}
  0x49   :  { %61 = dma.hbm_to_vmem [thread:$0]  %s11271_s2, 32, %s59_s19, [#allocation7]  }
  0x4a   :  { %s10409_s1 = scalar_lea.vmem %s80_s21, 69888  ;;  %p10414_p3 = scmp.lt.s32.totalorder %s80_s21, %s80_s21 }
  0x4b   :  { %p10410_p2 = scmp.ne.s32.totalorder %s80_s21, %s10409_s1  ;;  %p10415_p4 = scmp.lt.s32.totalorder %s10409_s1, %s10409_s1 }
  0x4d   :  { %p10416_p5 = por %p10415_p4, %p10414_p3 }
  0x4f   :  { %p10417_p6 = pnand %p10416_p5, %p10410_p2 }
  0x51   :  { %10420 = shalt.err (!%p10417_p6)
}
  0x52   :  { %s10546_s0 = smov 384   ;;  %s10547_s24 = smov 24  }
  0x53   :  { %85 = dma.hbm_to_vmem [thread:$0]  %s11274_s5, 69888, %s80_s21, [#allocation10], %s10546_s0, %s10546_s0, %s10547_s24  }
  0x54   :  { %s10548_s27 = smov [#allocation14]  }
  0x55   :  { %s101_s28 = sshll.u32 %s10548_s27, 4  ;;  %s102_s28 = int_to_ptr.vmem [resolvable:$true] %s101_s28 }
  0x56   :  { %s10429_s29 = scalar_lea.vmem %s102_s28, 18432  ;;  %p10434_p8 = scmp.lt.s32.totalorder %s102_s28, %s102_s28 }
  0x57   :  { %p10430_p7 = scmp.ne.s32.totalorder %s102_s28, %s10429_s29  ;;  %p10435_p9 = scmp.lt.s32.totalorder %s10429_s29, %s10429_s29 }
  0x59   :  { %p10436_p10 = por %p10435_p9, %p10434_p8 }
  0x5b   :  { %p10437_p11 = pnand %p10436_p10, %p10430_p7 }
  0x5d   :  { %10440 = shalt.err (!%p10437_p11)
}
  0x5e   :  { %s10549_s2 = smov 192   ;;  %s10550_s3 = smov 12  }
  0x5f   :  { %107 = dma.hbm_to_vmem [thread:$0]  %s11276_s7, 18432, %s102_s28, [#allocation13], %s10549_s2, %s10549_s2, %s10550_s3  }
  0x60   :  { %s10551_s14 = smov [#allocation17]  }
  0x61   :  { %s126_s6 = sshll.u32 %s10551_s14, 4  ;;  %s127_s6 = int_to_ptr.vmem [resolvable:$true] %s126_s6 }
  0x62   :  { %s10449_s5 = scalar_lea.vmem %s127_s6, 16  ;;  %s10453_s15 = scalar_lea.vmem %s127_s6, 32 }
  0x63   :  { %p10450_p12 = scmp.ne.s32.totalorder %s127_s6, %s10449_s5  ;;  %p10454_p13 = scmp.lt.s32.totalorder %s127_s6, %s127_s6 }
  0x64   :  { %p10455_p0 = scmp.lt.s32.totalorder %s10453_s15, %s10449_s5 }
  0x66   :  { %p10456_p1 = por %p10455_p0, %p10454_p13 }
  0x68   :  { %p10457_p2 = pnand %p10456_p1, %p10450_p12 }
  0x6a   :  { %10460 = shalt.err (!%p10457_p2)
}
  0x6b   :  { %129 = dma.hbm_to_vmem [thread:$0]  %s11279_s10, 16, %s127_s6, [#allocation16]  }
  0x6c   :  { %10521 = dma.done.wait [#allocation4], 3072  }
  0x6d   :  { %10522 = vsyncadd [#allocation4], 4294964224 }
  0x6e   :  { %10523 = dma.done.wait [#allocation7], 23328  }
  0x6f   :  { %10524 = vsyncadd [#allocation7], 4294943968 }
  0x70   :  { %10525 = dma.done.wait [#allocation10], 69920  }
  0x71   :  { %10526 = vsyncadd [#allocation10], 4294897376 }
  0x72   :  { %10527 = dma.done.wait [#allocation13], 18528  }
  0x73   :  { %10528 = vsyncadd [#allocation13], 4294948768 }
  0x74   :  { %10529 = dma.done.wait [#allocation16], 64  }
  0x75   :  { %10530 = vsyncadd [#allocation16], 4294967232  ;;  %v8928_v1 = vld [vmem:[#allocation6 + $0x74] ss:$8 sps:$4 sm:$0xff]   ;;  %v8930_v2 = vld [vmem:[#allocation6 + $0x70] ss:$8 sps:$4 sm:$0xff]  }
  0x76   :  { %1420 = vmatprep.subr.bf16.mxu0 %v8928_v1  ;;  %v8931_v3 = vld [vmem:[#allocation6 + $0x174] ss:$8 sps:$4 sm:$0xff]   ;;  %v8933_v4 = vld [vmem:[#allocation6 + $0x170] ss:$8 sps:$4 sm:$0xff]   ;;  %v8934_v5 = vld [vmem:[#allocation6 + $0x64] ss:$8 sps:$4 sm:$0xff]  }
  0x77   :  { %1421 = vmatpush1.bf16.msra.mxu0 %v8930_v2  ;;  %v8936_v6 = vld [vmem:[#allocation6 + $0x60] ss:$8 sps:$4 sm:$0xff]   ;;  %1463 = vmatprep.subr.bf16.mxu1 %v8931_v3  ;;  %v8937_v7 = vld [vmem:[#allocation6 + $0x164] ss:$8 sps:$4 sm:$0xff]   ;;  %v8940_v9 = vld [vmem:[#allocation6 + $0x54] ss:$8 sps:$4 sm:$0xff]  }
  0x78   :  { %1464 = vmatpush1.bf16.msra.mxu1 %v8933_v4  ;;  %1422 = vmatprep.subr.bf16.mxu0 %v8934_v5  ;;  %v8939_v8 = vld [vmem:[#allocation6 + $0x160] ss:$8 sps:$4 sm:$0xff]   ;;  %v8942_v10 = vld [vmem:[#allocation6 + $0x50] ss:$8 sps:$4 sm:$0xff]   ;;  %v8943_v11 = vld [vmem:[#allocation6 + $0x154] ss:$8 sps:$4 sm:$0xff]  }
  0x79   :  { %1465 = vmatprep.subr.bf16.mxu1 %v8937_v7  ;;  %v8946_v12 = vld [vmem:[#allocation6 + $0x44] ss:$8 sps:$4 sm:$0xff]   ;;  %v8945_v13 = vld [vmem:[#allocation6 + $0x150] ss:$8 sps:$4 sm:$0xff]   ;;  %v8948_v15 = vld [vmem:[#allocation6 + $0x40] ss:$8 sps:$4 sm:$0xff]  }
  0x7a   :  { %v8949_v14 = vld [vmem:[#allocation6 + $0x144] ss:$8 sps:$4 sm:$0xff]   ;;  %v8952_v16 = vld [vmem:[#allocation6 + $0x34] ss:$8 sps:$4 sm:$0xff]   ;;  %v8951_v17 = vld [vmem:[#allocation6 + $0x140] ss:$8 sps:$4 sm:$0xff]  }
  0x7b   :  { %1423 = vmatpush1.bf16.msra.mxu0 %v8936_v6  ;;  %v8955_v18 = vld [vmem:[#allocation6 + $0x134] ss:$8 sps:$4 sm:$0xff]   ;;  %v8954_v19 = vld [vmem:[#allocation6 + $0x30] ss:$8 sps:$4 sm:$0xff]   ;;  %v8958_v20 = vld [vmem:[#allocation6 + $0x24] ss:$8 sps:$4 sm:$0xff]  }
  0x7c   :  { %1424 = vmatprep.subr.bf16.mxu0 %v8940_v9  ;;  %1466 = vmatpush1.bf16.msra.mxu1 %v8939_v8  ;;  %v8957_v21 = vld [vmem:[#allocation6 + $0x130] ss:$8 sps:$4 sm:$0xff]   ;;  %v8961_v22 = vld [vmem:[#allocation6 + $0x124] ss:$8 sps:$4 sm:$0xff]   ;;  %v8960_v23 = vld [vmem:[#allocation6 + $0x20] ss:$8 sps:$4 sm:$0xff]  }
  0x7d   :  { %1467 = vmatprep.subr.bf16.mxu1 %v8943_v11  ;;  %v8964_v24 = vld [vmem:[#allocation6 + $0x14] ss:$8 sps:$4 sm:$0xff]   ;;  %v8963_v25 = vld [vmem:[#allocation6 + $0x120] ss:$8 sps:$4 sm:$0xff]   ;;  %v8966_v27 = vld [vmem:[#allocation6 + $0x10] ss:$8 sps:$4 sm:$0xff]  }
  0x7e   :  { %v8967_v26 = vld [vmem:[#allocation6 + $0x114] ss:$8 sps:$4 sm:$0xff]   ;;  %v8970_v28 = vld [vmem:[#allocation6 + $0x4] ss:$8 sps:$4 sm:$0xff]   ;;  %v8969_v29 = vld [vmem:[#allocation6 + $0x110] ss:$8 sps:$4 sm:$0xff]  }
  0x7f   :  { %1425 = vmatpush1.bf16.msra.mxu0 %v8942_v10  ;;  %v8973_v30 = vld [vmem:[#allocation6 + $0x104] ss:$8 sps:$4 sm:$0xff]   ;;  %v8972_v31 = vld [vmem:[#allocation6] ss:$8 sps:$4 sm:$0xff]   ;;  %v8976_v32 = vld [vmem:[#allocation6 + $0xf4] ss:$8 sps:$4 sm:$0xff]  }
  0x80   :  { %1426 = vmatprep.subr.bf16.mxu0 %v8946_v12  ;;  %1468 = vmatpush1.bf16.msra.mxu1 %v8945_v13  ;;  %v8975_v33 = vld [vmem:[#allocation6 + $0x100] ss:$8 sps:$4 sm:$0xff]   ;;  %v8979_v34 = vld [vmem:[#allocation6 + $0x1f4] ss:$8 sps:$4 sm:$0xff]   ;;  %v8978_v35 = vld [vmem:[#allocation6 + $0xf0] ss:$8 sps:$4 sm:$0xff]  }
  0x81   :  { %1469 = vmatprep.subr.bf16.mxu1 %v8949_v14  ;;  %v8982_v36 = vld [vmem:[#allocation6 + $0xe4] ss:$8 sps:$4 sm:$0xff]   ;;  %v8981_v37 = vld [vmem:[#allocation6 + $0x1f0] ss:$8 sps:$4 sm:$0xff]   ;;  %v8984_v39 = vld [vmem:[#allocation6 + $0xe0] ss:$8 sps:$4 sm:$0xff]  }
  0x82   :  { %v8985_v38 = vld [vmem:[#allocation6 + $0x1e4] ss:$8 sps:$4 sm:$0xff]   ;;  %v8988_v40 = vld [vmem:[#allocation6 + $0xd4] ss:$8 sps:$4 sm:$0xff]   ;;  %v8987_v41 = vld [vmem:[#allocation6 + $0x1e0] ss:$8 sps:$4 sm:$0xff]  }
  0x83   :  { %1427 = vmatpush1.bf16.msra.mxu0 %v8948_v15  ;;  %v8991_v42 = vld [vmem:[#allocation6 + $0x1d4] ss:$8 sps:$4 sm:$0xff]   ;;  %v8990_v43 = vld [vmem:[#allocation6 + $0xd0] ss:$8 sps:$4 sm:$0xff]   ;;  %v8994_v44 = vld [vmem:[#allocation6 + $0xc4] ss:$8 sps:$4 sm:$0xff]  }
  0x84   :  { %1428 = vmatprep.subr.bf16.mxu0 %v8952_v16  ;;  %1470 = vmatpush1.bf16.msra.mxu1 %v8951_v17  ;;  %v8993_v45 = vld [vmem:[#allocation6 + $0x1d0] ss:$8 sps:$4 sm:$0xff]   ;;  %v8997_v46 = vld [vmem:[#allocation6 + $0x1c4] ss:$8 sps:$4 sm:$0xff]   ;;  %v8996_v48 = vld [vmem:[#allocation6 + $0xc0] ss:$8 sps:$4 sm:$0xff]  }
  0x85   :  { %1471 = vmatprep.subr.bf16.mxu1 %v8955_v18  ;;  %v159_v47 = vld [vmem:[#allocation3 + $0x8] sm:$0xff]  ;;  %v9000_v50 = vld [vmem:[#allocation6 + $0xb4] ss:$8 sps:$4 sm:$0xff]   ;;  %v9002_v56 = vld [vmem:[#allocation6 + $0xb0] ss:$8 sps:$4 sm:$0xff]   ;;  %vm192_vm0 = vcmask 375808  }
  0x86   :  { %v171_v49 = vld [vmem:[#allocation3 + $0x68] sm:$0xff]  ;;  %v161_v53 = vld [vmem:[#allocation3 + $0x18] sm:$0xff]  ;;  %v158_v6 = vld [vmem:[#allocation3] sm:$0xff]  ;;  %vm1413_vm1 = vcmask 1046528   ;;  %vm1730_vm4 = vcmask 1041409   ;;  %vm1733_vm5 = vcmask 58368  }
  0x87   :  { %1429 = vmatpush1.bf16.msra.mxu0 %v8954_v19  ;;  %v8738_v51 = vpack.c.bf16 %v171_v49, %v159_v47  ;;  %v8999_v52 = vld [vmem:[#allocation6 + $0x1c0] ss:$8 sps:$4 sm:$0xff]   ;;  %v9003_v54 = vld [vmem:[#allocation6 + $0x1b4] ss:$8 sps:$4 sm:$0xff]   ;;  %v9006_v58 = vld [vmem:[#allocation6 + $0xa4] ss:$8 sps:$4 sm:$0xff]  }
  0x88   :  { %1430 = vmatprep.subr.bf16.mxu0 %v8958_v20  ;;  %1472 = vmatpush1.bf16.msra.mxu1 %v8957_v21  ;;  %v173_v55 = vld [vmem:[#allocation3 + $0x78] sm:$0xff]  ;;  %v9009_v60 = vld [vmem:[#allocation6 + $0x1a4] ss:$8 sps:$4 sm:$0xff]   ;;  %v9008_v61 = vld [vmem:[#allocation6 + $0xa0] ss:$8 sps:$4 sm:$0xff]   ;;  %vm2153_vm6 = vcmask 1043459  }
  0x89   :  { %1473 = vmatprep.subr.bf16.mxu1 %v8961_v22  ;;  %1452 = vmatprep.mubr.bf16.mxu0 %v8738_v51  ;;  %v8740_v57 = vpack.c.bf16 %v173_v55, %v161_v53  ;;  %v9005_v59 = vld [vmem:[#allocation6 + $0x1b0] ss:$8 sps:$4 sm:$0xff]   ;;  %v9012_v62 = vld [vmem:[#allocation6 + $0x94] ss:$8 sps:$4 sm:$0xff]   ;;  %v9011_v63 = vld [vmem:[#allocation6 + $0x1a0] ss:$8 sps:$4 sm:$0xff]  }
  0x8a   :  { %v9015_v0 = vld [vmem:[#allocation6 + $0x194] ss:$8 sps:$4 sm:$0xff]   ;;  %v9014_v1 = vld [vmem:[#allocation6 + $0x90] ss:$8 sps:$4 sm:$0xff]   ;;  %v9018_v3 = vld [vmem:[#allocation6 + $0x84] ss:$8 sps:$4 sm:$0xff]  }
  0x8b   :  { %1431 = vmatpush1.bf16.msra.mxu0 %v8960_v23  ;;  %1495 = vmatprep.mubr.bf16.mxu1 %v8740_v57  ;;  %v9017_v2 = vld [vmem:[#allocation6 + $0x190] ss:$8 sps:$4 sm:$0xff]   ;;  %v9020_v4 = vld [vmem:[#allocation6 + $0x80] ss:$8 sps:$4 sm:$0xff]   ;;  %v9021_v5 = vld [vmem:[#allocation6 + $0x184] ss:$8 sps:$4 sm:$0xff]  }
  0x8c   :  { %1432 = vmatprep.subr.bf16.mxu0 %v8964_v24  ;;  %1474 = vmatpush1.bf16.msra.mxu1 %v8963_v25  ;;  %v170_v7 = vld [vmem:[#allocation3 + $0x60] sm:$0xff]  ;;  %v9026_v9 = vld [vmem:[#allocation6 + $0x274] ss:$8 sps:$4 sm:$0xff]   ;;  %v9024_v14 = vld [vmem:[#allocation6 + $0x270] ss:$8 sps:$4 sm:$0xff]   ;;  %vm2178_vm7 = vcmask 1041408  }
  0x8d   :  { %1475 = vmatprep.subr.bf16.mxu1 %v8967_v26  ;;  %v9023_v8 = vld [vmem:[#allocation6 + $0x180] ss:$8 sps:$4 sm:$0xff]   ;;  %v160_v10 = vld [vmem:[#allocation3 + $0x10] sm:$0xff]  ;;  %v8737_v12 = vpack.c.bf16 %v170_v7, %v158_v6  ;;  %v9032_v16 = vld [vmem:[#allocation6 + $0x264] ss:$8 sps:$4 sm:$0xff]   ;;  %vm2179_vm8 = vcmask 1043458  }
  0x8e   :  { %v172_v11 = vld [vmem:[#allocation3 + $0x70] sm:$0xff]  ;;  %v9035_v18 = vld [vmem:[#allocation6 + $0x364] ss:$8 sps:$4 sm:$0xff]   ;;  %v9030_v19 = vld [vmem:[#allocation6 + $0x260] ss:$8 sps:$4 sm:$0xff]   ;;  %vm2155_vm9 = vcmask 1045509  }
  0x8f   :  { %1433 = vmatpush1.bf16.msra.mxu0 %v8966_v27  ;;  %v9029_v13 = vld [vmem:[#allocation6 + $0x374] ss:$8 sps:$4 sm:$0xff]   ;;  %v8739_v15 = vpack.c.bf16 %v172_v11, %v160_v10  ;;  %v9027_v17 = vld [vmem:[#allocation6 + $0x370] ss:$8 sps:$4 sm:$0xff]   ;;  %v9033_v21 = vld [vmem:[#allocation6 + $0x360] ss:$8 sps:$4 sm:$0xff]  }
  0x90   :  { %1434 = vmatprep.subr.bf16.mxu0 %v8970_v28  ;;  %1476 = vmatpush1.bf16.msra.mxu1 %v8969_v29  ;;  %v9038_v20 = vld [vmem:[#allocation6 + $0x254] ss:$8 sps:$4 sm:$0xff]   ;;  %v9036_v23 = vld [vmem:[#allocation6 + $0x250] ss:$8 sps:$4 sm:$0xff]   ;;  %v9044_v24 = vld [vmem:[#allocation6 + $0x244] ss:$8 sps:$4 sm:$0xff]  }
  0x91   :  { %1477 = vmatprep.subr.bf16.mxu1 %v8973_v30  ;;  %v9041_v22 = vld [vmem:[#allocation6 + $0x354] ss:$8 sps:$4 sm:$0xff]   ;;  %v9039_v25 = vld [vmem:[#allocation6 + $0x350] ss:$8 sps:$4 sm:$0xff]   ;;  %v9047_v26 = vld [vmem:[#allocation6 + $0x344] ss:$8 sps:$4 sm:$0xff]  }
  0x92   :  { %v9042_v27 = vld [vmem:[#allocation6 + $0x240] ss:$8 sps:$4 sm:$0xff]   ;;  %v9050_v28 = vld [vmem:[#allocation6 + $0x234] ss:$8 sps:$4 sm:$0xff]   ;;  %v9072_v53 = vld [vmem:[#allocation6 + $0x2f0] ss:$8 sps:$4 sm:$0xff]  }
  0x93   :  { %1435 = vmatpush1.bf16.msra.mxu0 %v8972_v31  ;;  %v9045_v29 = vld [vmem:[#allocation6 + $0x340] ss:$8 sps:$4 sm:$0xff]   ;;  %v9053_v30 = vld [vmem:[#allocation6 + $0x334] ss:$8 sps:$4 sm:$0xff]   ;;  %v9048_v31 = vld [vmem:[#allocation6 + $0x230] ss:$8 sps:$4 sm:$0xff]  }
  0x94   :  { %1436 = vmatprep.subr.bf16.mxu0 %v8976_v32  ;;  %1478 = vmatpush1.bf16.msra.mxu1 %v8975_v33  ;;  %v9056_v32 = vld [vmem:[#allocation6 + $0x224] ss:$8 sps:$4 sm:$0xff]   ;;  %v9051_v33 = vld [vmem:[#allocation6 + $0x330] ss:$8 sps:$4 sm:$0xff]   ;;  %v9066_v47 = vld [vmem:[#allocation6 + $0x200] ss:$8 sps:$4 sm:$0xff]  }
  0x95   :  { %1479 = vmatprep.subr.bf16.mxu1 %v8979_v34  ;;  %v9059_v34 = vld [vmem:[#allocation6 + $0x324] ss:$8 sps:$4 sm:$0xff]   ;;  %v9074_v49 = vld [vmem:[#allocation6 + $0x2f4] ss:$8 sps:$4 sm:$0xff]   ;;  %v9069_v51 = vld [vmem:[#allocation6 + $0x300] ss:$8 sps:$4 sm:$0xff]  }
  0x96   :  { %v9075_v55 = vld [vmem:[#allocation6 + $0x3f0] ss:$8 sps:$4 sm:$0xff]   ;;  %v9078_v57 = vld [vmem:[#allocation6 + $0x2e0] ss:$8 sps:$4 sm:$0xff]   ;;  %v9104_v6 = vld [vmem:[#allocation6 + $0x2a4] ss:$8 sps:$4 sm:$0xff]  }
  0x97   :  { %1437 = vmatpush2.bf16.msra.mxu0 %v8978_v35  ;;  %v9054_v35 = vld [vmem:[#allocation6 + $0x220] ss:$8 sps:$4 sm:$0xff]   ;;  %v9099_v7 = vld [vmem:[#allocation6 + $0x3b0] ss:$8 sps:$4 sm:$0xff]   ;;  %v9110_v10 = vld [vmem:[#allocation6 + $0x294] ss:$8 sps:$4 sm:$0xff]  }
  0x98   :  { %1438 = vmatprep.subr.bf16.mxu0 %v8982_v36  ;;  %1480 = vmatpush2.bf16.msra.mxu1 %v8981_v37  ;;  %v9062_v36 = vld [vmem:[#allocation6 + $0x214] ss:$8 sps:$4 sm:$0xff]   ;;  %v9057_v37 = vld [vmem:[#allocation6 + $0x320] ss:$8 sps:$4 sm:$0xff]   ;;  %vm2157_vm10 = vcmask 1047559   ;;  %vm10925_vm11 = vmor %vm2179_vm8, %vm2178_vm7  ;;  %vm2181_vm12 = vcmask 1045508  }
  0x99   :  { %1481 = vmatprep.subr.bf16.mxu1 %v8985_v38  ;;  %v9065_v38 = vld [vmem:[#allocation6 + $0x314] ss:$8 sps:$4 sm:$0xff]   ;;  %v9105_v11 = vld [vmem:[#allocation6 + $0x3a0] ss:$8 sps:$4 sm:$0xff]   ;;  %vm2182_vm13 = vmor %vm2181_vm12, %vm10925_vm11  ;;  %vm2183_vm14 = vcmask 375814   ;;  %s10557_s29 = smov [#allocation18]  }
  0x9a   :  { %vm2184_vm15 = vmor %vm2183_vm14, %vm2182_vm13  ;;  %s7803_s2 = sshll.u32 %s10557_s29, 4  ;;  %s7804_s2 = int_to_ptr.vmem [resolvable:$true] %s7803_s2 }
  0x9b   :  { %1439 = vmatpush2.bf16.msra.mxu0 %v8984_v39  ;;  %v9060_v39 = vld [vmem:[#allocation6 + $0x210] ss:$8 sps:$4 sm:$0xff]  }
  0x9c   :  { %1440 = vmatprep.subr.bf16.mxu0 %v8988_v40  ;;  %1482 = vmatpush2.bf16.msra.mxu1 %v8987_v41  ;;  %v9063_v40 = vld [vmem:[#allocation6 + $0x310] ss:$8 sps:$4 sm:$0xff]   ;;  %v9068_v41 = vld [vmem:[#allocation6 + $0x204] ss:$8 sps:$4 sm:$0xff]  }
  0x9d   :  { %1483 = vmatprep.subr.bf16.mxu1 %v8991_v42  ;;  %v163_v42 = vld [vmem:[#allocation3 + $0x28] sm:$0xff] }
  0x9f   :  { %1441 = vmatpush2.bf16.msra.mxu0 %v8990_v43  ;;  %v175_v43 = vld [vmem:[#allocation3 + $0x88] sm:$0xff] }
  0xa0   :  { %1442 = vmatprep.subr.bf16.mxu0 %v8994_v44  ;;  %1484 = vmatpush2.bf16.msra.mxu1 %v8993_v45  ;;  %v9071_v44 = vld [vmem:[#allocation6 + $0x304] ss:$8 sps:$4 sm:$0xff]   ;;  %v8742_v45 = vpack.c.bf16 %v175_v43, %v163_v42  ;;  %v9147_v43 = vld [vmem:[#allocation6 + $0x550] ss:$8 sps:$4 sm:$0xff]  }
  0xa1   :  { %1485 = vmatprep.subr.bf16.mxu1 %v8997_v46  ;;  %v165_v46 = vld [vmem:[#allocation3 + $0x38] sm:$0xff]  ;;  %v9131_v42 = vld [vmem:[#allocation6 + $0x444] ss:$8 sps:$4 sm:$0xff]  }
  0xa3   :  { %1443 = vmatpush2.bf16.msra.mxu0 %v8996_v48  ;;  %v177_v48 = vld [vmem:[#allocation3 + $0x98] sm:$0xff] }
  0xa4   :  { %1444 = vmatprep.subr.bf16.mxu0 %v9000_v50  ;;  %1486 = vmatpush2.bf16.msra.mxu1 %v8999_v52  ;;  %v8744_v50 = vpack.c.bf16 %v177_v48, %v165_v46  ;;  %v9077_v52 = vld [vmem:[#allocation6 + $0x3f4] ss:$8 sps:$4 sm:$0xff]  }
  0xa5   :  { %1487 = vmatprep.subr.bf16.mxu1 %v9003_v54  ;;  %v9080_v54 = vld [vmem:[#allocation6 + $0x2e4] ss:$8 sps:$4 sm:$0xff]   ;;  %v9134_v46 = vld [vmem:[#allocation6 + $0x434] ss:$8 sps:$4 sm:$0xff]  }
  0xa6   :  { %v9161_v48 = vld [vmem:[#allocation6 + $0x534] ss:$8 sps:$4 sm:$0xff]  }
  0xa7   :  { %1445 = vmatpush2.bf16.msra.mxu0 %v9002_v56  ;;  %v9083_v56 = vld [vmem:[#allocation6 + $0x3e4] ss:$8 sps:$4 sm:$0xff]  }
  0xa8   :  { %1446 = vmatprep.subr.bf16.mxu0 %v9006_v58  ;;  %1488 = vmatpush2.bf16.msra.mxu1 %v9005_v59  ;;  %v9086_v58 = vld [vmem:[#allocation6 + $0x2d4] ss:$8 sps:$4 sm:$0xff]   ;;  %v9081_v59 = vld [vmem:[#allocation6 + $0x3e0] ss:$8 sps:$4 sm:$0xff]  }
  0xa9   :  { %1489 = vmatprep.subr.bf16.mxu1 %v9009_v60  ;;  %v9089_v60 = vld [vmem:[#allocation6 + $0x3d4] ss:$8 sps:$4 sm:$0xff]  }
  0xab   :  { %1447 = vmatpush2.bf16.msra.mxu0 %v9008_v61  ;;  %v9084_v61 = vld [vmem:[#allocation6 + $0x2d0] ss:$8 sps:$4 sm:$0xff]  }
  0xac   :  { %1448 = vmatprep.subr.bf16.mxu0 %v9012_v62  ;;  %1490 = vmatpush2.bf16.msra.mxu1 %v9011_v63  ;;  %v9092_v62 = vld [vmem:[#allocation6 + $0x2c4] ss:$8 sps:$4 sm:$0xff]   ;;  %v9087_v63 = vld [vmem:[#allocation6 + $0x3d0] ss:$8 sps:$4 sm:$0xff]  }
  0xad   :  { %1491 = vmatprep.subr.bf16.mxu1 %v9015_v0  ;;  %v9095_v0 = vld [vmem:[#allocation6 + $0x3c4] ss:$8 sps:$4 sm:$0xff]  }
  0xaf   :  { %1449 = vmatpush2.bf16.msra.mxu0 %v9014_v1  ;;  %v9090_v1 = vld [vmem:[#allocation6 + $0x2c0] ss:$8 sps:$4 sm:$0xff]  }
  0xb0   :  { %1450 = vmatprep.subr.bf16.mxu0 %v9018_v3  ;;  %1492 = vmatpush2.bf16.msra.mxu1 %v9017_v2  ;;  %v9098_v2 = vld [vmem:[#allocation6 + $0x2b4] ss:$8 sps:$4 sm:$0xff]   ;;  %v9093_v3 = vld [vmem:[#allocation6 + $0x3c0] ss:$8 sps:$4 sm:$0xff]  }
  0xb1   :  { %1493 = vmatprep.subr.bf16.mxu1 %v9021_v5  ;;  %v9096_v5 = vld [vmem:[#allocation6 + $0x2b0] ss:$8 sps:$4 sm:$0xff]  }
  0xb3   :  { %1451 = vmatpush2.bf16.msra.mxu0 %v9020_v4  ;;  %v9101_v4 = vld [vmem:[#allocation6 + $0x3b4] ss:$8 sps:$4 sm:$0xff]  }
  0xb4   :  { %1506 = vmatprep.subr.bf16.mxu0 %v9026_v9  ;;  %1494 = vmatpush2.bf16.msra.mxu1 %v9023_v8  ;;  %v9107_v8 = vld [vmem:[#allocation6 + $0x3a4] ss:$8 sps:$4 sm:$0xff]   ;;  %v9102_v9 = vld [vmem:[#allocation6 + $0x2a0] ss:$8 sps:$4 sm:$0xff]  }
  0xb5   :  { %1549 = vmatprep.subr.bf16.mxu1 %v9029_v13  ;;  %v9108_v13 = vld [vmem:[#allocation6 + $0x290] ss:$8 sps:$4 sm:$0xff]  }
  0xb6   :  { %1453 = vmatmul.mubr.bf16.vlgmr.msra.gmra.mxu0 %v8737_v12  ;;  %v9113_v12 = vld [vmem:[#allocation6 + $0x394] ss:$8 sps:$4 sm:$0xff]  }
  0xb7   :  { %1507 = vmatpush1.bf16.msra.mxu0 %v9024_v14  ;;  %1496 = vmatmul.mubr.bf16.vlgmr.msra.gmra.mxu1 %v8739_v15  ;;  %v9116_v14 = vld [vmem:[#allocation6 + $0x284] ss:$8 sps:$4 sm:$0xff]  }
  0xb8   :  { %1508 = vmatprep.subr.bf16.mxu0 %v9032_v16  ;;  %1550 = vmatpush1.bf16.msra.mxu1 %v9027_v17  ;;  %v162_v15 = vld [vmem:[#allocation3 + $0x20] sm:$0xff]  ;;  %v9111_v17 = vld [vmem:[#allocation6 + $0x390] ss:$8 sps:$4 sm:$0xff]  }
  0xb9   :  { %1551 = vmatprep.subr.bf16.mxu1 %v9035_v18  ;;  %1538 = vmatprep.mubr.bf16.mxu0 %v8742_v45  ;;  %v174_v16 = vld [vmem:[#allocation3 + $0x80] sm:$0xff] }
  0xba   :  { %1581 = vmatprep.mubr.bf16.mxu1 %v8744_v50  ;;  %v9114_v18 = vld [vmem:[#allocation6 + $0x280] ss:$8 sps:$4 sm:$0xff]   ;;  %v9140_v50 = vld [vmem:[#allocation6 + $0x424] ss:$8 sps:$4 sm:$0xff]  }
  0xbb   :  { %1509 = vmatpush1.bf16.msra.mxu0 %v9030_v19  ;;  %v9119_v19 = vld [vmem:[#allocation6 + $0x384] ss:$8 sps:$4 sm:$0xff]   ;;  %v9129_v45 = vld [vmem:[#allocation6 + $0x440] ss:$8 sps:$4 sm:$0xff]  }
  0xbc   :  { %1510 = vmatprep.subr.bf16.mxu0 %v9038_v20  ;;  %1552 = vmatpush1.bf16.msra.mxu1 %v9033_v21  ;;  %v9117_v20 = vld [vmem:[#allocation6 + $0x380] ss:$8 sps:$4 sm:$0xff]   ;;  %v9122_v21 = vld [vmem:[#allocation6 + $0x474] ss:$8 sps:$4 sm:$0xff]  }
  0xbd   :  { %1553 = vmatprep.subr.bf16.mxu1 %v9041_v22  ;;  %v176_v22 = vld [vmem:[#allocation3 + $0x90] sm:$0xff] }
  0xbf   :  { %1511 = vmatpush1.bf16.msra.mxu0 %v9036_v23  ;;  %v164_v23 = vld [vmem:[#allocation3 + $0x30] sm:$0xff] }
  0xc0   :  { %1512 = vmatprep.subr.bf16.mxu0 %v9044_v24  ;;  %1554 = vmatpush1.bf16.msra.mxu1 %v9039_v25  ;;  %v9137_v24 = vld [vmem:[#allocation6 + $0x574] ss:$8 sps:$4 sm:$0xff]  }
  0xc1   :  { %1555 = vmatprep.subr.bf16.mxu1 %v9047_v26  ;;  %v169_v25 = vld [vmem:[#allocation3 + $0x58] sm:$0xff]  ;;  %v8741_v26 = vpack.c.bf16 %v174_v16, %v162_v15  ;;  %v9174_v15 = vld [vmem:[#allocation6 + $0x4c0] ss:$8 sps:$4 sm:$0xff]  }
  0xc2   :  { %v9182_v16 = vld [vmem:[#allocation6 + $0x4b4] ss:$8 sps:$4 sm:$0xff]  }
  0xc3   :  { %1513 = vmatpush1.bf16.msra.mxu0 %v9042_v27  ;;  %v181_v27 = vld [vmem:[#allocation3 + $0xb8] sm:$0xff] }
  0xc4   :  { %1514 = vmatprep.subr.bf16.mxu0 %v9050_v28  ;;  %1556 = vmatpush1.bf16.msra.mxu1 %v9045_v29  ;;  %v9120_v28 = vld [vmem:[#allocation6 + $0x470] ss:$8 sps:$4 sm:$0xff]   ;;  %v8743_v29 = vpack.c.bf16 %v176_v22, %v164_v23  ;;  %v9200_v23 = vld [vmem:[#allocation6 + $0x484] ss:$8 sps:$4 sm:$0xff]  }
  0xc5   :  { %1557 = vmatprep.subr.bf16.mxu1 %v9053_v30  ;;  %v9125_v30 = vld [vmem:[#allocation6 + $0x464] ss:$8 sps:$4 sm:$0xff]   ;;  %v9192_v22 = vld [vmem:[#allocation6 + $0x490] ss:$8 sps:$4 sm:$0xff]  }
  0xc7   :  { %1515 = vmatpush1.bf16.msra.mxu0 %v9048_v31  ;;  %v167_v31 = vld [vmem:[#allocation3 + $0x48] sm:$0xff] }
  0xc8   :  { %1516 = vmatprep.subr.bf16.mxu0 %v9056_v32  ;;  %1558 = vmatpush1.bf16.msra.mxu1 %v9051_v33  ;;  %v179_v32 = vld [vmem:[#allocation3 + $0xa8] sm:$0xff] }
  0xc9   :  { %1559 = vmatprep.subr.bf16.mxu1 %v9059_v34  ;;  %v9123_v33 = vld [vmem:[#allocation6 + $0x460] ss:$8 sps:$4 sm:$0xff]   ;;  %v9135_v34 = vld [vmem:[#allocation6 + $0x570] ss:$8 sps:$4 sm:$0xff]  }
  0xcb   :  { %1517 = vmatpush1.bf16.msra.mxu0 %v9054_v35  ;;  %v9143_v35 = vld [vmem:[#allocation6 + $0x564] ss:$8 sps:$4 sm:$0xff]  }
  0xcc   :  { %1518 = vmatprep.subr.bf16.mxu0 %v9062_v36  ;;  %1560 = vmatpush1.bf16.msra.mxu1 %v9057_v37  ;;  %v8748_v36 = vpack.c.bf16 %v181_v27, %v169_v25  ;;  %v8746_v37 = vpack.c.bf16 %v179_v32, %v167_v31  ;;  %v166_v25 = vld [vmem:[#allocation3 + $0x40] sm:$0xff]  ;;  %v10238_v31 = vld [vmem:[#allocation3 + $0x8] sm:$0xff] }
  0xcd   :  { %1561 = vmatprep.subr.bf16.mxu1 %v9065_v38  ;;  %v9128_v38 = vld [vmem:[#allocation6 + $0x454] ss:$8 sps:$4 sm:$0xff]   ;;  %v10239_v32 = vld [vmem:[#allocation3] sm:$0xff] }
  0xcf   :  { %1519 = vmatpush1.bf16.msra.mxu0 %v9060_v39  ;;  %v9141_v39 = vld [vmem:[#allocation6 + $0x560] ss:$8 sps:$4 sm:$0xff]  }
  0xd0   :  { %1520 = vmatprep.subr.bf16.mxu0 %v9068_v41  ;;  %1562 = vmatpush1.bf16.msra.mxu1 %v9063_v40  ;;  %v9149_v40 = vld [vmem:[#allocation6 + $0x554] ss:$8 sps:$4 sm:$0xff]   ;;  %v9126_v41 = vld [vmem:[#allocation6 + $0x450] ss:$8 sps:$4 sm:$0xff]  }
  0xd1   :  { %1563 = vmatprep.subr.bf16.mxu1 %v9071_v44  ;;  %v9155_v44 = vld [vmem:[#allocation6 + $0x544] ss:$8 sps:$4 sm:$0xff]  }
  0xd3   :  { %1521 = vmatpush1.bf16.msra.mxu0 %v9066_v47  ;;  %v9153_v47 = vld [vmem:[#allocation6 + $0x540] ss:$8 sps:$4 sm:$0xff]  }
  0xd4   :  { %1522 = vmatprep.subr.bf16.mxu0 %v9074_v49  ;;  %1564 = vmatpush1.bf16.msra.mxu1 %v9069_v51  ;;  %v9132_v49 = vld [vmem:[#allocation6 + $0x430] ss:$8 sps:$4 sm:$0xff]  }
  0xd5   :  { %1565 = vmatprep.subr.bf16.mxu1 %v9077_v52  ;;  %v9159_v51 = vld [vmem:[#allocation6 + $0x530] ss:$8 sps:$4 sm:$0xff]   ;;  %v9167_v52 = vld [vmem:[#allocation6 + $0x524] ss:$8 sps:$4 sm:$0xff]  }
  0xd7   :  { %1523 = vmatpush2.bf16.msra.mxu0 %v9072_v53  ;;  %v9138_v53 = vld [vmem:[#allocation6 + $0x420] ss:$8 sps:$4 sm:$0xff]  }
  0xd8   :  { %1524 = vmatprep.subr.bf16.mxu0 %v9080_v54  ;;  %1566 = vmatpush2.bf16.msra.mxu1 %v9075_v55  ;;  %v9146_v54 = vld [vmem:[#allocation6 + $0x414] ss:$8 sps:$4 sm:$0xff]   ;;  %v9165_v55 = vld [vmem:[#allocation6 + $0x520] ss:$8 sps:$4 sm:$0xff]  }
  0xd9   :  { %1567 = vmatprep.subr.bf16.mxu1 %v9083_v56  ;;  %v9173_v56 = vld [vmem:[#allocation6 + $0x514] ss:$8 sps:$4 sm:$0xff]  }
  0xdb   :  { %1525 = vmatpush2.bf16.msra.mxu0 %v9078_v57  ;;  %v9144_v57 = vld [vmem:[#allocation6 + $0x410] ss:$8 sps:$4 sm:$0xff]  }
  0xdc   :  { %1526 = vmatprep.subr.bf16.mxu0 %v9086_v58  ;;  %1568 = vmatpush2.bf16.msra.mxu1 %v9081_v59  ;;  %v9152_v58 = vld [vmem:[#allocation6 + $0x404] ss:$8 sps:$4 sm:$0xff]   ;;  %v9171_v59 = vld [vmem:[#allocation6 + $0x510] ss:$8 sps:$4 sm:$0xff]  }
  0xdd   :  { %1569 = vmatprep.subr.bf16.mxu1 %v9089_v60  ;;  %v9179_v60 = vld [vmem:[#allocation6 + $0x504] ss:$8 sps:$4 sm:$0xff]  }
  0xdf   :  { %1527 = vmatpush2.bf16.msra.mxu0 %v9084_v61  ;;  %v9150_v61 = vld [vmem:[#allocation6 + $0x400] ss:$8 sps:$4 sm:$0xff]  }
  0xe0   :  { %1528 = vmatprep.subr.bf16.mxu0 %v9092_v62  ;;  %1570 = vmatpush2.bf16.msra.mxu1 %v9087_v63  ;;  %v9158_v62 = vld [vmem:[#allocation6 + $0x4f4] ss:$8 sps:$4 sm:$0xff]   ;;  %v9177_v63 = vld [vmem:[#allocation6 + $0x500] ss:$8 sps:$4 sm:$0xff]  }
  0xe1   :  { %1571 = vmatprep.subr.bf16.mxu1 %v9095_v0  ;;  %v9183_v0 = vld [vmem:[#allocation6 + $0x5a4] ss:$8 sps:$4 sm:$0x7f]  }
  0xe3   :  { %1529 = vmatpush2.bf16.msra.mxu0 %v9090_v1  ;;  %v9185_v1 = vld [vmem:[#allocation6 + $0x5a0] ss:$8 sps:$4 sm:$0x7f]  }
  0xe4   :  { %1530 = vmatprep.subr.bf16.mxu0 %v9098_v2  ;;  %1572 = vmatpush2.bf16.msra.mxu1 %v9093_v3  ;;  %v9156_v2 = vld [vmem:[#allocation6 + $0x4f0] ss:$8 sps:$4 sm:$0xff]   ;;  %v9164_v3 = vld [vmem:[#allocation6 + $0x4e4] ss:$8 sps:$4 sm:$0xff]  }
  0xe5   :  { %1573 = vmatprep.subr.bf16.mxu1 %v9101_v4  ;;  %v9191_v4 = vld [vmem:[#allocation6 + $0x594] ss:$8 sps:$4 sm:$0xff]  }
  0xe7   :  { %1531 = vmatpush2.bf16.msra.mxu0 %v9096_v5  ;;  %v9162_v5 = vld [vmem:[#allocation6 + $0x4e0] ss:$8 sps:$4 sm:$0xff]  }
  0xe8   :  { %1532 = vmatprep.subr.bf16.mxu0 %v9104_v6  ;;  %1574 = vmatpush2.bf16.msra.mxu1 %v9099_v7  ;;  %v9170_v6 = vld [vmem:[#allocation6 + $0x4d4] ss:$8 sps:$4 sm:$0xff]   ;;  %v1415_v7 = vsel %vm1413_vm1, %v9185_v1, 0  ;;  %v10552_v1 = vmov 0  }
  0xe9   :  { %1575 = vmatprep.subr.bf16.mxu1 %v9107_v8  ;;  %v9189_v8 = vld [vmem:[#allocation6 + $0x590] ss:$8 sps:$4 sm:$0xff]   ;;  %8926 = vset.pattern.permute.xlu0 %v10552_v1 }
  0xea   :  { %8927 = vset.pattern.permute.xlu1 %v10552_v1 }
  0xeb   :  { %1533 = vmatpush2.bf16.msra.mxu0 %v9102_v9  ;;  %v9197_v9 = vld [vmem:[#allocation6 + $0x584] ss:$8 sps:$4 sm:$0xff]  }
  0xec   :  { %1534 = vmatprep.subr.bf16.mxu0 %v9110_v10  ;;  %1576 = vmatpush2.bf16.msra.mxu1 %v9105_v11  ;;  %v9168_v10 = vld [vmem:[#allocation6 + $0x4d0] ss:$8 sps:$4 sm:$0xff]   ;;  %v9176_v11 = vld [vmem:[#allocation6 + $0x4c4] ss:$8 sps:$4 sm:$0xff]  }
  0xed   :  { %1577 = vmatprep.subr.bf16.mxu1 %v9113_v12  ;;  %v9195_v12 = vld [vmem:[#allocation6 + $0x580] ss:$8 sps:$4 sm:$0xff]  }
  0xef   :  { %1535 = vmatpush2.bf16.msra.mxu0 %v9108_v13  ;;  %v10662_v13 = vld [vmem:[#allocation3 + $0x50] sm:$0xff] }
  0xf0   :  { %1536 = vmatprep.subr.bf16.mxu0 %v9116_v14  ;;  %1578 = vmatpush2.bf16.msra.mxu1 %v9111_v17  ;;  %v10664_v14 = vld [vmem:[#allocation3 + $0xb0] sm:$0xff] }
  0xf1   :  { %1579 = vmatprep.subr.bf16.mxu1 %v9119_v19  ;;  %v8747_v17 = vpack.c.bf16 %v10664_v14, %v10662_v13  ;;  %v9188_v19 = vld [vmem:[#allocation6 + $0x4a4] ss:$8 sps:$4 sm:$0xff]  }
  0xf3   :  { %1537 = vmatpush2.bf16.msra.mxu0 %v9114_v18  ;;  %v9180_v18 = vld [vmem:[#allocation6 + $0x4b0] ss:$8 sps:$4 sm:$0xff]  }
  0xf4   :  { %1592 = vmatprep.subr.bf16.mxu0 %v9122_v21  ;;  %1580 = vmatpush2.bf16.msra.mxu1 %v9117_v20  ;;  %v9186_v20 = vld [vmem:[#allocation6 + $0x4a0] ss:$8 sps:$4 sm:$0xff]   ;;  %v9194_v21 = vld [vmem:[#allocation6 + $0x494] ss:$8 sps:$4 sm:$0xff]  }
  0xf5   :  { %1635 = vmatprep.subr.bf16.mxu1 %v9137_v24  ;;  %v9198_v24 = vld [vmem:[#allocation6 + $0x480] ss:$8 sps:$4 sm:$0xff]  }
  0xf6   :  { %1539 = vmatmul.mubr.bf16.vlgmr.msra.gmra.mxu0 %v8741_v26  ;;  %v178_v26 = vld [vmem:[#allocation3 + $0xa0] sm:$0xff] }
  0xf7   :  { %1593 = vmatpush1.bf16.msra.mxu0 %v9120_v28  ;;  %1624 = vmatprep.mubr.bf16.mxu0 %v8746_v37  ;;  %v8745_v27 = vpack.c.bf16 %v178_v26, %v166_v25  ;;  %v10236_v28 = vld [vmem:[#allocation3 + $0x68] sm:$0xff] }
  0xf8   :  { %1582 = vmatmul.mubr.bf16.vlgmr.msra.gmra.mxu1 %v8743_v29  ;;  %1594 = vmatprep.subr.bf16.mxu0 %v9125_v30  ;;  %v10237_v29 = vld [vmem:[#allocation3 + $0x60] sm:$0xff] }
  0xf9   :  { %1636 = vmatpush1.bf16.msra.mxu1 %v9135_v34  ;;  %8038 = vmatprep.mubr.msk.bf16.mxu1 %vm192_vm0, %v8748_v36  ;;  %v197_v30 = vadd.f32 %v10237_v29, %v10236_v28  ;;  %v10240_v34 = vld [vmem:[#allocation3 + $0x70] sm:$0xff] }
  0xfa   :  { %1637 = vmatprep.subr.bf16.mxu1 %v9143_v35  ;;  %v10241_v36 = vld [vmem:[#allocation3 + $0x10] sm:$0xff] }
  0xfb   :  { %1595 = vmatpush1.bf16.msra.mxu0 %v9123_v33  ;;  %v182_v33 = vadd.f32 %v10239_v32, %v10238_v31  ;;  %v198_v35 = vadd.f32 %v10240_v34, %v197_v30 }
  0xfc   :  { %1596 = vmatprep.subr.bf16.mxu0 %v9128_v38  ;;  %v10242_v38 = vld [vmem:[#allocation3 + $0x78] sm:$0xff] }
  0xfd   :  { %1638 = vmatpush1.bf16.msra.mxu1 %v9141_v39  ;;  %v183_v37 = vadd.f32 %v10241_v36, %v182_v33  ;;  %v199_v39 = vadd.f32 %v10242_v38, %v198_v35 }
  0xfe   :  { %1639 = vmatprep.subr.bf16.mxu1 %v9149_v40  ;;  %v10243_v40 = vld [vmem:[#allocation3 + $0x18] sm:$0xff] }
  0xff   :  { %1597 = vmatpush1.bf16.msra.mxu0 %v9126_v41  ;;  %v184_v41 = vadd.f32 %v10243_v40, %v183_v37 }
 0x100   :  { %1598 = vmatprep.subr.bf16.mxu0 %v9131_v42  ;;  %v10244_v42 = vld [vmem:[#allocation3 + $0x80] sm:$0xff] }
 0x101   :  { %1640 = vmatpush1.bf16.msra.mxu1 %v9147_v43  ;;  %v200_v43 = vadd.f32 %v10244_v42, %v199_v39 }
 0x102   :  { %1641 = vmatprep.subr.bf16.mxu1 %v9155_v44  ;;  %v10245_v44 = vld [vmem:[#allocation3 + $0x20] sm:$0xff] }
 0x103   :  { %1599 = vmatpush1.bf16.msra.mxu0 %v9129_v45  ;;  %v185_v45 = vadd.f32 %v10245_v44, %v184_v41 }
 0x104   :  { %1600 = vmatprep.subr.bf16.mxu0 %v9134_v46  ;;  %v10246_v46 = vld [vmem:[#allocation3 + $0x88] sm:$0xff] }
 0x105   :  { %1642 = vmatpush1.bf16.msra.mxu1 %v9153_v47  ;;  %v201_v47 = vadd.f32 %v10246_v46, %v200_v43 }
 0x106   :  { %1643 = vmatprep.subr.bf16.mxu1 %v9161_v48  ;;  %v10247_v48 = vld [vmem:[#allocation3 + $0x28] sm:$0xff] }
 0x107   :  { %1601 = vmatpush1.bf16.msra.mxu0 %v9132_v49  ;;  %v186_v49 = vadd.f32 %v10247_v48, %v185_v45 }
 0x108   :  { %1602 = vmatprep.subr.bf16.mxu0 %v9140_v50  ;;  %v10248_v50 = vld [vmem:[#allocation3 + $0x90] sm:$0xff] }
 0x109   :  { %1644 = vmatpush1.bf16.msra.mxu1 %v9159_v51  ;;  %v202_v51 = vadd.f32 %v10248_v50, %v201_v47 }
 0x10a   :  { %1645 = vmatprep.subr.bf16.mxu1 %v9167_v52  ;;  %v10249_v52 = vld [vmem:[#allocation3 + $0x30] sm:$0xff] }
 0x10b   :  { %1603 = vmatpush1.bf16.msra.mxu0 %v9138_v53  ;;  %v187_v53 = vadd.f32 %v10249_v52, %v186_v49 }
 0x10c   :  { %1604 = vmatprep.subr.bf16.mxu0 %v9146_v54  ;;  %v10250_v54 = vld [vmem:[#allocation3 + $0x38] sm:$0xff] }
 0x10d   :  { %1646 = vmatpush1.bf16.msra.mxu1 %v9165_v55  ;;  %v188_v55 = vadd.f32 %v10250_v54, %v187_v53 }
 0x10e   :  { %1647 = vmatprep.subr.bf16.mxu1 %v9173_v56  ;;  %v10251_v56 = vld [vmem:[#allocation3 + $0x98] sm:$0xff] }
 0x10f   :  { %1605 = vmatpush1.bf16.msra.mxu0 %v9144_v57  ;;  %v203_v57 = vadd.f32 %v10251_v56, %v202_v51 }
 0x110   :  { %1606 = vmatprep.subr.bf16.mxu0 %v9152_v58  ;;  %v189_v58 = vadd.f32 %v188_v55, %v166_v25 }
 0x111   :  { %1648 = vmatpush1.bf16.msra.mxu1 %v9171_v59  ;;  %v10252_v59 = vld [vmem:[#allocation3 + $0x48] sm:$0xff] }
 0x112   :  { %1649 = vmatprep.subr.bf16.mxu1 %v9179_v60  ;;  %v190_v60 = vadd.f32 %v10252_v59, %v189_v58 }
 0x113   :  { %1607 = vmatpush1.bf16.msra.mxu0 %v9150_v61  ;;  %v10253_v61 = vld [vmem:[#allocation3 + $0x58] sm:$0xff] }
 0x114   :  { %1608 = vmatprep.subr.bf16.mxu0 %v9158_v62  ;;  %v193_v62 = vsel %vm192_vm0, %v10253_v61, 0.0 }
 0x115   :  { %1650 = vmatpush1.bf16.msra.mxu1 %v9177_v63  ;;  %v204_v63 = vadd.f32 %v203_v57, %v178_v26 }
 0x116   :  { %8037 = vmatprep.subr.msk.bf16.mxu1 %vm1413_vm1, %v9183_v0  ;;  %v191_v0 = vadd.f32 %v190_v60, %v10662_v13 }
 0x117   :  { %1609 = vmatpush2.bf16.msra.mxu0 %v9156_v2  ;;  %v10254_v2 = vld [vmem:[#allocation3 + $0xa8] sm:$0xff] }
 0x118   :  { %1610 = vmatprep.subr.bf16.mxu0 %v9164_v3  ;;  %v205_v3 = vadd.f32 %v10254_v2, %v204_v63 }
 0x119   :  { %1662 = vmatpush2.bf16.msra.mxu1 %v1415_v7 }
 0x11a   :  { %1663 = vmatprep.subr.bf16.mxu1 %v9191_v4  ;;  %v194_v4 = vadd.f32 %v193_v62, %v191_v0  ;;  %v206_v7 = vadd.f32 %v205_v3, %v10664_v14  ;;  %v1682_v0 = vld [vmem:[#allocation9] sm:$0x3] }
 0x11b   :  { %1611 = vmatpush2.bf16.msra.mxu0 %v9162_v5  ;;  %v10255_v5 = vld [vmem:[#allocation3 + $0xb8] sm:$0xff] }
 0x11c   :  { %1612 = vmatprep.subr.bf16.mxu0 %v9170_v6  ;;  %v207_v6 = vsel %vm192_vm0, %v10255_v5, 0.0  ;;  %195 = vadd.xlane.f32.xlu1 %v194_v4 }
 0x11d   :  { %1664 = vmatpush2.bf16.msra.mxu1 %v9189_v8  ;;  %v208_v8 = vadd.f32 %v207_v6, %v206_v7 }
 0x11e   :  { %1665 = vmatprep.subr.bf16.mxu1 %v9197_v9 }
 0x11f   :  { %1613 = vmatpush2.bf16.msra.mxu0 %v9168_v10  ;;  %v469_v10 = vlaneseq }
 0x120   :  { %1614 = vmatprep.subr.bf16.mxu0 %v9176_v11  ;;  %209 = vadd.xlane.f32.xlu1 %v208_v8 }
 0x121   :  { %1666 = vmatpush2.bf16.msra.mxu1 %v9195_v12  ;;  %v10673_v13 = vshrl.u32 %v469_v10, 7 }
 0x123   :  { %1615 = vmatpush2.bf16.msra.mxu0 %v9174_v15 }
 0x124   :  { %1616 = vmatprep.subr.bf16.mxu0 %v9182_v16  ;;  %1668 = vmatmul.mubr.bf16.vlgmr.msra.gmra.mxu1 %v8747_v17  ;;  %v10676_v17 = vsub.s32 0, %v10673_v13 }
 0x126   :  { %v1687_v1 = vrot.slane %v1682_v0, %v10676_v17 }
 0x127   :  { %1617 = vmatpush2.bf16.msra.mxu0 %v9180_v18  ;;  %v10679_v18 = vsub.s32 1, %v10673_v13 }
 0x128   :  { %1618 = vmatprep.subr.bf16.mxu0 %v9188_v19  ;;  %v467_v19 = vld [vmem:[#allocation8] sm:$0x3] }
 0x129   :  { %v476_v26 = vrot.slane %v467_v19, %v10679_v18  ;;  %v1691_v2 = vrot.slane %v1682_v0, %v10679_v18  ;;  %v9201_v0 = vld [vmem:[#allocation11 + $0x150] ss:$24 sps:$4 sm:$0xff]  }
 0x12b   :  { %1619 = vmatpush2.bf16.msra.mxu0 %v9186_v20 }
 0x12c   :  { %1620 = vmatprep.subr.bf16.mxu0 %v9194_v21 }
 0x12f   :  { %1621 = vmatpush2.bf16.msra.mxu0 %v9192_v22 }
 0x130   :  { %1622 = vmatprep.subr.bf16.mxu0 %v9200_v23  ;;  %v472_v23 = vrot.slane %v467_v19, %v10676_v17 }
 0x133   :  { %1623 = vmatpush2.bf16.msra.mxu0 %v9198_v24 }
 0x136   :  { %1625 = vmatmul.mubr.bf16.vlgmr.msra.gmra.mxu0 %v8745_v27 }
 0x176   :  { %v1454_v11 = vpop.f32.mrf.mxu0 }
 0x177   :  { %v1497_v9 = vpop.f32.mrf.mxu1  ;;  %v1455_v27 = vadd.f32 %v1454_v11, %v472_v23 }
 0x178   :  { %v1456_v15 = vpop.f32.mrf.mxu0 }
 0x179   :  { %v1499_v12 = vpop.f32.mrf.mxu1  ;;  %v1457_v30 = vadd.f32 %v1456_v15, %v476_v26  ;;  %v1498_v31 = vadd.f32 %v1497_v9, %v1455_v27 }
 0x17a   :  { %v1458_v14 = vpop.f32.mrf.mxu0 }
 0x17b   :  { %v1501_v16 = vpop.f32.mrf.mxu1  ;;  %v1459_v32 = vadd.f32 %v1458_v14, %v472_v23  ;;  %v1500_v35 = vadd.f32 %v1499_v12, %v1457_v30 }
 0x17c   :  { %v1460_v22 = vpop.f32.mrf.mxu0 }
 0x17d   :  { %v1503_v20 = vpop.f32.mrf.mxu1  ;;  %v1461_v36 = vadd.f32 %v1460_v22, %v476_v26  ;;  %v1502_v39 = vadd.f32 %v1501_v16, %v1459_v32  ;;  %v8039_v16 = vld [vmem:[#allocation2] ss:$0 sm:$0xff] }
 0x17f   :  { %v1504_v42 = vadd.f32 %v1503_v20, %v1461_v36 }
 0x1a5   :  { %v196_v14 = vpop.xlane.xlu1 %195 }
 0x1a6   :  { %vm211_vm3 = vcmp.eq.f32.partialorder %v196_v14, 0.0  ;;  %v9222_v14 = vld [vmem:[#allocation11 + $0x3c0] ss:$24 sps:$4 sm:$0xff]  }
 0x1a9   :  { %v210_v22 = vpop.xlane.xlu1 %209 }
 0x1aa   :  { %vm212_vm2 = vcmp.eq.f32.partialorder %v210_v22, 0.0  ;;  %v9225_v22 = vld [vmem:[#allocation11 + $0x90] ss:$24 sps:$4 sm:$0xff]  }
 0x1b6   :  { %v1540_v24 = vpop.f32.mrf.mxu0 }
 0x1b7   :  { %v1541_v37 = vadd.f32 %v1540_v24, %v1498_v31 }
 0x1b8   :  { %v1583_v21 = vpop.f32.mrf.mxu1  ;;  %v1542_v28 = vpop.f32.mrf.mxu0 }
 0x1b9   :  { %v1543_v40 = vadd.f32 %v1542_v28, %v1500_v35  ;;  %v1584_v43 = vadd.f32 %v1583_v21, %v1541_v37  ;;  %v1721_v21 = vand.u32 127, %v469_v10 }
 0x1ba   :  { %v1585_v25 = vpop.f32.mrf.mxu1  ;;  %v1544_v33 = vpop.f32.mrf.mxu0 }
 0x1bb   :  { %v1545_v44 = vadd.f32 %v1544_v33, %v1502_v39  ;;  %v1586_v47 = vadd.f32 %v1585_v25, %v1543_v40  ;;  %v10687_v23 = vsub.s32 %v1721_v21, %v10673_v13  ;;  %v9230_v21 = vld [vmem:[#allocation11 + $0x394] ss:$24 sps:$4 sm:$0xff]  }
 0x1bc   :  { %v1587_v29 = vpop.f32.mrf.mxu1  ;;  %v1546_v41 = vpop.f32.mrf.mxu0 }
 0x1bd   :  { %v1547_v48 = vadd.f32 %v1546_v41, %v1504_v42  ;;  %v1588_v51 = vadd.f32 %v1587_v29, %v1545_v44 }
 0x1be   :  { %v1589_v34 = vpop.f32.mrf.mxu1 }
 0x1bf   :  { %v1590_v56 = vadd.f32 %v1589_v34, %v1547_v48 }
 0x1e4   :  { %v1669_v38 = vpop.f32.mrf.mxu1 }
 0x1e6   :  { %v1671_v45 = vpop.f32.mrf.mxu1 }
 0x1e8   :  { %v1673_v54 = vpop.f32.mrf.mxu1 }
 0x1ea   :  { %v1675_v62 = vpop.f32.mrf.mxu1 }
 0x1f6   :  { %v1626_v46 = vpop.f32.mrf.mxu0 }
 0x1f7   :  { %v1627_v49 = vadd.f32 %v1626_v46, %v1584_v43 }
 0x1f8   :  { %v1628_v50 = vpop.f32.mrf.mxu0 }
 0x1f9   :  { %v1670_v52 = vadd.f32 %v1669_v38, %v1627_v49  ;;  %v1629_v53 = vadd.f32 %v1628_v50, %v1586_v47 }
 0x1fa   :  { %v1630_v55 = vpop.f32.mrf.mxu0 }
 0x1fb   :  { %10212 = vtanh.f32 %v1670_v52  ;;  %v1672_v57 = vadd.f32 %v1671_v45, %v1629_v53  ;;  %v1631_v58 = vadd.f32 %v1630_v55, %v1588_v51 }
 0x1fc   :  { %v1632_v59 = vpop.f32.mrf.mxu0 }
 0x1fd   :  { %10214 = vtanh.f32 %v1672_v57  ;;  %v1674_v60 = vadd.f32 %v1673_v54, %v1631_v58  ;;  %v1633_v61 = vadd.f32 %v1632_v59, %v1590_v56 }
 0x1ff   :  { %10216 = vtanh.f32 %v1674_v60  ;;  %v1676_v63 = vadd.f32 %v1675_v62, %v1633_v61 }
 0x201   :  { %10218 = vtanh.f32 %v1676_v63 }
 0x208   :  { %v10213_v3 = vpop.eup %10212 }
 0x209   :  { %v1694_v5 = vmul.f32 %v10213_v3, %v1687_v1  ;;  %v9206_v3 = vld [vmem:[#allocation11 + $0x454] ss:$24 sps:$4 sm:$0xff]  }
 0x20a   :  { %v10215_v4 = vpop.eup %10214  ;;  %5657 = vmatprep.subr.bf16.mxu0 %v9206_v3  ;;  %v9282_v3 = vld [vmem:[#allocation11 + $0x4e0] ss:$24 sps:$4 sm:$0xff]  }
 0x20b   :  { %v1695_v6 = vmul.f32 %v10215_v4, %v1691_v2  ;;  %v9209_v4 = vld [vmem:[#allocation11 + $0x124] ss:$24 sps:$4 sm:$0xff]  }
 0x20c   :  { %v10217_v7 = vpop.eup %10216 }
 0x20d   :  { %v1698_v8 = vadd.f32 %v1695_v6, %v1694_v5  ;;  %v1696_v11 = vmul.f32 %v10217_v7, %v1687_v1  ;;  %v9203_v1 = vld [vmem:[#allocation11 + $0x154] ss:$24 sps:$4 sm:$0xff]   ;;  %v9212_v5 = vld [vmem:[#allocation11 + $0x424] ss:$24 sps:$4 sm:$0xff]   ;;  %v9207_v6 = vld [vmem:[#allocation11 + $0x120] ss:$24 sps:$4 sm:$0xff]  }
 0x20e   :  { %v10219_v9 = vpop.eup %10218  ;;  %5616 = vmatprep.subr.bf16.mxu1 %v9203_v1  ;;  %v9210_v7 = vld [vmem:[#allocation11 + $0x420] ss:$24 sps:$4 sm:$0xff]   ;;  %v9284_v1 = vld [vmem:[#allocation11 + $0x4e4] ss:$24 sps:$4 sm:$0xff]  }
 0x20f   :  { %1699 = vadd.xlane.f32.xlu0 %v1698_v8  ;;  %v1697_v12 = vmul.f32 %v10219_v9, %v1691_v2  ;;  %v9204_v2 = vld [vmem:[#allocation11 + $0x450] ss:$24 sps:$4 sm:$0xff]   ;;  %5617 = vmatpush1.bf16.msra.mxu1 %v9201_v0  ;;  %v9215_v8 = vld [vmem:[#allocation11 + $0xf4] ss:$24 sps:$4 sm:$0xff]   ;;  %v9281_v0 = vld [vmem:[#allocation11 + $0x1e4] ss:$24 sps:$4 sm:$0xff]  }
 0x210   :  { %5658 = vmatpush1.bf16.msra.mxu0 %v9204_v2  ;;  %5618 = vmatprep.subr.bf16.mxu1 %v9209_v4  ;;  %v9218_v9 = vld [vmem:[#allocation11 + $0x3f4] ss:$24 sps:$4 sm:$0xff]   ;;  %v9279_v2 = vld [vmem:[#allocation11 + $0x1e0] ss:$24 sps:$4 sm:$0xff]  }
 0x211   :  { %v1701_v15 = vadd.f32 %v1697_v12, %v1696_v11  ;;  %5659 = vmatprep.subr.bf16.mxu0 %v9212_v5  ;;  %v9213_v11 = vld [vmem:[#allocation11 + $0xf0] ss:$24 sps:$4 sm:$0xff]   ;;  %v9287_v4 = vld [vmem:[#allocation11 + $0x1b4] ss:$24 sps:$4 sm:$0xff]  }
 0x212   :  { %v9216_v12 = vld [vmem:[#allocation11 + $0x3f0] ss:$24 sps:$4 sm:$0xff]   ;;  %v9290_v5 = vld [vmem:[#allocation11 + $0x4b4] ss:$24 sps:$4 sm:$0xff]  }
 0x213   :  { %1702 = vadd.xlane.f32.xlu0 %v1701_v15  ;;  %5619 = vmatpush1.bf16.msra.mxu1 %v9207_v6  ;;  %v9221_v15 = vld [vmem:[#allocation11 + $0xc4] ss:$24 sps:$4 sm:$0xff]   ;;  %v9288_v6 = vld [vmem:[#allocation11 + $0x4b0] ss:$24 sps:$4 sm:$0xff]  }
 0x214   :  { %5660 = vmatpush1.bf16.msra.mxu0 %v9210_v7  ;;  %5620 = vmatprep.subr.bf16.mxu1 %v9215_v8  ;;  %v9293_v7 = vld [vmem:[#allocation11 + $0x184] ss:$24 sps:$4 sm:$0xff]  }
 0x215   :  { %5661 = vmatprep.subr.bf16.mxu0 %v9218_v9  ;;  %v9296_v8 = vld [vmem:[#allocation11 + $0x484] ss:$24 sps:$4 sm:$0xff]   ;;  %v9291_v9 = vld [vmem:[#allocation11 + $0x180] ss:$24 sps:$4 sm:$0xff]  }
 0x217   :  { %5621 = vmatpush1.bf16.msra.mxu1 %v9213_v11  ;;  %v9294_v11 = vld [vmem:[#allocation11 + $0x480] ss:$24 sps:$4 sm:$0xff]  }
 0x218   :  { %5662 = vmatpush1.bf16.msra.mxu0 %v9216_v12  ;;  %5622 = vmatprep.subr.bf16.mxu1 %v9221_v15  ;;  %v9299_v12 = vld [vmem:[#allocation11 + $0x754] ss:$24 sps:$4 sm:$0xff]  }
 0x219   :  { %v9302_v15 = vld [vmem:[#allocation11 + $0xa54] ss:$24 sps:$4 sm:$0xff]  }
 0x229   :  { %1711 = vperm.xlu0 %8926, %v8039_v16   ;;  %v9224_v16 = vld [vmem:[#allocation11 + $0x3c4] ss:$24 sps:$4 sm:$0xff]  }
 0x22a   :  { %5663 = vmatprep.subr.bf16.mxu0 %v9224_v16 }
 0x22b   :  { %5664 = vmatpush1.bf16.msra.mxu0 %v9222_v14 }
 0x22c   :  { %5665 = vmatprep.subr.bf16.mxu0 %v9230_v21 }
 0x298   :  { %v1700_v19 = vpop.xlane.xlu0 %1699 }
 0x29c   :  { %v1703_v20 = vpop.xlane.xlu0 %1702 }
 0x2a4   :  { %v1712_v24 = vpop.permute.xlu0 %1711 }
 0x2a5   :  { %v1714_v25 = vadd.f32 %v1712_v24, %v1700_v19  ;;  %v1715_v26 = vadd.f32 %v1712_v24, %v1703_v20  ;;  %v9219_v19 = vld [vmem:[#allocation11 + $0xc0] ss:$24 sps:$4 sm:$0xff]   ;;  %v9227_v20 = vld [vmem:[#allocation11 + $0x94] ss:$24 sps:$4 sm:$0xff]   ;;  %v9228_v24 = vld [vmem:[#allocation11 + $0x390] ss:$24 sps:$4 sm:$0xff]  }
 0x2a6   :  { %5623 = vmatpush1.bf16.msra.mxu1 %v9219_v19  ;;  %5666 = vmatpush1.bf16.msra.mxu0 %v9228_v24  ;;  %v10256_v19 = vld [vmem:[#allocation3] sm:$0xff] }
 0x2a7   :  { %v1716_v27 = vsel %vm211_vm3, 0.0, %v1714_v25  ;;  %v1717_v28 = vsel %vm212_vm2, 0.0, %v1715_v26  ;;  %5624 = vmatprep.subr.bf16.mxu1 %v9227_v20  ;;  %v9233_v25 = vld [vmem:[#allocation11 + $0x64] ss:$24 sps:$4 sm:$0xff]   ;;  %v10257_v20 = vld [vmem:[#allocation3 + $0x8] sm:$0xff] }
 0x2a8   :  { %v1725_v29 = vrot.slane %v1716_v27, %v10687_v23  ;;  %v1729_v30 = vrot.slane %v1717_v28, %v10687_v23  ;;  %v9236_v26 = vld [vmem:[#allocation11 + $0x364] ss:$24 sps:$4 sm:$0xff]  }
 0x2a9   :  { %5667 = vmatprep.subr.bf16.mxu0 %v9236_v26 }
 0x2aa   :  { %v1731_v10 = vsel %vm1730_vm4, %v1729_v30, %v1725_v29  ;;  %5625 = vmatpush1.bf16.msra.mxu1 %v9225_v22  ;;  %v9239_v29 = vld [vmem:[#allocation11 + $0x34] ss:$24 sps:$4 sm:$0xff]   ;;  %v10258_v22 = vld [vmem:[#allocation3 + $0x10] sm:$0xff] }
 0x2ab   :  { %v1734_v31 = vsel %vm1733_vm5, %v1731_v10, -inf  ;;  %5626 = vmatprep.subr.bf16.mxu1 %v9233_v25  ;;  %v9242_v30 = vld [vmem:[#allocation11 + $0x334] ss:$24 sps:$4 sm:$0xff]   ;;  %v9237_v10 = vld [vmem:[#allocation11 + $0x30] ss:$24 sps:$4 sm:$0xff]  }
 0x2ac   :  { %1735 = vmax.xlane.f32.xlu1 %v1734_v31  ;;  %v9240_v31 = vld [vmem:[#allocation11 + $0x330] ss:$24 sps:$4 sm:$0xff]  }
 0x2ad   :  { %v10259_v25 = vld [vmem:[#allocation3 + $0x18] sm:$0xff] }
 0x335   :  { %v1736_v32 = vpop.xlane.xlu1 %1735 }
 0x336   :  { %v1741_v33 = vrot.slane %v1736_v32, %v10676_v17  ;;  %v1745_v34 = vrot.slane %v1736_v32, %v10679_v18  ;;  %v9245_v32 = vld [vmem:[#allocation11 + $0x4] ss:$24 sps:$4 sm:$0xff]  }
 0x338   :  { %v1748_v35 = vsub.f32 %v1716_v27, %v1741_v33  ;;  %v1749_v36 = vsub.f32 %v1717_v28, %v1745_v34  ;;  %v9231_v27 = vld [vmem:[#allocation11 + $0x60] ss:$24 sps:$4 sm:$0xff]   ;;  %v9248_v33 = vld [vmem:[#allocation11 + $0x304] ss:$24 sps:$4 sm:$0xff]  }
 0x339   :  { %v9234_v28 = vld [vmem:[#allocation11 + $0x360] ss:$24 sps:$4 sm:$0xff]   ;;  %5627 = vmatpush1.bf16.msra.mxu1 %v9231_v27 }
 0x33a   :  { %v1750_v37 = vmul.f32 1.442695, %v1748_v35  ;;  %v1752_v38 = vmul.f32 1.442695, %v1749_v36  ;;  %5668 = vmatpush1.bf16.msra.mxu0 %v9234_v28  ;;  %5628 = vmatprep.subr.bf16.mxu1 %v9239_v29  ;;  %v9243_v34 = vld [vmem:[#allocation11] ss:$24 sps:$4 sm:$0xff]  }
 0x33b   :  { %5669 = vmatprep.subr.bf16.mxu0 %v9242_v30  ;;  %v9246_v35 = vld [vmem:[#allocation11 + $0x300] ss:$24 sps:$4 sm:$0xff]   ;;  %v9251_v36 = vld [vmem:[#allocation11 + $0x2d4] ss:$24 sps:$4 sm:$0xff]  }
 0x33c   :  { %10220 = vpow2.f32 %v1750_v37  ;;  %v9254_v37 = vld [vmem:[#allocation11 + $0x5d4] ss:$24 sps:$4 sm:$0xff]  }
 0x33d   :  { %10222 = vpow2.f32 %v1752_v38  ;;  %5629 = vmatpush1.bf16.msra.mxu1 %v9237_v10  ;;  %v9249_v38 = vld [vmem:[#allocation11 + $0x2d0] ss:$24 sps:$4 sm:$0xff]  }
 0x33e   :  { %5670 = vmatpush1.bf16.msra.mxu0 %v9240_v31  ;;  %5630 = vmatprep.subr.bf16.mxu1 %v9245_v32  ;;  %v10260_v31 = vld [vmem:[#allocation3 + $0x60] sm:$0xff] }
 0x33f   :  { %5671 = vmatprep.subr.bf16.mxu0 %v9248_v33  ;;  %v10261_v33 = vld [vmem:[#allocation3 + $0x68] sm:$0xff] }
 0x341   :  { %5631 = vmatpush1.bf16.msra.mxu1 %v9243_v34 }
 0x342   :  { %5672 = vmatpush1.bf16.msra.mxu0 %v9246_v35  ;;  %5632 = vmatprep.subr.bf16.mxu1 %v9251_v36 }
 0x343   :  { %5673 = vmatprep.subr.bf16.mxu0 %v9254_v37  ;;  %v10262_v37 = vld [vmem:[#allocation3 + $0x70] sm:$0xff] }
 0x345   :  { %5633 = vmatpush2.bf16.msra.mxu1 %v9249_v38 }
 0x349   :  { %v10221_v39 = vpop.eup %10220 }
 0x34a   :  { %1757 = vperm.xlu1 %8927, %v10221_v39   ;;  %v10223_v40 = vpop.eup %10222 }
 0x34e   :  { %1760 = vperm.xlu1 %8927, %v10223_v40  }
 0x3c5   :  { %v1758_v41 = vpop.permute.xlu1 %1757 }
 0x3c6   :  { %v1765_v43 = vrot.slane %v1758_v41, %v10687_v23  ;;  %v9260_v41 = vld [vmem:[#allocation11 + $0x5a4] ss:$24 sps:$4 sm:$0xff]  }
 0x3c9   :  { %v1761_v42 = vpop.permute.xlu1 %1760 }
 0x3ca   :  { %v1769_v44 = vrot.slane %v1761_v42, %v10687_v23  ;;  %v9255_v42 = vld [vmem:[#allocation11 + $0x2a0] ss:$24 sps:$4 sm:$0xff]  }
 0x3cc   :  { %v1770_v45 = vsel %vm1730_vm4, %v1769_v44, %v1765_v43  ;;  %v9258_v43 = vld [vmem:[#allocation11 + $0x5a0] ss:$24 sps:$4 sm:$0xff]  }
 0x3cd   :  { %v1772_v46 = vsel %vm1733_vm5, %v1770_v45, 0.0 }
 0x3ce   :  { %1773 = vadd.xlane.f32.xlu1 %v1772_v46 }
 0x457   :  { %v1774_v47 = vpop.xlane.xlu1 %1773 }
 0x458   :  { %v1779_v48 = vrot.slane %v1774_v47, %v10676_v17  ;;  %v1783_v49 = vrot.slane %v1774_v47, %v10679_v18  ;;  %v9261_v47 = vld [vmem:[#allocation11 + $0x270] ss:$24 sps:$4 sm:$0xff]  }
 0x45a   :  { %10224 = vrcp.f32 %v1779_v48  ;;  %v9263_v48 = vld [vmem:[#allocation11 + $0x274] ss:$24 sps:$4 sm:$0xff]  }
 0x45b   :  { %10226 = vrcp.f32 %v1783_v49  ;;  %v9264_v49 = vld [vmem:[#allocation11 + $0x570] ss:$24 sps:$4 sm:$0xff]  }
 0x467   :  { %v10225_v50 = vpop.eup %10224 }
 0x468   :  { %v10227_v51 = vpop.eup %10226  ;;  %v1787_v52 = vmul.f32 %v10225_v50, %v10221_v39  ;;  %v9252_v39 = vld [vmem:[#allocation11 + $0x5d0] ss:$24 sps:$4 sm:$0xff]   ;;  %v9266_v50 = vld [vmem:[#allocation11 + $0x574] ss:$24 sps:$4 sm:$0xff]  }
 0x469   :  { %v1789_v53 = vmul.f32 %v10227_v51, %v10223_v40  ;;  %v9257_v40 = vld [vmem:[#allocation11 + $0x2a4] ss:$24 sps:$4 sm:$0xff]   ;;  %5674 = vmatpush2.bf16.msra.mxu0 %v9252_v39 }
 0x46a   :  { %v10704_v54 = vsel %vm211_vm3, 0.0, %v1787_v52  ;;  %5634 = vmatprep.subr.bf16.mxu1 %v9257_v40  ;;  %5675 = vmatprep.subr.bf16.mxu0 %v9260_v41  ;;  %v10263_v39 = vld [vmem:[#allocation3 + $0x78] sm:$0xff] }
 0x46b   :  { %v1792_v55 = vadd.f32 1e-09, %v10704_v54  ;;  %v10708_v56 = vsel %vm212_vm2, 0.0, %v1789_v53  ;;  %5635 = vmatpush2.bf16.msra.mxu1 %v9255_v42 }
 0x46c   :  { %v1793_v57 = vadd.f32 1e-09, %v10708_v56  ;;  %5636 = vmatprep.subr.bf16.mxu1 %v9263_v48 }
 0x46d   :  { %1797 = vperm.xlu0 %8926, %v1792_v55   ;;  %5676 = vmatpush2.bf16.msra.mxu0 %v9258_v43  ;;  %v9267_v55 = vld [vmem:[#allocation11 + $0x240] ss:$24 sps:$4 sm:$0xff]  }
 0x46e   :  { %5677 = vmatprep.subr.bf16.mxu0 %v9266_v50 }
 0x46f   :  { %5637 = vmatpush2.bf16.msra.mxu1 %v9261_v47 }
 0x471   :  { %1800 = vperm.xlu0 %8926, %v1793_v57   ;;  %5678 = vmatpush2.bf16.msra.mxu0 %v9264_v49  ;;  %v9269_v57 = vld [vmem:[#allocation11 + $0x244] ss:$24 sps:$4 sm:$0xff]  }
 0x472   :  { %5638 = vmatprep.subr.bf16.mxu1 %v9269_v57 }
 0x473   :  { %5639 = vmatpush2.bf16.msra.mxu1 %v9267_v55 }
 0x4e8   :  { %v1798_v58 = vpop.permute.xlu0 %1797 }
 0x4e9   :  { %v1805_v60 = vrot.slane %v1798_v58, %v10687_v23  ;;  %v9270_v58 = vld [vmem:[#allocation11 + $0x540] ss:$24 sps:$4 sm:$0xff]  }
 0x4ec   :  { %v1801_v59 = vpop.permute.xlu0 %1800 }
 0x4ed   :  { %v1809_v61 = vrot.slane %v1801_v59, %v10687_v23  ;;  %v9272_v59 = vld [vmem:[#allocation11 + $0x544] ss:$24 sps:$4 sm:$0xff]  }
 0x4ee   :  { %5679 = vmatprep.subr.bf16.mxu0 %v9272_v59 }
 0x4ef   :  { %v1810_v62 = vsel %vm1730_vm4, %v1809_v61, %v1805_v60  ;;  %v9275_v60 = vld [vmem:[#allocation11 + $0x214] ss:$24 sps:$4 sm:$0xff]   ;;  %5680 = vmatpush2.bf16.msra.mxu0 %v9270_v58 }
 0x4f0   :  { %v1812_v63 = vsel %vm1733_vm5, %v1810_v62, 0.0  ;;  %v9278_v61 = vld [vmem:[#allocation11 + $0x514] ss:$24 sps:$4 sm:$0xff]   ;;  %5640 = vmatprep.subr.bf16.mxu1 %v9275_v60 }
 0x4f1   :  { %1813 = vadd.xlane.f32.xlu0 %v1812_v63  ;;  %v9273_v63 = vld [vmem:[#allocation11 + $0x210] ss:$24 sps:$4 sm:$0xff]   ;;  %5681 = vmatprep.subr.bf16.mxu0 %v9278_v61 }
 0x4f2   :  { %5641 = vmatpush2.bf16.msra.mxu1 %v9273_v63 }
 0x4f3   :  { %5642 = vmatprep.subr.bf16.mxu1 %v9281_v0 }
 0x4f6   :  { %5643 = vmatpush2.bf16.msra.mxu1 %v9279_v2 }
 0x4f7   :  { %5644 = vmatprep.subr.bf16.mxu1 %v9287_v4 }
 0x57a   :  { %v1814_v44 = vpop.xlane.xlu0 %1813 }
 0x57b   :  { %v1819_v45 = vrot.slane %v1814_v44, %v10676_v17  ;;  %v1823_v46 = vrot.slane %v1814_v44, %v10679_v18 }
 0x57d   :  { %10228 = vrcp.f32 %v1819_v45 }
 0x57e   :  { %10230 = vrcp.f32 %v1823_v46 }
 0x58a   :  { %v10229_v51 = vpop.eup %10228 }
 0x58b   :  { %v1827_v52 = vmul.f32 %v10229_v51, %v10704_v54  ;;  %v10231_v53 = vpop.eup %10230  ;;  %v9276_v54 = vld [vmem:[#allocation11 + $0x510] ss:$24 sps:$4 sm:$0xff]  }
 0x58c   :  { %v1829_v62 = vmul.f32 %v10231_v53, %v10708_v56  ;;  %5682 = vmatpush2.bf16.msra.mxu0 %v9276_v54  ;;  %v9285_v56 = vld [vmem:[#allocation11 + $0x1b0] ss:$24 sps:$4 sm:$0xff]  }
 0x58d   :  { %1833 = vperm.xlu1 %8927, %v1827_v52   ;;  %5683 = vmatprep.subr.bf16.mxu0 %v9284_v1 }
 0x58e   :  { %5645 = vmatpush2.bf16.msra.mxu1 %v9285_v56 }
 0x58f   :  { %5646 = vmatprep.subr.bf16.mxu1 %v9293_v7 }
 0x590   :  { %5684 = vmatpush2.bf16.msra.mxu0 %v9282_v3 }
 0x591   :  { %1836 = vperm.xlu1 %8927, %v1829_v62   ;;  %5685 = vmatprep.subr.bf16.mxu0 %v9290_v5 }
 0x592   :  { %5647 = vmatpush2.bf16.msra.mxu1 %v9291_v9 }
 0x593   :  { %5698 = vmatprep.subr.bf16.mxu1 %v9299_v12 }
 0x594   :  { %5686 = vmatpush2.bf16.msra.mxu0 %v9288_v6 }
 0x595   :  { %5687 = vmatprep.subr.bf16.mxu0 %v9296_v8 }
 0x598   :  { %5688 = vmatpush2.bf16.msra.mxu0 %v9294_v11 }
 0x599   :  { %5739 = vmatprep.subr.bf16.mxu0 %v9302_v15  ;;  %v10264_v15 = vld [vmem:[#allocation3 + $0x28] sm:$0xff] }
 0x608   :  { %v10719_v16 = vpop.permute.xlu1 %1833 }
 0x609   :  { %v1851_v14 = vmul.f32 %v10256_v19, %v10719_v16  ;;  %v1852_v21 = vmul.f32 %v10257_v20, %v10719_v16  ;;  %v1853_v24 = vmul.f32 %v10258_v22, %v10719_v16  ;;  %v1854_v26 = vmul.f32 %v10259_v25, %v10719_v16  ;;  %v10265_v22 = vld [vmem:[#allocation3 + $0x38] sm:$0xff] }
 0x60a   :  { %v1856_v19 = vmul.f32 %v10264_v15, %v10719_v16 }
 0x60b   :  { %v1875_v27 = vrot.slane %v1851_v14, 4  ;;  %v1881_v28 = vrot.slane %v1852_v21, 4  ;;  %v1887_v29 = vrot.slane %v1853_v24, 4  ;;  %v1893_v30 = vrot.slane %v1854_v26, 4 }
 0x60c   :  { %v10725_v10 = vpop.permute.xlu1 %1836 }
 0x60d   :  { %v1863_v32 = vmul.f32 %v10260_v31, %v10725_v10  ;;  %v1864_v34 = vmul.f32 %v10261_v33, %v10725_v10  ;;  %v1876_v35 = vadd.f32 %v1875_v27, %v1851_v14  ;;  %v1882_v36 = vadd.f32 %v1881_v28, %v1852_v21 }
 0x60e   :  { %v1865_v38 = vmul.f32 %v10262_v37, %v10725_v10  ;;  %v1866_v40 = vmul.f32 %v10263_v39, %v10725_v10  ;;  %v1888_v41 = vadd.f32 %v1887_v29, %v1853_v24  ;;  %v1894_v42 = vadd.f32 %v1893_v30, %v1854_v26 }
 0x60f   :  { %v1877_v43 = vrot.slane %v1876_v35, 2  ;;  %v1883_v44 = vrot.slane %v1882_v36, 2  ;;  %v1948_v45 = vrot.slane %v1863_v32, 4  ;;  %v1954_v46 = vrot.slane %v1864_v34, 4 }
 0x610   :  { %v1889_v47 = vrot.slane %v1888_v41, 2  ;;  %v1895_v48 = vrot.slane %v1894_v42, 2  ;;  %v1960_v49 = vrot.slane %v1865_v38, 4  ;;  %v1966_v50 = vrot.slane %v1866_v40, 4 }
 0x611   :  { %v1878_v51 = vadd.f32 %v1877_v43, %v1876_v35  ;;  %v1884_v52 = vadd.f32 %v1883_v44, %v1882_v36  ;;  %v1949_v53 = vadd.f32 %v1948_v45, %v1863_v32  ;;  %v1955_v55 = vadd.f32 %v1954_v46, %v1864_v34 }
 0x612   :  { %v1890_v57 = vadd.f32 %v1889_v47, %v1888_v41  ;;  %v1896_v58 = vadd.f32 %v1895_v48, %v1894_v42  ;;  %v1961_v59 = vadd.f32 %v1960_v49, %v1865_v38  ;;  %v1967_v60 = vadd.f32 %v1966_v50, %v1866_v40  ;;  %v10266_v48 = vld [vmem:[#allocation3 + $0x80] sm:$0xff]  ;;  %v10267_v50 = vld [vmem:[#allocation3 + $0x88] sm:$0xff] }
 0x613   :  { %v1879_v61 = vrot.slane %v1878_v51, 1  ;;  %v1885_v62 = vrot.slane %v1884_v52, 1  ;;  %v1950_v63 = vrot.slane %v1949_v53, 2  ;;  %v1956_v54 = vrot.slane %v1955_v55, 2 }
 0x614   :  { %v1891_v0 = vrot.slane %v1890_v57, 1  ;;  %v1897_v1 = vrot.slane %v1896_v58, 1  ;;  %v1962_v2 = vrot.slane %v1961_v59, 2  ;;  %v1968_v3 = vrot.slane %v1967_v60, 2 }
 0x615   :  { %v10731_v4 = vadd.f32 %v1885_v62, %v1884_v52  ;;  %v1951_v5 = vadd.f32 %v1950_v63, %v1949_v53  ;;  %v1957_v56 = vadd.f32 %v1956_v54, %v1955_v55  ;;  %v10735_v9 = vadd.f32 %v1879_v61, %v1878_v51  ;;  %v9297_v55 = vld [vmem:[#allocation11 + $0x750] ss:$24 sps:$4 sm:$0xff]   ;;  %v9305_v63 = vld [vmem:[#allocation11 + $0x724] ss:$24 sps:$4 sm:$0xff]  }
 0x616   :  { %v10733_v6 = vadd.f32 %v1897_v1, %v1896_v58  ;;  %v1963_v7 = vadd.f32 %v1962_v2, %v1961_v59  ;;  %v1969_v8 = vadd.f32 %v1968_v3, %v1967_v60  ;;  %v10738_v14 = vadd.f32 %v1891_v0, %v1890_v57  ;;  %v10268_v60 = vld [vmem:[#allocation3 + $0x20] sm:$0xff]  ;;  %v10269_v2 = vld [vmem:[#allocation3 + $0x30] sm:$0xff] }
 0x617   :  { %v1952_v11 = vrot.slane %v1951_v5, 1  ;;  %v1958_v12 = vrot.slane %v1957_v56, 1  ;;  %v1858_v24 = vmul.f32 %v10265_v22, %v10719_v16  ;;  %v2187_v27 = vpack.c.bf16 %v10731_v4, %v10731_v4  ;;  %v9300_v54 = vld [vmem:[#allocation11 + $0xa50] ss:$24 sps:$4 sm:$0xff]   ;;  %v9303_v22 = vld [vmem:[#allocation11 + $0x720] ss:$24 sps:$4 sm:$0xff]  }
 0x618   :  { %v1964_v20 = vrot.slane %v1963_v7, 1  ;;  %v1970_v21 = vrot.slane %v1969_v8, 1  ;;  %v2189_v30 = vpack.c.bf16 %v10733_v6, %v10733_v6  ;;  %v2186_v32 = vpack.c.bf16 %v10735_v9, %v10735_v9 }
 0x619   :  { %v10741_v25 = vadd.f32 %v1952_v11, %v1951_v5  ;;  %v10743_v26 = vadd.f32 %v1958_v12, %v1957_v56  ;;  %v2188_v35 = vpack.c.bf16 %v10738_v14, %v10738_v14  ;;  %v1905_v36 = vrot.slane %v1856_v19, 4  ;;  %v10270_v5 = vld [vmem:[#allocation3 + $0x98] sm:$0xff] }
 0x61a   :  { %v10747_v28 = vadd.f32 %v1964_v20, %v1963_v7  ;;  %v10749_v29 = vadd.f32 %v1970_v21, %v1969_v8  ;;  %v1917_v37 = vrot.slane %v1858_v24, 4  ;;  %v2813_v38 = vunpack.c.l.b16 %v2187_v27  ;;  %v9308_v12 = vld [vmem:[#allocation11 + $0xa24] ss:$24 sps:$4 sm:$0xff]  }
 0x61b   :  { %v2199_v31 = vpack.c.bf16 %v10743_v26, %v10743_v26  ;;  %v2198_v33 = vpack.c.bf16 %v10741_v25, %v10741_v25  ;;  %v2812_v40 = vunpack.c.l.b16 %v2186_v32  ;;  %v2815_v42 = vunpack.c.l.b16 %v2189_v30  ;;  %v9311_v32 = vld [vmem:[#allocation11 + $0x6f4] ss:$24 sps:$4 sm:$0xff]  }
 0x61c   :  { %v2201_v34 = vpack.c.bf16 %v10749_v29, %v10749_v29  ;;  %v2200_v44 = vpack.c.bf16 %v10747_v28, %v10747_v28  ;;  %v2814_v45 = vunpack.c.l.b16 %v2188_v35  ;;  %v1867_v49 = vmul.f32 %v10266_v48, %v10725_v10 }
 0x61d   :  { %v2825_v39 = vunpack.c.l.b16 %v2199_v31  ;;  %v2824_v41 = vunpack.c.l.b16 %v2198_v33  ;;  %v1868_v51 = vmul.f32 %v10267_v50, %v10725_v10  ;;  %v1855_v61 = vmul.f32 %v10268_v60, %v10719_v16  ;;  %v9317_v50 = vld [vmem:[#allocation11 + $0x6c4] ss:$24 sps:$4 sm:$0xff]  }
 0x61e   :  { %v2827_v43 = vunpack.c.l.b16 %v2201_v34  ;;  %v2826_v58 = vunpack.c.l.b16 %v2200_v44  ;;  %v1906_v62 = vadd.f32 %v1905_v36, %v1856_v19  ;;  %v1857_v3 = vmul.f32 %v10269_v2, %v10719_v16  ;;  %v10271_v19 = vld [vmem:[#allocation3 + $0x90] sm:$0xff] }
 0x61f   :  { %v2837_v46 = vsel %vm1730_vm4, %v2825_v39, %v2813_v38  ;;  %v2836_v47 = vsel %vm1730_vm4, %v2824_v41, %v2812_v40  ;;  %v1978_v1 = vrot.slane %v1868_v51, 4  ;;  %v1870_v56 = vmul.f32 %v10270_v5, %v10725_v10  ;;  %v9306_v36 = vld [vmem:[#allocation11 + $0xa20] ss:$24 sps:$4 sm:$0xff]   ;;  %v9314_v41 = vld [vmem:[#allocation11 + $0x9f4] ss:$24 sps:$4 sm:$0xff]  }
 0x620   :  { %v10769_v52 = vpack.c.b16 %v2837_v46, %v2837_v46  ;;  %v2839_v53 = vsel %vm1730_vm4, %v2827_v43, %v2815_v42  ;;  %v10772_v57 = vpack.c.b16 %v2836_v47, %v2836_v47  ;;  %v2838_v0 = vsel %vm1730_vm4, %v2826_v58, %v2814_v45  ;;  %v9309_v43 = vld [vmem:[#allocation11 + $0x6f0] ss:$24 sps:$4 sm:$0xff]  }
 0x621   :  { %v10774_v59 = vpack.c.b16 %v2839_v53, %v2839_v53  ;;  %v10783_v7 = vpack.c.b16 %v2838_v0, %v2838_v0  ;;  %v1907_v8 = vrot.slane %v1906_v62, 2  ;;  %v1972_v11 = vrot.slane %v1867_v49, 4 }
 0x622   :  { %5648 = vmatprep.mubr.bf16.mxu1 %v10769_v52  ;;  %v1979_v15 = vadd.f32 %v1978_v1, %v1868_v51  ;;  %v1869_v20 = vmul.f32 %v10271_v19, %v10725_v10  ;;  %v1918_v21 = vadd.f32 %v1917_v37, %v1858_v24  ;;  %v1899_v27 = vrot.slane %v1855_v61, 4  ;;  %v9315_v1 = vld [vmem:[#allocation11 + $0x6c0] ss:$24 sps:$4 sm:$0xff]  }
 0x623   :  { %5689 = vmatprep.mubr.bf16.mxu0 %v10774_v59  ;;  %5649 = vmatmul.mubr.bf16.vlgmr.msra.gmra.mxu1 %v10772_v57  ;;  %v1908_v30 = vadd.f32 %v1907_v8, %v1906_v62  ;;  %v1990_v31 = vrot.slane %v1870_v56, 4  ;;  %v1911_v34 = vrot.slane %v1857_v3, 4  ;;  %v1973_v39 = vadd.f32 %v1972_v11, %v1867_v49  ;;  %v9312_v49 = vld [vmem:[#allocation11 + $0x9f0] ss:$24 sps:$4 sm:$0xff]   ;;  %v9320_v62 = vld [vmem:[#allocation11 + $0x9c4] ss:$24 sps:$4 sm:$0xff]  }
 0x624   :  { %5699 = vmatpush1.bf16.msra.mxu1 %v9297_v55  ;;  %5690 = vmatmul.mubr.bf16.vlgmr.msra.gmra.mxu0 %v10783_v7  ;;  %v1980_v33 = vrot.slane %v1979_v15, 2  ;;  %v1919_v35 = vrot.slane %v1918_v21, 2  ;;  %v1984_v37 = vrot.slane %v1869_v20, 4  ;;  %v10553_v44 = vmov 1983009808  }
 0x625   :  { %5700 = vmatprep.subr.bf16.mxu1 %v9305_v63  ;;  %5740 = vmatpush1.bf16.msra.mxu0 %v9300_v54  ;;  %v1909_v38 = vrot.slane %v1908_v30, 1  ;;  %v1991_v40 = vadd.f32 %v1990_v31, %v1870_v56  ;;  %v2048_v45 = vunpack.c.l.s4 %v10553_v44  ;;  %v1900_v46 = vadd.f32 %v1899_v27, %v1855_v61  ;;  %v9323_v56 = vld [vmem:[#allocation11 + $0x694] ss:$24 sps:$4 sm:$0xff]   ;;  %v9321_v31 = vld [vmem:[#allocation11 + $0x690] ss:$24 sps:$4 sm:$0xff]  }
 0x626   :  { %5741 = vmatprep.subr.bf16.mxu0 %v9308_v12  ;;  %v1981_v42 = vadd.f32 %v1980_v33, %v1979_v15  ;;  %v1920_v24 = vadd.f32 %v1919_v35, %v1918_v21  ;;  %v1912_v53 = vadd.f32 %v1911_v34, %v1857_v3  ;;  %v1974_v58 = vrot.slane %v1973_v39, 2  ;;  %v9318_v12 = vld [vmem:[#allocation11 + $0x9c0] ss:$24 sps:$4 sm:$0xff]  }
 0x627   :  { %v10787_v47 = vadd.f32 %v1909_v38, %v1908_v30  ;;  %v1992_v48 = vrot.slane %v1991_v40, 2  ;;  %v1985_v0 = vadd.f32 %v1984_v37, %v1869_v20  ;;  %v2049_v2 = vunpack.c.0.s8 %v2048_v45  ;;  %v9326_v20 = vld [vmem:[#allocation11 + $0x994] ss:$24 sps:$4 sm:$0xff]   ;;  %v9332_v45 = vld [vmem:[#allocation11 + $0x964] ss:$24 sps:$4 sm:$0xff]  }
 0x628   :  { %5701 = vmatpush1.bf16.msra.mxu1 %v9303_v22  ;;  %v1982_v51 = vrot.slane %v1981_v42, 1  ;;  %v1921_v55 = vrot.slane %v1920_v24, 1  ;;  %v1901_v5 = vrot.slane %v1900_v46, 2  ;;  %v1913_v11 = vrot.slane %v1912_v53, 2 }
 0x629   :  { %5702 = vmatprep.subr.bf16.mxu1 %v9311_v32  ;;  %5742 = vmatpush1.bf16.msra.mxu0 %v9306_v36  ;;  %v1993_v60 = vadd.f32 %v1992_v48, %v1991_v40  ;;  %v2191_v54 = vpack.c.bf16 %v10787_v47, %v10787_v47  ;;  %v1975_v15 = vadd.f32 %v1974_v58, %v1973_v39  ;;  %v1986_v30 = vrot.slane %v1985_v0, 2  ;;  %v9329_v36 = vld [vmem:[#allocation11 + $0x664] ss:$24 sps:$4 sm:$0xff]  }
 0x62a   :  { %5743 = vmatprep.subr.bf16.mxu0 %v9314_v41  ;;  %v10789_v63 = vadd.f32 %v1982_v51, %v1981_v42  ;;  %v10793_v61 = vadd.f32 %v1921_v55, %v1920_v24  ;;  %v10804_v33 = vsub.s32 %v2049_v2, %v10673_v13  ;;  %v10806_v34 = vadd.f32 %v1901_v5, %v1900_v46  ;;  %v9324_v42 = vld [vmem:[#allocation11 + $0x990] ss:$24 sps:$4 sm:$0xff]   ;;  %v10273_v55 = vld [vmem:[#allocation3 + $0x48] sm:$0xff] }
 0x62b   :  { %v1994_v3 = vrot.slane %v1993_v60, 1  ;;  %v2817_v22 = vunpack.c.l.b16 %v2191_v54  ;;  %v10815_v41 = vadd.f32 %v1913_v11, %v1912_v53  ;;  %v1976_v24 = vrot.slane %v1975_v15, 1  ;;  %v10272_v51 = vld [vmem:[#allocation3 + $0x40] sm:$0xff]  ;;  %v9342_v46 = vld [vmem:[#allocation11 + $0x900] ss:$24 sps:$4 sm:$0xff]  }
 0x62c   :  { %5703 = vmatpush1.bf16.msra.mxu1 %v9309_v43  ;;  %v2203_v8 = vpack.c.bf16 %v10789_v63, %v10789_v63  ;;  %v2193_v21 = vpack.c.bf16 %v10793_v61, %v10793_v61  ;;  %v10821_v48 = vadd.f32 %v1986_v30, %v1985_v0  ;;  %v1859_v53 = vmul.f32 %v10272_v51, %v10719_v16  ;;  %v10274_v54 = vld [vmem:[#allocation3 + $0xa0] sm:$0xff]  ;;  %v10278_v51 = vld [vmem:[#allocation3 + $0x50] sm:$0xff] }
 0x62d   :  { %5704 = vmatprep.subr.bf16.mxu1 %v9317_v50  ;;  %5744 = vmatpush1.bf16.msra.mxu0 %v9312_v49  ;;  %v10797_v19 = vadd.f32 %v1994_v3, %v1993_v60  ;;  %v9327_v50 = vld [vmem:[#allocation11 + $0x660] ss:$24 sps:$4 sm:$0xff]   ;;  %v1860_v49 = vmul.f32 %v10273_v55, %v10719_v16  ;;  %v1903_v58 = vrot.slane %v10806_v34, 1  ;;  %v1871_v0 = vmul.f32 %v10274_v54, %v10725_v10 }
 0x62e   :  { %5745 = vmatprep.subr.bf16.mxu0 %v9320_v62  ;;  %v2829_v27 = vunpack.c.l.b16 %v2203_v8  ;;  %v2819_v43 = vunpack.c.l.b16 %v2193_v21  ;;  %v9335_v62 = vld [vmem:[#allocation11 + $0x634] ss:$24 sps:$4 sm:$0xff]   ;;  %v1923_v8 = vrot.slane %v1859_v53, 4  ;;  %v1861_v55 = vmul.f32 %v10278_v51, %v10719_v16 }
 0x62f   :  { %v2205_v35 = vpack.c.bf16 %v10797_v19, %v10797_v19  ;;  %v1929_v11 = vrot.slane %v1860_v49, 4  ;;  %v9338_v21 = vld [vmem:[#allocation11 + $0x934] ss:$24 sps:$4 sm:$0xff]  }
 0x630   :  { %5705 = vmatpush1.bf16.msra.mxu1 %v9315_v1  ;;  %v2841_v40 = vsel %vm1730_vm4, %v2829_v27, %v2817_v22  ;;  %v10275_v1 = vld [vmem:[#allocation3 + $0xa8] sm:$0xff]  ;;  %v10276_v27 = vld [vmem:[#allocation3 + $0x58] sm:$0xff] }
 0x631   :  { %5706 = vmatprep.subr.bf16.mxu1 %v9323_v56  ;;  %5746 = vmatpush1.bf16.msra.mxu0 %v9318_v12  ;;  %v10817_v37 = vpack.c.b16 %v2841_v40, %v2841_v40  ;;  %v2831_v44 = vunpack.c.l.b16 %v2205_v35  ;;  %v1872_v2 = vmul.f32 %v10275_v1, %v10725_v10  ;;  %v9330_v56 = vld [vmem:[#allocation11 + $0x960] ss:$24 sps:$4 sm:$0xff]   ;;  %v10833_v12 = vadd.f32 %v1976_v24, %v1975_v15  ;;  %v9333_v35 = vld [vmem:[#allocation11 + $0x630] ss:$24 sps:$4 sm:$0xff]   ;;  %v9341_v15 = vld [vmem:[#allocation11 + $0x604] ss:$24 sps:$4 sm:$0xff]  }
 0x632   :  { %5747 = vmatprep.subr.bf16.mxu0 %v9326_v20  ;;  %v1996_v20 = vrot.slane %v1871_v0, 4  ;;  %v1862_v30 = vmul.f32 %v10276_v27, %v10719_v16  ;;  %v1930_v40 = vadd.f32 %v1929_v11, %v1860_v49  ;;  %v9344_v49 = vld [vmem:[#allocation11 + $0x904] ss:$24 sps:$4 sm:$0xff]  }
 0x633   :  { %5730 = vmatprep.mubr.bf16.mxu1 %v10817_v37  ;;  %v2843_v60 = vsel %vm1730_vm4, %v2831_v44, %v2819_v43  ;;  %v2002_v22 = vrot.slane %v1872_v2, 4  ;;  %v10279_v27 = vld [vmem:[#allocation3 + $0xb0] sm:$0xff] }
 0x634   :  { %5707 = vmatpush1.bf16.msra.mxu1 %v9321_v31  ;;  %v10831_v3 = vpack.c.b16 %v2843_v60, %v2843_v60  ;;  %v1988_v31 = vrot.slane %v10821_v48, 1  ;;  %v1997_v24 = vadd.f32 %v1996_v20, %v1871_v0  ;;  %v9336_v60 = vld [vmem:[#allocation11 + $0x930] ss:$24 sps:$4 sm:$0xff]   ;;  %v1931_v1 = vrot.slane %v1930_v40, 2 }
 0x635   :  { %5708 = vmatprep.subr.bf16.mxu1 %v9329_v36  ;;  %5748 = vmatpush1.bf16.msra.mxu0 %v9324_v42  ;;  %v1924_v36 = vadd.f32 %v1923_v8, %v1859_v53  ;;  %v10277_v42 = vld [vmem:[#allocation3 + $0xb8] sm:$0xff]  ;;  %v2003_v44 = vadd.f32 %v2002_v22, %v1872_v2  ;;  %v1873_v0 = vmul.f32 %v10279_v27, %v10725_v10  ;;  %v9339_v2 = vld [vmem:[#allocation11 + $0x600] ss:$24 sps:$4 sm:$0xff]  }
 0x636   :  { %5749 = vmatprep.subr.bf16.mxu0 %v9332_v45  ;;  %5771 = vmatprep.mubr.bf16.mxu0 %v10831_v3  ;;  %v1874_v43 = vmul.f32 %v10277_v42, %v10725_v10  ;;  %v1941_v45 = vsel %vm192_vm0, %v1862_v30, 0.0  ;;  %v1998_v8 = vrot.slane %v1997_v24, 2  ;;  %v1932_v22 = vadd.f32 %v1931_v1, %v1930_v40  ;;  %v9347_v42 = vld [vmem:[#allocation11 + $0x8d4] ss:$24 sps:$4 sm:$0xff]   ;;  %v9353_v1 = vld [vmem:[#allocation11 + $0x8a4] ss:$24 sps:$4 sm:$0xff]  }
 0x637   :  { %v1925_v54 = vrot.slane %v1924_v36, 2  ;;  %v2004_v11 = vrot.slane %v2003_v44, 2 }
 0x638   :  { %5709 = vmatpush1.bf16.msra.mxu1 %v9327_v50  ;;  %v1942_v50 = vrot.slane %v1941_v45, 4  ;;  %v2014_v53 = vsel %vm192_vm0, %v1874_v43, 0.0  ;;  %v1999_v51 = vadd.f32 %v1998_v8, %v1997_v24  ;;  %v2008_v43 = vrot.slane %v1873_v0, 4  ;;  %v9345_v24 = vld [vmem:[#allocation11 + $0x8d0] ss:$24 sps:$4 sm:$0xff]  }
 0x639   :  { %5710 = vmatprep.subr.bf16.mxu1 %v9335_v62  ;;  %5750 = vmatpush1.bf16.msra.mxu0 %v9330_v56  ;;  %v2015_v62 = vrot.slane %v2014_v53, 4  ;;  %v1926_v20 = vadd.f32 %v1925_v54, %v1924_v36  ;;  %v1935_v56 = vrot.slane %v1861_v55, 4  ;;  %v2005_v39 = vadd.f32 %v2004_v11, %v2003_v44 }
 0x63a   :  { %5751 = vmatprep.subr.bf16.mxu0 %v9338_v21  ;;  %v1943_v30 = vadd.f32 %v1942_v50, %v1941_v45  ;;  %v10844_v21 = vadd.f32 %v1988_v31, %v10821_v48  ;;  %v2000_v36 = vrot.slane %v1999_v51, 1  ;;  %v2009_v54 = vadd.f32 %v2008_v43, %v1873_v0 }
 0x63b   :  { %v2016_v32 = vadd.f32 %v2015_v62, %v2014_v53  ;;  %v1927_v38 = vrot.slane %v1926_v20, 1  ;;  %v1936_v27 = vadd.f32 %v1935_v56, %v1861_v55  ;;  %v2006_v40 = vrot.slane %v2005_v39, 1 }
 0x63c   :  { %5711 = vmatpush1.bf16.msra.mxu1 %v9333_v35  ;;  %v1944_v5 = vrot.slane %v1943_v30, 2  ;;  %v9350_v35 = vld [vmem:[#allocation11 + $0xbd4] ss:$24 sps:$4 sm:$0xff]   ;;  %v11283_v48 = vrot.slane %v10815_v41, 1  ;;  %v1933_v50 = vrot.slane %v1932_v22, 1 }
 0x63d   :  { %5712 = vmatprep.subr.bf16.mxu1 %v9341_v15  ;;  %5752 = vmatpush1.bf16.msra.mxu0 %v9336_v60  ;;  %v2017_v45 = vrot.slane %v2016_v32, 2  ;;  %v10849_v15 = vadd.f32 %v1903_v58, %v10806_v34  ;;  %v1937_v55 = vrot.slane %v1936_v27, 2  ;;  %v2113_v60 = vcombine.low %v10833_v12, %v10789_v63  ;;  %v9348_v58 = vld [vmem:[#allocation11 + $0xbd0] ss:$24 sps:$4 sm:$0xff]  }
 0x63e   :  { %5753 = vmatprep.subr.bf16.mxu0 %v9344_v49  ;;  %v10854_v31 = vadd.f32 %v11283_v48, %v10815_v41  ;;  %v1945_v44 = vadd.f32 %v1944_v5, %v1943_v30  ;;  %v2010_v49 = vrot.slane %v2009_v54, 2  ;;  %v2114_v34 = vcombine.low %v10844_v21, %v10797_v19  ;;  %v9356_v5 = vld [vmem:[#allocation11 + $0xba4] ss:$24 sps:$4 sm:$0xff]  }
 0x63f   :  { %v2018_v53 = vadd.f32 %v2017_v45, %v2016_v32  ;;  %v10860_v8 = vadd.f32 %v1927_v38, %v1926_v20  ;;  %v2001_v41 = vadd.f32 %v2000_v36, %v1999_v51  ;;  %v1938_v11 = vadd.f32 %v1937_v55, %v1936_v27  ;;  %v9351_v20 = vld [vmem:[#allocation11 + $0x8a0] ss:$24 sps:$4 sm:$0xff]   ;;  %v9357_v55 = vld [vmem:[#allocation11 + $0x870] ss:$24 sps:$4 sm:$0xff]  }
 0x640   :  { %5713 = vmatpush1.bf16.msra.mxu1 %v9339_v2  ;;  %v10862_v62 = vadd.f32 %v2006_v40, %v2005_v39  ;;  %v1946_v0 = vrot.slane %v1945_v44, 1  ;;  %v2011_v2 = vadd.f32 %v2010_v49, %v2009_v54  ;;  %v11284_v32 = vcombine.low %v10741_v25, %v10743_v26 }
 0x641   :  { %5714 = vmatprep.subr.bf16.mxu1 %v9347_v42  ;;  %5754 = vmatpush1.bf16.msra.mxu0 %v9342_v46  ;;  %v2019_v63 = vrot.slane %v2018_v53, 1  ;;  %v11285_v19 = vcombine.low %v10747_v28, %v10749_v29  ;;  %v2062_v46 = vcombine.low %v10849_v15, %v10787_v47  ;;  %v1939_v39 = vrot.slane %v1938_v11, 1  ;;  %v9359_v42 = vld [vmem:[#allocation11 + $0x874] ss:$24 sps:$4 sm:$0xff]   ;;  %v9354_v29 = vld [vmem:[#allocation11 + $0xba0] ss:$24 sps:$4 sm:$0xff]  }
 0x642   :  { %5755 = vmatprep.subr.bf16.mxu0 %v9350_v35  ;;  %v2104_v30 = vrot.slane %v11284_v32, %v10804_v33  ;;  %v2063_v56 = vcombine.low %v10854_v31, %v10793_v61  ;;  %v10876_v51 = vadd.f32 %v1933_v50, %v1932_v22  ;;  %v2012_v26 = vrot.slane %v2011_v2, 1  ;;  %v9362_v35 = vld [vmem:[#allocation11 + $0xb74] ss:$24 sps:$4 sm:$0xff]  }
 0x643   :  { %v2111_v38 = vrot.slane %v11285_v19, %v10804_v33  ;;  %v10878_v25 = vadd.f32 %v2019_v63, %v2018_v53  ;;  %v2121_v43 = vrot.slane %v2113_v60, %v10804_v33  ;;  %v2128_v28 = vrot.slane %v2114_v34, %v10804_v33  ;;  %v9368_v34 = vld [vmem:[#allocation11 + $0xb44] ss:$24 sps:$4 sm:$0xff]  }
 0x644   :  { %5715 = vmatpush2.bf16.msra.mxu1 %v9345_v24  ;;  %v2194_v47 = vpack.c.bf16 %v10860_v8, %v10860_v8  ;;  %v2206_v27 = vpack.c.bf16 %v2001_v41, %v2001_v41  ;;  %v2130_v61 = vcombine.low %v2001_v41, %v10862_v62  ;;  %v10885_v36 = vadd.f32 %v1946_v0, %v1945_v44 }
 0x645   :  { %5716 = vmatprep.subr.bf16.mxu1 %v9353_v1  ;;  %5756 = vmatpush2.bf16.msra.mxu0 %v9348_v58  ;;  %v10887_v22 = vadd.f32 %v1939_v39, %v1938_v11  ;;  %v10889_v40 = vadd.f32 %v2012_v26, %v2011_v2  ;;  %v11286_v45 = vcombine.low %v10735_v9, %v10731_v4  ;;  %v9365_v1 = vld [vmem:[#allocation11 + $0x844] ss:$24 sps:$4 sm:$0xff]   ;;  %v9360_v9 = vld [vmem:[#allocation11 + $0xb70] ss:$24 sps:$4 sm:$0xff]  }
 0x646   :  { %5757 = vmatprep.subr.bf16.mxu0 %v9356_v5  ;;  %v11287_v48 = vcombine.low %v10738_v14, %v10733_v6  ;;  %v2070_v60 = vrot.slane %v2062_v46, %v10804_v33  ;;  %v2077_v44 = vrot.slane %v2063_v56, %v10804_v33  ;;  %v2079_v50 = vcombine.low %v10860_v8, %v10876_v51  ;;  %v9363_v5 = vld [vmem:[#allocation11 + $0x840] ss:$24 sps:$4 sm:$0xff]  }
 0x647   :  { %v2053_v54 = vrot.slane %v11286_v45, %v10804_v33  ;;  %v2131_v4 = vcombine.low %v10889_v40, %v10878_v25  ;;  %v2820_v53 = vunpack.c.l.b16 %v2194_v47  ;;  %v2832_v49 = vunpack.c.l.b16 %v2206_v27  ;;  %v9372_v27 = vld [vmem:[#allocation11 + $0xb10] ss:$24 sps:$4 sm:$0xff]   ;;  %v9380_v45 = vld [vmem:[#allocation11 + $0xae4] ss:$24 sps:$4 sm:$0xff]  }
 0x648   :  { %v2060_v24 = vrot.slane %v11287_v48, %v10804_v33  ;;  %5717 = vmatpush2.bf16.msra.mxu1 %v9351_v20  ;;  %v1841_v6 = vrot.slane %v10719_v16, %v10687_v23  ;;  %v1845_v14 = vrot.slane %v10725_v10, %v10687_v23  ;;  %v2138_v58 = vrot.slane %v2130_v61, %v10804_v33  ;;  %v9371_v23 = vld [vmem:[#allocation11 + $0x814] ss:$24 sps:$4 sm:$0xff]  }
 0x649   :  { %5718 = vmatprep.subr.bf16.mxu1 %v9359_v42  ;;  %5758 = vmatpush2.bf16.msra.mxu0 %v9354_v29  ;;  %v2080_v8 = vcombine.low %v10887_v22, %v10885_v36  ;;  %v2112_v41 = vcombine.low %v2104_v30, %v2111_v38  ;;  %v2129_v11 = vcombine.low %v2121_v43, %v2128_v28  ;;  %v9366_v30 = vld [vmem:[#allocation11 + $0xb40] ss:$24 sps:$4 sm:$0xff]   ;;  %v9374_v38 = vld [vmem:[#allocation11 + $0xb14] ss:$24 sps:$4 sm:$0xff]   ;;  %v9369_v42 = vld [vmem:[#allocation11 + $0x810] ss:$24 sps:$4 sm:$0xff]  }
 0x64a   :  { %5759 = vmatprep.subr.bf16.mxu0 %v9362_v35  ;;  %v10913_v0 = vsel %vm1730_vm4, %v2832_v49, %v2820_v53  ;;  %v1846_v63 = vsel %vm1730_vm4, %v1845_v14, %v1841_v6  ;;  %v2061_v16 = vcombine.low %v2053_v54, %v2060_v24  ;;  %v2145_v10 = vrot.slane %v2131_v4, %v10804_v33  ;;  %v9377_v29 = vld [vmem:[#allocation11 + $0x7e4] ss:$24 sps:$4 sm:$0xff]   ;;  %v9381_v6 = vld [vmem:[#allocation11 + $0x7b0] ss:$24 sps:$4 sm:$0xff]  }
 0x64b   :  { %1848 = vst.msk [vmem:[#allocation19] sm:$0x3] %vm1733_vm5, %v1846_v63  ;;  %v2151_v2 = vrot.slane %v2112_v41, 7  ;;  %v2078_v32 = vcombine.low %v2070_v60, %v2077_v44  ;;  %v2161_v19 = vrot.slane %v2129_v11, 7  ;;  %v2087_v46 = vrot.slane %v2079_v50, %v10804_v33  ;;  %v9383_v60 = vld [vmem:[#allocation11 + $0x7b4] ss:$24 sps:$4 sm:$0xff]  }
 0x64c   :  { %5719 = vmatpush2.bf16.msra.mxu1 %v9357_v55  ;;  %v2094_v20 = vrot.slane %v2080_v8, %v10804_v33  ;;  %v2146_v39 = vcombine.low %v2138_v58, %v2145_v10  ;;  %v9375_v55 = vld [vmem:[#allocation11 + $0x7e0] ss:$24 sps:$4 sm:$0xff]   ;;  %v2202_v50 = vpack.c.bf16 %v10833_v12, %v10833_v12  ;;  %v2207_v53 = vpack.c.bf16 %v10862_v62, %v10862_v62  ;;  %v9389_v58 = vld [vmem:[#allocation11 + $0x784] ss:$24 sps:$4 sm:$0xff]   ;;  %v9384_v41 = vld [vmem:[#allocation11 + $0xab0] ss:$24 sps:$4 sm:$0xff]  }
 0x64d   :  { %5720 = vmatprep.subr.bf16.mxu1 %v9365_v1  ;;  %5760 = vmatpush2.bf16.msra.mxu0 %v9360_v9  ;;  %v2152_v56 = vsel %vm1730_vm4, %v2151_v2, %v2061_v16  ;;  %v2162_v43 = vsel %vm1730_vm4, %v2161_v19, %v2078_v32  ;;  %v9378_v1 = vld [vmem:[#allocation11 + $0xae0] ss:$24 sps:$4 sm:$0xff]   ;;  %v9386_v9 = vld [vmem:[#allocation11 + $0xab4] ss:$24 sps:$4 sm:$0xff]   ;;  %v2190_v14 = vpack.c.bf16 %v10849_v15, %v10849_v15 }
 0x64e   :  { %5761 = vmatprep.subr.bf16.mxu0 %v9368_v34  ;;  %v2154_v26 = vsel %vm2153_vm6, %v2151_v2, %v2152_v56  ;;  %v2163_v47 = vsel %vm2153_vm6, %v2161_v19, %v2162_v43  ;;  %v2095_v54 = vcombine.low %v2087_v46, %v2094_v20  ;;  %v2168_v24 = vrot.slane %v2146_v39, 7  ;;  %v9387_v16 = vld [vmem:[#allocation11 + $0x780] ss:$24 sps:$4 sm:$0xff]   ;;  %v9395_v10 = vld [vmem:[#allocation11 + $0xd54] ss:$24 sps:$4 sm:$0xff]  }
 0x64f   :  { %v2156_v33 = vsel %vm2155_vm9, %v2151_v2, %v2154_v26  ;;  %v2164_v61 = vsel %vm2155_vm9, %v2161_v19, %v2163_v47  ;;  %v2204_v34 = vpack.c.bf16 %v10844_v21, %v10844_v21  ;;  %v2195_v8 = vpack.c.bf16 %v10876_v51, %v10876_v51  ;;  %v9390_v32 = vld [vmem:[#allocation11 + $0xa80] ss:$24 sps:$4 sm:$0xff]   ;;  %v9393_v20 = vld [vmem:[#allocation11 + $0xd50] ss:$24 sps:$4 sm:$0xff]  }
 0x650   :  { %5721 = vmatpush2.bf16.msra.mxu1 %v9363_v5  ;;  %v2158_v35 = vsel %vm2157_vm10, %v2151_v2, %v2156_v33  ;;  %v2165_v48 = vsel %vm2157_vm10, %v2161_v19, %v2164_v61  ;;  %v2169_v44 = vsel %vm1730_vm4, %v2168_v24, %v2095_v54  ;;  %v2209_v62 = vpack.c.bf16 %v10878_v25, %v10878_v25  ;;  %v9392_v5 = vld [vmem:[#allocation11 + $0xa84] ss:$24 sps:$4 sm:$0xff]   ;;  %v9396_v26 = vld [vmem:[#allocation11 + $0x1050] ss:$24 sps:$4 sm:$0xff]   ;;  %v9399_v47 = vld [vmem:[#allocation11 + $0xd20] ss:$24 sps:$4 sm:$0xff]  }
 0x651   :  { %5722 = vmatprep.subr.bf16.mxu1 %v9371_v23  ;;  %5762 = vmatpush2.bf16.msra.mxu0 %v9366_v30  ;;  %2176 = vst [vmem:[#allocation18] sm:$0xff] %v2158_v35  ;;  %2177 = vst [vmem:[#allocation18 + $0x8] sm:$0xff] %v2165_v48  ;;  %v2170_v4 = vsel %vm2153_vm6, %v2168_v24, %v2169_v44  ;;  %v2828_v11 = vunpack.c.l.b16 %v2202_v50  ;;  %v2192_v15 = vpack.c.bf16 %v10854_v31, %v10854_v31  ;;  %v9398_v31 = vld [vmem:[#allocation11 + $0x1054] ss:$24 sps:$4 sm:$0xff]   ;;  %v9402_v35 = vld [vmem:[#allocation11 + $0x1020] ss:$24 sps:$4 sm:$0xff]  }
 0x652   :  { %5763 = vmatprep.subr.bf16.mxu0 %v9374_v38  ;;  %v2171_v49 = vsel %vm2155_vm9, %v2168_v24, %v2170_v4  ;;  %v2833_v21 = vunpack.c.l.b16 %v2207_v53  ;;  %v2197_v63 = vpack.c.bf16 %v10885_v36, %v10885_v36  ;;  %v2816_v23 = vunpack.c.l.b16 %v2190_v14  ;;  %v9410_v61 = vld [vmem:[#allocation11 + $0xff4] ss:$24 sps:$4 sm:$0xff]   ;;  %v9413_v54 = vld [vmem:[#allocation11 + $0xcc4] ss:$24 sps:$4 sm:$0xff]   ;;  %v9408_v48 = vld [vmem:[#allocation11 + $0xff0] ss:$24 sps:$4 sm:$0xff]  }
 0x653   :  { %v2172_v12 = vsel %vm2157_vm10, %v2168_v24, %v2171_v49  ;;  %v2830_v51 = vunpack.c.l.b16 %v2204_v34  ;;  %v2821_v25 = vunpack.c.l.b16 %v2195_v8  ;;  %v2835_v2 = vunpack.c.l.b16 %v2209_v62  ;;  %v9416_v24 = vld [vmem:[#allocation11 + $0xfc4] ss:$24 sps:$4 sm:$0xff]   ;;  %v9414_v44 = vld [vmem:[#allocation11 + $0xfc0] ss:$24 sps:$4 sm:$0xff]   ;;  %v9417_v50 = vld [vmem:[#allocation11 + $0xc90] ss:$24 sps:$4 sm:$0xff]  }
 0x654   :  { %5723 = vmatpush2.bf16.msra.mxu1 %v9369_v42  ;;  %2185 = vst.msk [vmem:[#allocation18 + $0x10] sm:$0xff] %vm2184_vm15, %v2172_v12  ;;  %v2840_v30 = vsel %vm1730_vm4, %v2828_v11, %v2816_v23  ;;  %v2818_v19 = vunpack.c.l.b16 %v2192_v15  ;;  %v2823_v46 = vunpack.c.l.b16 %v2197_v63  ;;  %v9401_v42 = vld [vmem:[#allocation11 + $0xd24] ss:$24 sps:$4 sm:$0xff]   ;;  %v9423_v49 = vld [vmem:[#allocation11 + $0xc60] ss:$24 sps:$4 sm:$0xff]  }
 0x655   :  { %5724 = vmatprep.subr.bf16.mxu1 %v9377_v29  ;;  %5764 = vmatpush2.bf16.msra.mxu0 %v9372_v27  ;;  %v2845_v38 = vsel %vm1730_vm4, %v2833_v21, %v2821_v25  ;;  %v10960_v39 = vpack.c.b16 %v2840_v30, %v2840_v30  ;;  %v9404_v29 = vld [vmem:[#allocation11 + $0x1024] ss:$24 sps:$4 sm:$0xff]   ;;  %v9407_v27 = vld [vmem:[#allocation11 + $0xcf4] ss:$24 sps:$4 sm:$0xff]   ;;  %v9426_v14 = vld [vmem:[#allocation11 + $0xf60] ss:$24 sps:$4 sm:$0xff]   ;;  %v2208_v25 = vpack.c.bf16 %v10889_v40, %v10889_v40 }
 0x656   :  { %5765 = vmatprep.subr.bf16.mxu0 %v9380_v45  ;;  %v2842_v36 = vsel %vm1730_vm4, %v2830_v51, %v2818_v19  ;;  %v2847_v56 = vsel %vm1730_vm4, %v2835_v2, %v2823_v46  ;;  %v10963_v43 = vpack.c.b16 %v2845_v38, %v2845_v38  ;;  %v9405_v45 = vld [vmem:[#allocation11 + $0xcf0] ss:$24 sps:$4 sm:$0xff]   ;;  %v9425_v4 = vld [vmem:[#allocation11 + $0xc64] ss:$24 sps:$4 sm:$0xff]   ;;  %v9434_v34 = vld [vmem:[#allocation11 + $0xf34] ss:$24 sps:$4 sm:$0xff]   ;;  %v2196_v30 = vpack.c.bf16 %v10887_v22, %v10887_v22 }
 0x657   :  { %v10966_v28 = vpack.c.b16 %v2842_v36, %v2842_v36  ;;  %v10969_v33 = vpack.c.b16 %v2847_v56, %v2847_v56  ;;  %v9428_v53 = vld [vmem:[#allocation11 + $0xf64] ss:$24 sps:$4 sm:$0xff]   ;;  %v9429_v12 = vld [vmem:[#allocation11 + $0xc30] ss:$24 sps:$4 sm:$0xff]   ;;  %v9443_v11 = vld [vmem:[#allocation11 + $0xed4] ss:$24 sps:$4 sm:$0xff]   ;;  %v2834_v38 = vunpack.c.l.b16 %v2208_v25 }
 0x658   :  { %5725 = vmatpush2.bf16.msra.mxu1 %v9375_v55  ;;  %v9411_v55 = vld [vmem:[#allocation11 + $0xcc0] ss:$24 sps:$4 sm:$0xff]   ;;  %v9432_v8 = vld [vmem:[#allocation11 + $0xf30] ss:$24 sps:$4 sm:$0xff]   ;;  %v9440_v62 = vld [vmem:[#allocation11 + $0xf04] ss:$24 sps:$4 sm:$0xff]  }
 0x659   :  { %5726 = vmatprep.subr.bf16.mxu1 %v9383_v60  ;;  %5766 = vmatpush2.bf16.msra.mxu0 %v9378_v1  ;;  %v9419_v60 = vld [vmem:[#allocation11 + $0xc94] ss:$24 sps:$4 sm:$0xff]   ;;  %v9438_v15 = vld [vmem:[#allocation11 + $0xf00] ss:$24 sps:$4 sm:$0xff]   ;;  %v9441_v63 = vld [vmem:[#allocation11 + $0xed0] ss:$24 sps:$4 sm:$0xff]  }
 0x65a   :  { %5767 = vmatprep.subr.bf16.mxu0 %v9386_v9  ;;  %v9422_v1 = vld [vmem:[#allocation11 + $0xf94] ss:$24 sps:$4 sm:$0xff]   ;;  %v9420_v9 = vld [vmem:[#allocation11 + $0xf90] ss:$24 sps:$4 sm:$0xff]   ;;  %v9458_v19 = vld [vmem:[#allocation11 + $0x1084] ss:$24 sps:$4 sm:$0xff]  }
 0x65b   :  { %v9446_v21 = vld [vmem:[#allocation11 + $0x10e0] ss:$24 sps:$4 sm:$0x7f]   ;;  %v9452_v51 = vld [vmem:[#allocation11 + $0x10b4] ss:$24 sps:$4 sm:$0xff]  }
 0x65c   :  { %5727 = vmatpush2.bf16.msra.mxu1 %v9381_v6  ;;  %v9431_v6 = vld [vmem:[#allocation11 + $0xc34] ss:$24 sps:$4 sm:$0xff]   ;;  %v5599_v23 = vsel %vm1413_vm1, %v9446_v21, 0  ;;  %v9461_v46 = vld [vmem:[#allocation11 + $0xe44] ss:$24 sps:$4 sm:$0xff]  }
 0x65d   :  { %5728 = vmatprep.subr.bf16.mxu1 %v9389_v58  ;;  %5768 = vmatpush2.bf16.msra.mxu0 %v9384_v41  ;;  %v9437_v58 = vld [vmem:[#allocation11 + $0xc04] ss:$24 sps:$4 sm:$0xff]   ;;  %v9435_v41 = vld [vmem:[#allocation11 + $0xc00] ss:$24 sps:$4 sm:$0xff]   ;;  %v9455_v2 = vld [vmem:[#allocation11 + $0xe74] ss:$24 sps:$4 sm:$0xff]  }
 0x65e   :  { %5769 = vmatprep.subr.bf16.mxu0 %v9392_v5  ;;  %v9444_v5 = vld [vmem:[#allocation11 + $0x10e4] ss:$24 sps:$4 sm:$0x7f]   ;;  %v9456_v36 = vld [vmem:[#allocation11 + $0x1080] ss:$24 sps:$4 sm:$0xff]  }
 0x65f   :  { %v9464_v56 = vld [vmem:[#allocation11 + $0x15c] ss:$24 sps:$4 sm:$0xff]   ;;  %v9459_v40 = vld [vmem:[#allocation11 + $0xe40] ss:$24 sps:$4 sm:$0xff]   ;;  %v9524_v25 = vld [vmem:[#allocation11 + $0x36c] ss:$24 sps:$4 sm:$0xff]  }
 0x660   :  { %5729 = vmatpush2.bf16.msra.mxu1 %v9387_v16  ;;  %v9449_v16 = vld [vmem:[#allocation11 + $0xea4] ss:$24 sps:$4 sm:$0xff]   ;;  %v9462_v22 = vld [vmem:[#allocation11 + $0x158] ss:$24 sps:$4 sm:$0xff]  }
 0x661   :  { %5780 = vmatprep.subr.bf16.mxu1 %v9395_v10  ;;  %5770 = vmatpush2.bf16.msra.mxu0 %v9390_v32  ;;  %v9447_v10 = vld [vmem:[#allocation11 + $0xea0] ss:$24 sps:$4 sm:$0xff]   ;;  %v9450_v32 = vld [vmem:[#allocation11 + $0x10b0] ss:$24 sps:$4 sm:$0xff]   ;;  %v9509_v21 = vld [vmem:[#allocation11 + $0x2dc] ss:$24 sps:$4 sm:$0xff]  }
 0x662   :  { %5821 = vmatprep.subr.bf16.mxu0 %v9398_v31  ;;  %v9453_v31 = vld [vmem:[#allocation11 + $0xe70] ss:$24 sps:$4 sm:$0xff]  }
 0x663   :  { %5731 = vmatmul.mubr.bf16.vlgmr.msra.gmra.mxu1 %v10960_v39 }
 0x664   :  { %5781 = vmatpush1.bf16.msra.mxu1 %v9393_v20  ;;  %5812 = vmatprep.mubr.bf16.mxu1 %v10963_v43  ;;  %v2822_v20 = vunpack.c.l.b16 %v2196_v30  ;;  %v9522_v30 = vld [vmem:[#allocation11 + $0x368] ss:$24 sps:$4 sm:$0xff]  }
 0x665   :  { %5772 = vmatmul.mubr.bf16.vlgmr.msra.gmra.mxu0 %v10966_v28  ;;  %5782 = vmatprep.subr.bf16.mxu1 %v9401_v42 }
 0x666   :  { %5822 = vmatpush1.bf16.msra.mxu0 %v9396_v26  ;;  %8587 = vmatprep.mubr.msk.bf16.mxu0 %vm192_vm0, %v10969_v33  ;;  %v2846_v42 = vsel %vm1730_vm4, %v2834_v38, %v2822_v20  ;;  %v9467_v26 = vld [vmem:[#allocation11 + $0xe14] ss:$24 sps:$4 sm:$0xff]   ;;  %v9525_v20 = vld [vmem:[#allocation11 + $0x248] ss:$24 sps:$4 sm:$0xff]  }
 0x667   :  { %5823 = vmatprep.subr.bf16.mxu0 %v9404_v29  ;;  %v10981_v29 = vpack.c.b16 %v2846_v42, %v2846_v42  ;;  %v9527_v38 = vld [vmem:[#allocation11 + $0x24c] ss:$24 sps:$4 sm:$0xff]   ;;  %v9542_v42 = vld [vmem:[#allocation11 + $0x5dc] ss:$24 sps:$4 sm:$0xff]  }
 0x668   :  { %5783 = vmatpush1.bf16.msra.mxu1 %v9399_v47  ;;  %v9470_v47 = vld [vmem:[#allocation11 + $0x12c] ss:$24 sps:$4 sm:$0xff]  }
 0x669   :  { %5784 = vmatprep.subr.bf16.mxu1 %v9407_v27  ;;  %v9465_v27 = vld [vmem:[#allocation11 + $0xe10] ss:$24 sps:$4 sm:$0xff]  }
 0x66a   :  { %5824 = vmatpush1.bf16.msra.mxu0 %v9402_v35  ;;  %v9473_v35 = vld [vmem:[#allocation11 + $0xde4] ss:$24 sps:$4 sm:$0xff]  }
 0x66b   :  { %5825 = vmatprep.subr.bf16.mxu0 %v9410_v61  ;;  %v9468_v61 = vld [vmem:[#allocation11 + $0x128] ss:$24 sps:$4 sm:$0xff]  }
 0x66c   :  { %5785 = vmatpush1.bf16.msra.mxu1 %v9405_v45  ;;  %v9476_v45 = vld [vmem:[#allocation11 + $0xfc] ss:$24 sps:$4 sm:$0xff]  }
 0x66d   :  { %5786 = vmatprep.subr.bf16.mxu1 %v9413_v54  ;;  %v9471_v54 = vld [vmem:[#allocation11 + $0xde0] ss:$24 sps:$4 sm:$0xff]  }
 0x66e   :  { %5826 = vmatpush1.bf16.msra.mxu0 %v9408_v48  ;;  %v9479_v48 = vld [vmem:[#allocation11 + $0xdb4] ss:$24 sps:$4 sm:$0xff]  }
 0x66f   :  { %5827 = vmatprep.subr.bf16.mxu0 %v9416_v24  ;;  %v9474_v24 = vld [vmem:[#allocation11 + $0xf8] ss:$24 sps:$4 sm:$0xff]  }
 0x670   :  { %5787 = vmatpush1.bf16.msra.mxu1 %v9411_v55  ;;  %v9482_v55 = vld [vmem:[#allocation11 + $0xcc] ss:$24 sps:$4 sm:$0xff]  }
 0x671   :  { %5788 = vmatprep.subr.bf16.mxu1 %v9419_v60  ;;  %v9477_v60 = vld [vmem:[#allocation11 + $0xdb0] ss:$24 sps:$4 sm:$0xff]  }
 0x672   :  { %5828 = vmatpush1.bf16.msra.mxu0 %v9414_v44  ;;  %v9485_v44 = vld [vmem:[#allocation11 + $0xd84] ss:$24 sps:$4 sm:$0xff]  }
 0x673   :  { %5829 = vmatprep.subr.bf16.mxu0 %v9422_v1  ;;  %v9480_v1 = vld [vmem:[#allocation11 + $0xc8] ss:$24 sps:$4 sm:$0xff]  }
 0x674   :  { %5789 = vmatpush1.bf16.msra.mxu1 %v9417_v50  ;;  %v9488_v50 = vld [vmem:[#allocation11 + $0x9c] ss:$24 sps:$4 sm:$0xff]  }
 0x675   :  { %5790 = vmatprep.subr.bf16.mxu1 %v9425_v4  ;;  %v9483_v4 = vld [vmem:[#allocation11 + $0xd80] ss:$24 sps:$4 sm:$0xff]  }
 0x676   :  { %5830 = vmatpush1.bf16.msra.mxu0 %v9420_v9  ;;  %v9494_v9 = vld [vmem:[#allocation11 + $0x45c] ss:$24 sps:$4 sm:$0xff]  }
 0x677   :  { %5831 = vmatprep.subr.bf16.mxu0 %v9428_v53  ;;  %v9486_v53 = vld [vmem:[#allocation11 + $0x98] ss:$24 sps:$4 sm:$0xff]  }
 0x678   :  { %5791 = vmatpush1.bf16.msra.mxu1 %v9423_v49  ;;  %v9491_v49 = vld [vmem:[#allocation11 + $0x6c] ss:$24 sps:$4 sm:$0xff]  }
 0x679   :  { %5792 = vmatprep.subr.bf16.mxu1 %v9431_v6  ;;  %v9492_v6 = vld [vmem:[#allocation11 + $0x458] ss:$24 sps:$4 sm:$0xff]  }
 0x67a   :  { %5832 = vmatpush1.bf16.msra.mxu0 %v9426_v14  ;;  %v10987_v14 = vpack.c.b16 %v10913_v0, %v10913_v0  ;;  %v9504_v0 = vld [vmem:[#allocation11 + $0x3f8] ss:$24 sps:$4 sm:$0xff]  }
 0x67b   :  { %5833 = vmatprep.subr.bf16.mxu0 %v9434_v34  ;;  %v9500_v34 = vld [vmem:[#allocation11 + $0x42c] ss:$24 sps:$4 sm:$0xff]  }
 0x67c   :  { %5793 = vmatpush1.bf16.msra.mxu1 %v9429_v12  ;;  %v9489_v12 = vld [vmem:[#allocation11 + $0x68] ss:$24 sps:$4 sm:$0xff]  }
 0x67d   :  { %5794 = vmatprep.subr.bf16.mxu1 %v9437_v58  ;;  %v9497_v58 = vld [vmem:[#allocation11 + $0x3c] ss:$24 sps:$4 sm:$0xff]  }
 0x67e   :  { %5834 = vmatpush1.bf16.msra.mxu0 %v9432_v8  ;;  %v9498_v8 = vld [vmem:[#allocation11 + $0x428] ss:$24 sps:$4 sm:$0xff]  }
 0x67f   :  { %5835 = vmatprep.subr.bf16.mxu0 %v9440_v62  ;;  %v9506_v62 = vld [vmem:[#allocation11 + $0x3fc] ss:$24 sps:$4 sm:$0xff]  }
 0x680   :  { %5795 = vmatpush1.bf16.msra.mxu1 %v9435_v41  ;;  %v9495_v41 = vld [vmem:[#allocation11 + $0x38] ss:$24 sps:$4 sm:$0xff]  }
 0x681   :  { %5796 = vmatprep.subr.bf16.mxu1 %v9443_v11  ;;  %v9503_v11 = vld [vmem:[#allocation11 + $0xc] ss:$24 sps:$4 sm:$0xff]  }
 0x682   :  { %5836 = vmatpush1.bf16.msra.mxu0 %v9438_v15  ;;  %v9512_v15 = vld [vmem:[#allocation11 + $0x3cc] ss:$24 sps:$4 sm:$0xff]  }
 0x683   :  { %8586 = vmatprep.subr.msk.bf16.mxu0 %vm1413_vm1, %v9444_v5  ;;  %v9501_v5 = vld [vmem:[#allocation11 + $0x8] ss:$24 sps:$4 sm:$0xff]  }
 0x684   :  { %5797 = vmatpush2.bf16.msra.mxu1 %v9441_v63  ;;  %v9510_v63 = vld [vmem:[#allocation11 + $0x3c8] ss:$24 sps:$4 sm:$0xff]  }
 0x685   :  { %5798 = vmatprep.subr.bf16.mxu1 %v9449_v16  ;;  %v9518_v16 = vld [vmem:[#allocation11 + $0x39c] ss:$24 sps:$4 sm:$0xff]  }
 0x686   :  { %5848 = vmatpush2.bf16.msra.mxu0 %v5599_v23  ;;  %v9507_v23 = vld [vmem:[#allocation11 + $0x2d8] ss:$24 sps:$4 sm:$0xff]  }
 0x687   :  { %5849 = vmatprep.subr.bf16.mxu0 %v9452_v51  ;;  %v9515_v51 = vld [vmem:[#allocation11 + $0x2ac] ss:$24 sps:$4 sm:$0xff]  }
 0x688   :  { %5799 = vmatpush2.bf16.msra.mxu1 %v9447_v10  ;;  %v9516_v10 = vld [vmem:[#allocation11 + $0x398] ss:$24 sps:$4 sm:$0xff]  }
 0x689   :  { %5800 = vmatprep.subr.bf16.mxu1 %v9455_v2  ;;  %v9513_v2 = vld [vmem:[#allocation11 + $0x2a8] ss:$24 sps:$4 sm:$0xff]  }
 0x68a   :  { %5850 = vmatpush2.bf16.msra.mxu0 %v9450_v32  ;;  %v9521_v32 = vld [vmem:[#allocation11 + $0x27c] ss:$24 sps:$4 sm:$0xff]  }
 0x68b   :  { %5851 = vmatprep.subr.bf16.mxu0 %v9458_v19  ;;  %v9530_v19 = vld [vmem:[#allocation11 + $0x33c] ss:$24 sps:$4 sm:$0xff]  }
 0x68c   :  { %5801 = vmatpush2.bf16.msra.mxu1 %v9453_v31  ;;  %v9519_v31 = vld [vmem:[#allocation11 + $0x278] ss:$24 sps:$4 sm:$0xff]  }
 0x68d   :  { %5802 = vmatprep.subr.bf16.mxu1 %v9461_v46  ;;  %v9528_v46 = vld [vmem:[#allocation11 + $0x338] ss:$24 sps:$4 sm:$0xff]  }
 0x68e   :  { %5852 = vmatpush2.bf16.msra.mxu0 %v9456_v36  ;;  %v9536_v36 = vld [vmem:[#allocation11 + $0x30c] ss:$24 sps:$4 sm:$0xff]  }
 0x68f   :  { %5862 = vmatprep.subr.bf16.mxu0 %v9464_v56  ;;  %v9533_v56 = vld [vmem:[#allocation11 + $0x21c] ss:$24 sps:$4 sm:$0xff]  }
 0x690   :  { %5803 = vmatpush2.bf16.msra.mxu1 %v9459_v40  ;;  %v9534_v40 = vld [vmem:[#allocation11 + $0x308] ss:$24 sps:$4 sm:$0xff]  }
 0x691   :  { %5854 = vmatmul.mubr.bf16.vlgmr.msra.gmra.mxu0 %v10981_v29  ;;  %5804 = vmatprep.subr.bf16.mxu1 %v9467_v26  ;;  %v9531_v26 = vld [vmem:[#allocation11 + $0x218] ss:$24 sps:$4 sm:$0xff]  }
 0x692   :  { %5863 = vmatpush1.bf16.msra.mxu0 %v9462_v22  ;;  %5894 = vmatprep.mubr.bf16.mxu0 %v10769_v52  ;;  %v9539_v22 = vld [vmem:[#allocation11 + $0x1ec] ss:$24 sps:$4 sm:$0xff]  }
 0x693   :  { %5864 = vmatprep.subr.bf16.mxu0 %v9470_v47  ;;  %v9540_v47 = vld [vmem:[#allocation11 + $0x5d8] ss:$24 sps:$4 sm:$0xff]  }
 0x694   :  { %5805 = vmatpush2.bf16.msra.mxu1 %v9465_v27  ;;  %v9548_v27 = vld [vmem:[#allocation11 + $0x5ac] ss:$24 sps:$4 sm:$0xff]  }
 0x695   :  { %5806 = vmatprep.subr.bf16.mxu1 %v9473_v35  ;;  %v9537_v35 = vld [vmem:[#allocation11 + $0x1e8] ss:$24 sps:$4 sm:$0xff]  }
 0x696   :  { %5865 = vmatpush1.bf16.msra.mxu0 %v9468_v61  ;;  %v9545_v61 = vld [vmem:[#allocation11 + $0x1bc] ss:$24 sps:$4 sm:$0xff]  }
 0x697   :  { %5866 = vmatprep.subr.bf16.mxu0 %v9476_v45  ;;  %v9546_v45 = vld [vmem:[#allocation11 + $0x5a8] ss:$24 sps:$4 sm:$0xff]  }
 0x698   :  { %5807 = vmatpush2.bf16.msra.mxu1 %v9471_v54  ;;  %v9554_v54 = vld [vmem:[#allocation11 + $0x57c] ss:$24 sps:$4 sm:$0xff]  }
 0x699   :  { %5808 = vmatprep.subr.bf16.mxu1 %v9479_v48  ;;  %v9543_v48 = vld [vmem:[#allocation11 + $0x1b8] ss:$24 sps:$4 sm:$0xff]  }
 0x69a   :  { %5867 = vmatpush1.bf16.msra.mxu0 %v9474_v24  ;;  %v9551_v24 = vld [vmem:[#allocation11 + $0x18c] ss:$24 sps:$4 sm:$0xff]  }
 0x69b   :  { %5868 = vmatprep.subr.bf16.mxu0 %v9482_v55  ;;  %v9552_v55 = vld [vmem:[#allocation11 + $0x578] ss:$24 sps:$4 sm:$0xff]  }
 0x69c   :  { %5809 = vmatpush2.bf16.msra.mxu1 %v9477_v60  ;;  %v9557_v60 = vld [vmem:[#allocation11 + $0x54c] ss:$24 sps:$4 sm:$0xff]  }
 0x69d   :  { %5810 = vmatprep.subr.bf16.mxu1 %v9485_v44  ;;  %v9549_v44 = vld [vmem:[#allocation11 + $0x188] ss:$24 sps:$4 sm:$0xff]  }
 0x69e   :  { %5869 = vmatpush1.bf16.msra.mxu0 %v9480_v1  ;;  %v9560_v1 = vld [vmem:[#allocation11 + $0x75c] ss:$24 sps:$4 sm:$0xff]  }
 0x69f   :  { %5870 = vmatprep.subr.bf16.mxu0 %v9488_v50  ;;  %v9555_v50 = vld [vmem:[#allocation11 + $0x548] ss:$24 sps:$4 sm:$0xff]  }
 0x6a0   :  { %5811 = vmatpush2.bf16.msra.mxu1 %v9483_v4  ;;  %v9563_v4 = vld [vmem:[#allocation11 + $0x51c] ss:$24 sps:$4 sm:$0xff]  }
 0x6a1   :  { %5903 = vmatprep.subr.bf16.mxu1 %v9494_v9  ;;  %v9558_v9 = vld [vmem:[#allocation11 + $0x758] ss:$24 sps:$4 sm:$0xff]  }
 0x6a2   :  { %5871 = vmatpush1.bf16.msra.mxu0 %v9486_v53  ;;  %v9566_v53 = vld [vmem:[#allocation11 + $0x72c] ss:$24 sps:$4 sm:$0xff]  }
 0x6a3   :  { %5813 = vmatmul.mubr.bf16.vlgmr.msra.gmra.mxu1 %v10987_v14  ;;  %5872 = vmatprep.subr.bf16.mxu0 %v9491_v49  ;;  %v9561_v49 = vld [vmem:[#allocation11 + $0x518] ss:$24 sps:$4 sm:$0xff]  }
 0x6a4   :  { %5904 = vmatpush1.bf16.msra.mxu1 %v9492_v6  ;;  %5935 = vmatprep.mubr.bf16.mxu1 %v10774_v59  ;;  %v9569_v6 = vld [vmem:[#allocation11 + $0x4ec] ss:$24 sps:$4 sm:$0xff]  }
 0x6a5   :  { %5905 = vmatprep.subr.bf16.mxu1 %v9500_v34  ;;  %v9564_v34 = vld [vmem:[#allocation11 + $0x728] ss:$24 sps:$4 sm:$0xff]  }
 0x6a6   :  { %5873 = vmatpush1.bf16.msra.mxu0 %v9489_v12  ;;  %v9572_v12 = vld [vmem:[#allocation11 + $0x6fc] ss:$24 sps:$4 sm:$0xff]  }
 0x6a7   :  { %5874 = vmatprep.subr.bf16.mxu0 %v9497_v58  ;;  %v9567_v58 = vld [vmem:[#allocation11 + $0x4e8] ss:$24 sps:$4 sm:$0xff]  }
 0x6a8   :  { %5906 = vmatpush1.bf16.msra.mxu1 %v9498_v8  ;;  %v9575_v8 = vld [vmem:[#allocation11 + $0x4bc] ss:$24 sps:$4 sm:$0xff]  }
 0x6a9   :  { %5907 = vmatprep.subr.bf16.mxu1 %v9506_v62  ;;  %v9570_v62 = vld [vmem:[#allocation11 + $0x6f8] ss:$24 sps:$4 sm:$0xff]  }
 0x6aa   :  { %5875 = vmatpush1.bf16.msra.mxu0 %v9495_v41  ;;  %v9578_v41 = vld [vmem:[#allocation11 + $0x6cc] ss:$24 sps:$4 sm:$0xff]  }
 0x6ab   :  { %5876 = vmatprep.subr.bf16.mxu0 %v9503_v11  ;;  %v9573_v11 = vld [vmem:[#allocation11 + $0x4b8] ss:$24 sps:$4 sm:$0xff]  }
 0x6ac   :  { %5908 = vmatpush1.bf16.msra.mxu1 %v9504_v0  ;;  %v9581_v0 = vld [vmem:[#allocation11 + $0x48c] ss:$24 sps:$4 sm:$0xff]  }
 0x6ad   :  { %5909 = vmatprep.subr.bf16.mxu1 %v9512_v15  ;;  %v9576_v15 = vld [vmem:[#allocation11 + $0x6c8] ss:$24 sps:$4 sm:$0xff]  }
 0x6ae   :  { %5877 = vmatpush1.bf16.msra.mxu0 %v9501_v5  ;;  %v9584_v5 = vld [vmem:[#allocation11 + $0x69c] ss:$24 sps:$4 sm:$0xff]  }
 0x6af   :  { %5878 = vmatprep.subr.bf16.mxu0 %v9509_v21  ;;  %v9579_v21 = vld [vmem:[#allocation11 + $0x488] ss:$24 sps:$4 sm:$0xff]  }
 0x6b0   :  { %5910 = vmatpush1.bf16.msra.mxu1 %v9510_v63  ;;  %v9590_v63 = vld [vmem:[#allocation11 + $0xa5c] ss:$24 sps:$4 sm:$0xff]  }
 0x6b1   :  { %5911 = vmatprep.subr.bf16.mxu1 %v9518_v16  ;;  %v10993_v16 = vld [vmem:[#allocation12] sm:$0x3f] }
 0x6b2   :  { %5879 = vmatpush2.bf16.msra.mxu0 %v9507_v23  ;;  %v9582_v23 = vld [vmem:[#allocation11 + $0x698] ss:$24 sps:$4 sm:$0xff]  }
 0x6b3   :  { %5880 = vmatprep.subr.bf16.mxu0 %v9515_v51  ;;  %v9587_v51 = vld [vmem:[#allocation11 + $0x66c] ss:$24 sps:$4 sm:$0xff]  }
 0x6b4   :  { %5912 = vmatpush1.bf16.msra.mxu1 %v9516_v10  ;;  %v9588_v10 = vld [vmem:[#allocation11 + $0xa58] ss:$24 sps:$4 sm:$0xff]  }
 0x6b5   :  { %5913 = vmatprep.subr.bf16.mxu1 %v9524_v25  ;;  %v2761_v25 = vrot.slane %v10993_v16, %v10676_v17 }
 0x6b6   :  { %5881 = vmatpush2.bf16.msra.mxu0 %v9513_v2  ;;  %v9596_v2 = vld [vmem:[#allocation11 + $0xa2c] ss:$24 sps:$4 sm:$0xff]  }
 0x6b7   :  { %5882 = vmatprep.subr.bf16.mxu0 %v9521_v32  ;;  %v9585_v32 = vld [vmem:[#allocation11 + $0x668] ss:$24 sps:$4 sm:$0xff]  }
 0x6b8   :  { %5914 = vmatpush1.bf16.msra.mxu1 %v9522_v30  ;;  %v2765_v30 = vrot.slane %v10993_v16, %v10679_v18 }
 0x6b9   :  { %5915 = vmatprep.subr.bf16.mxu1 %v9530_v19 }
 0x6ba   :  { %5883 = vmatpush2.bf16.msra.mxu0 %v9519_v31  ;;  %v9593_v31 = vld [vmem:[#allocation11 + $0x63c] ss:$24 sps:$4 sm:$0xff]  }
 0x6bb   :  { %5884 = vmatprep.subr.bf16.mxu0 %v9527_v38 }
 0x6bc   :  { %5916 = vmatpush1.bf16.msra.mxu1 %v9528_v46  ;;  %v9594_v46 = vld [vmem:[#allocation11 + $0xa28] ss:$24 sps:$4 sm:$0xff]  }
 0x6bd   :  { %5917 = vmatprep.subr.bf16.mxu1 %v9536_v36 }
 0x6be   :  { %5885 = vmatpush2.bf16.msra.mxu0 %v9525_v20 }
 0x6bf   :  { %5886 = vmatprep.subr.bf16.mxu0 %v9533_v56  ;;  %v9602_v56 = vld [vmem:[#allocation11 + $0x9fc] ss:$24 sps:$4 sm:$0xff]  }
 0x6c0   :  { %5918 = vmatpush1.bf16.msra.mxu1 %v9534_v40 }
 0x6c1   :  { %5919 = vmatprep.subr.bf16.mxu1 %v9542_v42 }
 0x6c2   :  { %5887 = vmatpush2.bf16.msra.mxu0 %v9531_v26  ;;  %v9591_v26 = vld [vmem:[#allocation11 + $0x638] ss:$24 sps:$4 sm:$0xff]  }
 0x6c3   :  { %5888 = vmatprep.subr.bf16.mxu0 %v9539_v22 }
 0x6c4   :  { %5920 = vmatpush2.bf16.msra.mxu1 %v9540_v47 }
 0x6c5   :  { %5921 = vmatprep.subr.bf16.mxu1 %v9548_v27  ;;  %v9599_v27 = vld [vmem:[#allocation11 + $0x60c] ss:$24 sps:$4 sm:$0xff]  }
 0x6c6   :  { %5889 = vmatpush2.bf16.msra.mxu0 %v9537_v35 }
 0x6c7   :  { %5890 = vmatprep.subr.bf16.mxu0 %v9545_v61  ;;  %v9600_v61 = vld [vmem:[#allocation11 + $0x9f8] ss:$24 sps:$4 sm:$0xff]  }
 0x6c8   :  { %5922 = vmatpush2.bf16.msra.mxu1 %v9546_v45 }
 0x6c9   :  { %5923 = vmatprep.subr.bf16.mxu1 %v9554_v54 }
 0x6ca   :  { %5891 = vmatpush2.bf16.msra.mxu0 %v9543_v48  ;;  %v9608_v48 = vld [vmem:[#allocation11 + $0x9cc] ss:$24 sps:$4 sm:$0xff]  }
 0x6cb   :  { %5892 = vmatprep.subr.bf16.mxu0 %v9551_v24  ;;  %v9597_v24 = vld [vmem:[#allocation11 + $0x608] ss:$24 sps:$4 sm:$0xff]  }
 0x6cc   :  { %5924 = vmatpush2.bf16.msra.mxu1 %v9552_v55 }
 0x6cd   :  { %5925 = vmatprep.subr.bf16.mxu1 %v9557_v60  ;;  %v9605_v60 = vld [vmem:[#allocation11 + $0x8dc] ss:$24 sps:$4 sm:$0xff]  }
 0x6ce   :  { %5893 = vmatpush2.bf16.msra.mxu0 %v9549_v44  ;;  %v9606_v44 = vld [vmem:[#allocation11 + $0x9c8] ss:$24 sps:$4 sm:$0xff]  }
 0x6cf   :  { %5944 = vmatprep.subr.bf16.mxu0 %v9560_v1  ;;  %v9614_v1 = vld [vmem:[#allocation11 + $0x99c] ss:$24 sps:$4 sm:$0xff]  }
 0x6d0   :  { %5926 = vmatpush2.bf16.msra.mxu1 %v9555_v50  ;;  %v9603_v50 = vld [vmem:[#allocation11 + $0x8d8] ss:$24 sps:$4 sm:$0xff]  }
 0x6d1   :  { %5895 = vmatmul.mubr.bf16.vlgmr.msra.gmra.mxu0 %v10772_v57  ;;  %5927 = vmatprep.subr.bf16.mxu1 %v9563_v4  ;;  %v9611_v4 = vld [vmem:[#allocation11 + $0x8ac] ss:$24 sps:$4 sm:$0xff]  }
 0x6d2   :  { %5945 = vmatpush1.bf16.msra.mxu0 %v9558_v9  ;;  %5976 = vmatprep.mubr.bf16.mxu0 %v10817_v37  ;;  %v9612_v9 = vld [vmem:[#allocation11 + $0x998] ss:$24 sps:$4 sm:$0xff]  }
 0x6d3   :  { %5946 = vmatprep.subr.bf16.mxu0 %v9566_v53  ;;  %v9620_v53 = vld [vmem:[#allocation11 + $0x96c] ss:$24 sps:$4 sm:$0xff]  }
 0x6d4   :  { %5928 = vmatpush2.bf16.msra.mxu1 %v9561_v49  ;;  %v9609_v49 = vld [vmem:[#allocation11 + $0x8a8] ss:$24 sps:$4 sm:$0xff]  }
 0x6d5   :  { %5929 = vmatprep.subr.bf16.mxu1 %v9569_v6  ;;  %v9617_v6 = vld [vmem:[#allocation11 + $0x87c] ss:$24 sps:$4 sm:$0xff]  }
 0x6d6   :  { %5947 = vmatpush1.bf16.msra.mxu0 %v9564_v34  ;;  %v9618_v34 = vld [vmem:[#allocation11 + $0x968] ss:$24 sps:$4 sm:$0xff]  }
 0x6d7   :  { %5948 = vmatprep.subr.bf16.mxu0 %v9572_v12  ;;  %v9626_v12 = vld [vmem:[#allocation11 + $0x93c] ss:$24 sps:$4 sm:$0xff]  }
 0x6d8   :  { %5930 = vmatpush2.bf16.msra.mxu1 %v9567_v58  ;;  %v9615_v58 = vld [vmem:[#allocation11 + $0x878] ss:$24 sps:$4 sm:$0xff]  }
 0x6d9   :  { %5931 = vmatprep.subr.bf16.mxu1 %v9575_v8  ;;  %v9623_v8 = vld [vmem:[#allocation11 + $0x84c] ss:$24 sps:$4 sm:$0xff]  }
 0x6da   :  { %5949 = vmatpush1.bf16.msra.mxu0 %v9570_v62  ;;  %v9624_v62 = vld [vmem:[#allocation11 + $0x938] ss:$24 sps:$4 sm:$0xff]  }
 0x6db   :  { %5950 = vmatprep.subr.bf16.mxu0 %v9578_v41  ;;  %v9632_v41 = vld [vmem:[#allocation11 + $0x90c] ss:$24 sps:$4 sm:$0xff]  }
 0x6dc   :  { %5932 = vmatpush2.bf16.msra.mxu1 %v9573_v11  ;;  %v9621_v11 = vld [vmem:[#allocation11 + $0x848] ss:$24 sps:$4 sm:$0xff]  }
 0x6dd   :  { %5933 = vmatprep.subr.bf16.mxu1 %v9581_v0  ;;  %v9629_v0 = vld [vmem:[#allocation11 + $0x81c] ss:$24 sps:$4 sm:$0xff]  }
 0x6de   :  { %5951 = vmatpush1.bf16.msra.mxu0 %v9576_v15  ;;  %v9630_v15 = vld [vmem:[#allocation11 + $0x908] ss:$24 sps:$4 sm:$0xff]  }
 0x6df   :  { %5952 = vmatprep.subr.bf16.mxu0 %v9584_v5  ;;  %v9638_v5 = vld [vmem:[#allocation11 + $0xbdc] ss:$24 sps:$4 sm:$0xff]  }
 0x6e0   :  { %5934 = vmatpush2.bf16.msra.mxu1 %v9579_v21  ;;  %v9627_v21 = vld [vmem:[#allocation11 + $0x818] ss:$24 sps:$4 sm:$0xff]  }
 0x6e1   :  { %5985 = vmatprep.subr.bf16.mxu1 %v9590_v63  ;;  %v9635_v63 = vld [vmem:[#allocation11 + $0x7ec] ss:$24 sps:$4 sm:$0xff]  }
 0x6e2   :  { %5953 = vmatpush1.bf16.msra.mxu0 %v9582_v23  ;;  %v9636_v23 = vld [vmem:[#allocation11 + $0xbd8] ss:$24 sps:$4 sm:$0xff]  }
 0x6e3   :  { %5936 = vmatmul.mubr.bf16.vlgmr.msra.gmra.mxu1 %v10783_v7  ;;  %5954 = vmatprep.subr.bf16.mxu0 %v9587_v51  ;;  %v5650_v19 = vpop.f32.mrf.mxu1  ;;  %v9644_v51 = vld [vmem:[#allocation11 + $0xbac] ss:$24 sps:$4 sm:$0xff]  }
 0x6e4   :  { %v5651_v38 = vadd.f32 %v5650_v19, %v2761_v25  ;;  %5986 = vmatpush1.bf16.msra.mxu1 %v9588_v10  ;;  %6017 = vmatprep.mubr.bf16.mxu1 %v10831_v3  ;;  %v5691_v36 = vpop.f32.mrf.mxu0  ;;  %v9633_v10 = vld [vmem:[#allocation11 + $0x7e8] ss:$24 sps:$4 sm:$0xff]   ;;  %v9641_v25 = vld [vmem:[#allocation11 + $0x7bc] ss:$24 sps:$4 sm:$0xff]   ;;  %v9647_v19 = vld [vmem:[#allocation11 + $0x78c] ss:$24 sps:$4 sm:$0xff]  }
 0x6e5   :  { %v5652_v20 = vpop.f32.mrf.mxu1  ;;  %5987 = vmatprep.subr.bf16.mxu1 %v9596_v2  ;;  %v9642_v2 = vld [vmem:[#allocation11 + $0xba8] ss:$24 sps:$4 sm:$0xff]  }
 0x6e6   :  { %v11001_v40 = vadd.f32 %v5691_v36, %v5651_v38  ;;  %5955 = vmatpush1.bf16.msra.mxu0 %v9585_v32  ;;  %v5653_v42 = vadd.f32 %v5652_v20, %v2765_v30  ;;  %v5693_v22 = vpop.f32.mrf.mxu0  ;;  %v9650_v32 = vld [vmem:[#allocation11 + $0xb7c] ss:$24 sps:$4 sm:$0xff]   ;;  %v9639_v30 = vld [vmem:[#allocation11 + $0x7b8] ss:$24 sps:$4 sm:$0xff]   ;;  %v9653_v38 = vld [vmem:[#allocation11 + $0xb4c] ss:$24 sps:$4 sm:$0xff]  }
 0x6e7   :  { %5956 = vmatprep.subr.bf16.mxu0 %v9593_v31  ;;  %v5654_v47 = vpop.f32.mrf.mxu1  ;;  %v9648_v31 = vld [vmem:[#allocation11 + $0xb78] ss:$24 sps:$4 sm:$0xff]   ;;  %v9656_v36 = vld [vmem:[#allocation11 + $0xd5c] ss:$24 sps:$4 sm:$0xff]   ;;  %v9651_v20 = vld [vmem:[#allocation11 + $0xb48] ss:$24 sps:$4 sm:$0xff]  }
 0x6e8   :  { %v11003_v35 = vadd.f32 %v5693_v22, %v5653_v42  ;;  %5988 = vmatpush1.bf16.msra.mxu1 %v9594_v46  ;;  %v5695_v45 = vpop.f32.mrf.mxu0  ;;  %v9645_v46 = vld [vmem:[#allocation11 + $0x788] ss:$24 sps:$4 sm:$0xff]   ;;  %v9654_v42 = vld [vmem:[#allocation11 + $0xd58] ss:$24 sps:$4 sm:$0xff]   ;;  %v9665_v47 = vld [vmem:[#allocation11 + $0xaec] ss:$24 sps:$4 sm:$0xff]  }
 0x6e9   :  { %v5655_v54 = vpop.f32.mrf.mxu1  ;;  %5989 = vmatprep.subr.bf16.mxu1 %v9602_v56  ;;  %v9659_v56 = vld [vmem:[#allocation11 + $0xb1c] ss:$24 sps:$4 sm:$0xff]   ;;  %v9657_v22 = vld [vmem:[#allocation11 + $0xb18] ss:$24 sps:$4 sm:$0xff]   ;;  %v9663_v45 = vld [vmem:[#allocation11 + $0xae8] ss:$24 sps:$4 sm:$0xff]  }
 0x6ea   :  { %5957 = vmatpush1.bf16.msra.mxu0 %v9591_v26  ;;  %v5696_v55 = vpop.f32.mrf.mxu0  ;;  %v9662_v26 = vld [vmem:[#allocation11 + $0xd2c] ss:$24 sps:$4 sm:$0xff]   ;;  %v9671_v54 = vld [vmem:[#allocation11 + $0xabc] ss:$24 sps:$4 sm:$0xff]  }
 0x6eb   :  { %5958 = vmatprep.subr.bf16.mxu0 %v9599_v27  ;;  %v9660_v27 = vld [vmem:[#allocation11 + $0xd28] ss:$24 sps:$4 sm:$0xff]   ;;  %v9669_v55 = vld [vmem:[#allocation11 + $0xab8] ss:$24 sps:$4 sm:$0xff]  }
 0x6ec   :  { %5990 = vmatpush1.bf16.msra.mxu1 %v9600_v61  ;;  %v9668_v61 = vld [vmem:[#allocation11 + $0xcfc] ss:$24 sps:$4 sm:$0xff]  }
 0x6ed   :  { %5991 = vmatprep.subr.bf16.mxu1 %v9608_v48  ;;  %v9666_v48 = vld [vmem:[#allocation11 + $0xcf8] ss:$24 sps:$4 sm:$0xff]  }
 0x6ee   :  { %5959 = vmatpush1.bf16.msra.mxu0 %v9597_v24  ;;  %v9674_v24 = vld [vmem:[#allocation11 + $0xccc] ss:$24 sps:$4 sm:$0xff]  }
 0x6ef   :  { %5960 = vmatprep.subr.bf16.mxu0 %v9605_v60  ;;  %v9677_v60 = vld [vmem:[#allocation11 + $0xa8c] ss:$24 sps:$4 sm:$0xff]  }
 0x6f0   :  { %5992 = vmatpush1.bf16.msra.mxu1 %v9606_v44  ;;  %v9672_v44 = vld [vmem:[#allocation11 + $0xcc8] ss:$24 sps:$4 sm:$0xff]  }
 0x6f1   :  { %5993 = vmatprep.subr.bf16.mxu1 %v9614_v1  ;;  %v9680_v1 = vld [vmem:[#allocation11 + $0xc9c] ss:$24 sps:$4 sm:$0xff]  }
 0x6f2   :  { %5961 = vmatpush2.bf16.msra.mxu0 %v9603_v50  ;;  %v9675_v50 = vld [vmem:[#allocation11 + $0xa88] ss:$24 sps:$4 sm:$0xff]  }
 0x6f3   :  { %5962 = vmatprep.subr.bf16.mxu0 %v9611_v4  ;;  %v9686_v4 = vld [vmem:[#allocation11 + $0x105c] ss:$24 sps:$4 sm:$0xff]  }
 0x6f4   :  { %5994 = vmatpush1.bf16.msra.mxu1 %v9612_v9  ;;  %v9678_v9 = vld [vmem:[#allocation11 + $0xc98] ss:$24 sps:$4 sm:$0xff]  }
 0x6f5   :  { %5995 = vmatprep.subr.bf16.mxu1 %v9620_v53  ;;  %v9683_v53 = vld [vmem:[#allocation11 + $0xc6c] ss:$24 sps:$4 sm:$0xff]  }
 0x6f6   :  { %5963 = vmatpush2.bf16.msra.mxu0 %v9609_v49  ;;  %v9684_v49 = vld [vmem:[#allocation11 + $0x1058] ss:$24 sps:$4 sm:$0xff]  }
 0x6f7   :  { %5964 = vmatprep.subr.bf16.mxu0 %v9617_v6  ;;  %v9692_v6 = vld [vmem:[#allocation11 + $0x102c] ss:$24 sps:$4 sm:$0xff]  }
 0x6f8   :  { %5996 = vmatpush1.bf16.msra.mxu1 %v9618_v34  ;;  %v9681_v34 = vld [vmem:[#allocation11 + $0xc68] ss:$24 sps:$4 sm:$0xff]  }
 0x6f9   :  { %5997 = vmatprep.subr.bf16.mxu1 %v9626_v12 }
 0x6fa   :  { %5965 = vmatpush2.bf16.msra.mxu0 %v9615_v58  ;;  %v9689_v58 = vld [vmem:[#allocation11 + $0xc3c] ss:$24 sps:$4 sm:$0xff]  }
 0x6fb   :  { %5966 = vmatprep.subr.bf16.mxu0 %v9623_v8 }
 0x6fc   :  { %5998 = vmatpush1.bf16.msra.mxu1 %v9624_v62  ;;  %v9690_v62 = vld [vmem:[#allocation11 + $0x1028] ss:$24 sps:$4 sm:$0xff]  }
 0x6fd   :  { %5999 = vmatprep.subr.bf16.mxu1 %v9632_v41 }
 0x6fe   :  { %5967 = vmatpush2.bf16.msra.mxu0 %v9621_v11 }
 0x6ff   :  { %5968 = vmatprep.subr.bf16.mxu0 %v9629_v0  ;;  %v9698_v0 = vld [vmem:[#allocation11 + $0xffc] ss:$24 sps:$4 sm:$0xff]  }
 0x700   :  { %6000 = vmatpush1.bf16.msra.mxu1 %v9630_v15 }
 0x701   :  { %6001 = vmatprep.subr.bf16.mxu1 %v9638_v5 }
 0x702   :  { %5969 = vmatpush2.bf16.msra.mxu0 %v9627_v21  ;;  %v9687_v21 = vld [vmem:[#allocation11 + $0xc38] ss:$24 sps:$4 sm:$0xff]  }
 0x703   :  { %5970 = vmatprep.subr.bf16.mxu0 %v9635_v63 }
 0x704   :  { %6002 = vmatpush2.bf16.msra.mxu1 %v9636_v23 }
 0x705   :  { %6003 = vmatprep.subr.bf16.mxu1 %v9644_v51  ;;  %v9695_v51 = vld [vmem:[#allocation11 + $0xc0c] ss:$24 sps:$4 sm:$0xff]  }
 0x706   :  { %5971 = vmatpush2.bf16.msra.mxu0 %v9633_v10  ;;  %v9696_v10 = vld [vmem:[#allocation11 + $0xff8] ss:$24 sps:$4 sm:$0xff]  }
 0x707   :  { %5972 = vmatprep.subr.bf16.mxu0 %v9641_v25 }
 0x708   :  { %6004 = vmatpush2.bf16.msra.mxu1 %v9642_v2 }
 0x709   :  { %6005 = vmatprep.subr.bf16.mxu1 %v9650_v32  ;;  %v9704_v32 = vld [vmem:[#allocation11 + $0xfcc] ss:$24 sps:$4 sm:$0xff]  }
 0x70a   :  { %5973 = vmatpush2.bf16.msra.mxu0 %v9639_v30  ;;  %v9693_v30 = vld [vmem:[#allocation11 + $0xc08] ss:$24 sps:$4 sm:$0xff]  }
 0x70b   :  { %5974 = vmatprep.subr.bf16.mxu0 %v9647_v19 }
 0x70c   :  { %6006 = vmatpush2.bf16.msra.mxu1 %v9648_v31  ;;  %v9701_v31 = vld [vmem:[#allocation11 + $0xedc] ss:$24 sps:$4 sm:$0xff]  }
 0x70d   :  { %6007 = vmatprep.subr.bf16.mxu1 %v9653_v38  ;;  %v9710_v38 = vld [vmem:[#allocation11 + $0xf9c] ss:$24 sps:$4 sm:$0xff]  }
 0x70e   :  { %5975 = vmatpush2.bf16.msra.mxu0 %v9645_v46  ;;  %v9699_v46 = vld [vmem:[#allocation11 + $0xed8] ss:$24 sps:$4 sm:$0xff]  }
 0x70f   :  { %6026 = vmatprep.subr.bf16.mxu0 %v9656_v36  ;;  %v9707_v36 = vld [vmem:[#allocation11 + $0xeac] ss:$24 sps:$4 sm:$0xff]  }
 0x710   :  { %6008 = vmatpush2.bf16.msra.mxu1 %v9651_v20  ;;  %v9708_v20 = vld [vmem:[#allocation11 + $0xf98] ss:$24 sps:$4 sm:$0xff]  }
 0x711   :  { %5977 = vmatmul.mubr.bf16.vlgmr.msra.gmra.mxu0 %v10960_v39  ;;  %6009 = vmatprep.subr.bf16.mxu1 %v9659_v56  ;;  %v9716_v56 = vld [vmem:[#allocation11 + $0xf6c] ss:$24 sps:$4 sm:$0xff]  }
 0x712   :  { %6027 = vmatpush1.bf16.msra.mxu0 %v9654_v42  ;;  %6058 = vmatprep.mubr.bf16.mxu0 %v10963_v43  ;;  %v9705_v42 = vld [vmem:[#allocation11 + $0xea8] ss:$24 sps:$4 sm:$0xff]  }
 0x713   :  { %6028 = vmatprep.subr.bf16.mxu0 %v9662_v26  ;;  %v9713_v26 = vld [vmem:[#allocation11 + $0xe7c] ss:$24 sps:$4 sm:$0xff]  }
 0x714   :  { %6010 = vmatpush2.bf16.msra.mxu1 %v9657_v22  ;;  %v9714_v22 = vld [vmem:[#allocation11 + $0xf68] ss:$24 sps:$4 sm:$0xff]  }
 0x715   :  { %6011 = vmatprep.subr.bf16.mxu1 %v9665_v47  ;;  %v9722_v47 = vld [vmem:[#allocation11 + $0xf3c] ss:$24 sps:$4 sm:$0xff]  }
 0x716   :  { %6029 = vmatpush1.bf16.msra.mxu0 %v9660_v27  ;;  %v9711_v27 = vld [vmem:[#allocation11 + $0xe78] ss:$24 sps:$4 sm:$0xff]  }
 0x717   :  { %6030 = vmatprep.subr.bf16.mxu0 %v9668_v61  ;;  %v9719_v61 = vld [vmem:[#allocation11 + $0xe4c] ss:$24 sps:$4 sm:$0xff]  }
 0x718   :  { %6012 = vmatpush2.bf16.msra.mxu1 %v9663_v45  ;;  %v9720_v45 = vld [vmem:[#allocation11 + $0xf38] ss:$24 sps:$4 sm:$0xff]  }
 0x719   :  { %6013 = vmatprep.subr.bf16.mxu1 %v9671_v54  ;;  %v9728_v54 = vld [vmem:[#allocation11 + $0xf0c] ss:$24 sps:$4 sm:$0xff]  }
 0x71a   :  { %6031 = vmatpush1.bf16.msra.mxu0 %v9666_v48  ;;  %v9717_v48 = vld [vmem:[#allocation11 + $0xe48] ss:$24 sps:$4 sm:$0xff]  }
 0x71b   :  { %6032 = vmatprep.subr.bf16.mxu0 %v9674_v24  ;;  %v9725_v24 = vld [vmem:[#allocation11 + $0xe1c] ss:$24 sps:$4 sm:$0xff]  }
 0x71c   :  { %6014 = vmatpush2.bf16.msra.mxu1 %v9669_v55  ;;  %v9726_v55 = vld [vmem:[#allocation11 + $0xf08] ss:$24 sps:$4 sm:$0xff]  }
 0x71d   :  { %6015 = vmatprep.subr.bf16.mxu1 %v9677_v60  ;;  %v9732_v60 = vld [vmem:[#allocation11 + $0x10ec] ss:$24 sps:$4 sm:$0x7f]  }
 0x71e   :  { %6033 = vmatpush1.bf16.msra.mxu0 %v9672_v44  ;;  %v9734_v44 = vld [vmem:[#allocation11 + $0x10e8] ss:$24 sps:$4 sm:$0x7f]  }
 0x71f   :  { %6034 = vmatprep.subr.bf16.mxu0 %v9680_v1  ;;  %v9723_v1 = vld [vmem:[#allocation11 + $0xe18] ss:$24 sps:$4 sm:$0xff]  }
 0x720   :  { %6016 = vmatpush2.bf16.msra.mxu1 %v9675_v50  ;;  %v9731_v50 = vld [vmem:[#allocation11 + $0xdec] ss:$24 sps:$4 sm:$0xff]  }
 0x721   :  { %6067 = vmatprep.subr.bf16.mxu1 %v9686_v4  ;;  %v5605_v4 = vsel %vm1413_vm1, %v9734_v44, 0 }
 0x722   :  { %6035 = vmatpush1.bf16.msra.mxu0 %v9678_v9  ;;  %v9740_v9 = vld [vmem:[#allocation11 + $0x10bc] ss:$24 sps:$4 sm:$0xff]  }
 0x723   :  { %v5732_v12 = vpop.f32.mrf.mxu1  ;;  %6018 = vmatmul.mubr.bf16.vlgmr.msra.gmra.mxu1 %v10966_v28  ;;  %6036 = vmatprep.subr.bf16.mxu0 %v9683_v53  ;;  %v9729_v53 = vld [vmem:[#allocation11 + $0xde8] ss:$24 sps:$4 sm:$0xff]  }
 0x724   :  { %v5733_v8 = vadd.f32 %v5732_v12, %v11001_v40  ;;  %6068 = vmatpush1.bf16.msra.mxu1 %v9684_v49  ;;  %8589 = vmatprep.mubr.msk.bf16.mxu1 %vm192_vm0, %v10969_v33  ;;  %v9737_v49 = vld [vmem:[#allocation11 + $0xdbc] ss:$24 sps:$4 sm:$0xff]   ;;  %v9735_v12 = vld [vmem:[#allocation11 + $0xdb8] ss:$24 sps:$4 sm:$0xff]  }
 0x725   :  { %v5773_v41 = vpop.f32.mrf.mxu0  ;;  %v5734_v11 = vpop.f32.mrf.mxu1  ;;  %6069 = vmatprep.subr.bf16.mxu1 %v9692_v6  ;;  %v9738_v6 = vld [vmem:[#allocation11 + $0x10b8] ss:$24 sps:$4 sm:$0xff]  }
 0x726   :  { %v11011_v15 = vadd.f32 %v5773_v41, %v5733_v8  ;;  %6037 = vmatpush1.bf16.msra.mxu0 %v9681_v34  ;;  %v5735_v5 = vadd.f32 %v5734_v11, %v11003_v35  ;;  %v9702_v35 = vld [vmem:[#allocation11 + $0xfc8] ss:$24 sps:$4 sm:$0xff]   ;;  %v9746_v34 = vld [vmem:[#allocation11 + $0x108c] ss:$24 sps:$4 sm:$0xff]  }
 0x727   :  { %v5775_v63 = vpop.f32.mrf.mxu0  ;;  %v5736_v23 = vpop.f32.mrf.mxu1  ;;  %6038 = vmatprep.subr.bf16.mxu0 %v9689_v58  ;;  %v9743_v58 = vld [vmem:[#allocation11 + $0xd8c] ss:$24 sps:$4 sm:$0xff]   ;;  %v9744_v8 = vld [vmem:[#allocation11 + $0x1088] ss:$24 sps:$4 sm:$0xff]  }
 0x728   :  { %v11014_v40 = vadd.f32 %v5775_v63, %v5735_v5  ;;  %6070 = vmatpush1.bf16.msra.mxu1 %v9690_v62  ;;  %v9749_v62 = vld [vmem:[#allocation11 + $0x164] ss:$24 sps:$4 sm:$0xff]   ;;  %v9741_v41 = vld [vmem:[#allocation11 + $0xd88] ss:$24 sps:$4 sm:$0xff]   ;;  %v9755_v5 = vld [vmem:[#allocation11 + $0x134] ss:$24 sps:$4 sm:$0xff]  }
 0x729   :  { %v5777_v25 = vpop.f32.mrf.mxu0  ;;  %v5737_v2 = vpop.f32.mrf.mxu1  ;;  %6071 = vmatprep.subr.bf16.mxu1 %v9698_v0  ;;  %v9752_v11 = vld [vmem:[#allocation11 + $0x464] ss:$24 sps:$4 sm:$0xff]   ;;  %v9747_v0 = vld [vmem:[#allocation11 + $0x160] ss:$24 sps:$4 sm:$0xff]   ;;  %v9758_v63 = vld [vmem:[#allocation11 + $0x434] ss:$24 sps:$4 sm:$0xff]  }
 0x72a   :  { %6039 = vmatpush1.bf16.msra.mxu0 %v9687_v21  ;;  %v9750_v21 = vld [vmem:[#allocation11 + $0x460] ss:$24 sps:$4 sm:$0xff]   ;;  %v9753_v23 = vld [vmem:[#allocation11 + $0x130] ss:$24 sps:$4 sm:$0xff]  }
 0x72b   :  { %v5778_v19 = vpop.f32.mrf.mxu0  ;;  %6040 = vmatprep.subr.bf16.mxu0 %v9695_v51  ;;  %v9756_v25 = vld [vmem:[#allocation11 + $0x430] ss:$24 sps:$4 sm:$0xff]  }
 0x72c   :  { %6072 = vmatpush1.bf16.msra.mxu1 %v9696_v10  ;;  %v9761_v10 = vld [vmem:[#allocation11 + $0x104] ss:$24 sps:$4 sm:$0xff]  }
 0x72d   :  { %6073 = vmatprep.subr.bf16.mxu1 %v9704_v32  ;;  %v9764_v32 = vld [vmem:[#allocation11 + $0x404] ss:$24 sps:$4 sm:$0xff]  }
 0x72e   :  { %6041 = vmatpush1.bf16.msra.mxu0 %v9693_v30  ;;  %v9759_v30 = vld [vmem:[#allocation11 + $0x100] ss:$24 sps:$4 sm:$0xff]  }
 0x72f   :  { %6042 = vmatprep.subr.bf16.mxu0 %v9701_v31  ;;  %v9767_v31 = vld [vmem:[#allocation11 + $0xd4] ss:$24 sps:$4 sm:$0xff]  }
 0x730   :  { %6074 = vmatpush1.bf16.msra.mxu1 %v9702_v35 }
 0x731   :  { %6075 = vmatprep.subr.bf16.mxu1 %v9710_v38  ;;  %v9770_v38 = vld [vmem:[#allocation11 + $0x3d4] ss:$24 sps:$4 sm:$0xff]  }
 0x732   :  { %6043 = vmatpush2.bf16.msra.mxu0 %v9699_v46  ;;  %v9765_v46 = vld [vmem:[#allocation11 + $0xd0] ss:$24 sps:$4 sm:$0xff]  }
 0x733   :  { %6044 = vmatprep.subr.bf16.mxu0 %v9707_v36  ;;  %v9773_v36 = vld [vmem:[#allocation11 + $0xa4] ss:$24 sps:$4 sm:$0xff]  }
 0x734   :  { %6076 = vmatpush1.bf16.msra.mxu1 %v9708_v20  ;;  %v9776_v20 = vld [vmem:[#allocation11 + $0x3a4] ss:$24 sps:$4 sm:$0xff]  }
 0x735   :  { %6077 = vmatprep.subr.bf16.mxu1 %v9716_v56  ;;  %v9771_v56 = vld [vmem:[#allocation11 + $0xa0] ss:$24 sps:$4 sm:$0xff]  }
 0x736   :  { %6045 = vmatpush2.bf16.msra.mxu0 %v9705_v42  ;;  %v9779_v42 = vld [vmem:[#allocation11 + $0x74] ss:$24 sps:$4 sm:$0xff]  }
 0x737   :  { %6046 = vmatprep.subr.bf16.mxu0 %v9713_v26  ;;  %v9774_v26 = vld [vmem:[#allocation11 + $0x3a0] ss:$24 sps:$4 sm:$0xff]  }
 0x738   :  { %6078 = vmatpush1.bf16.msra.mxu1 %v9714_v22  ;;  %v9782_v22 = vld [vmem:[#allocation11 + $0x374] ss:$24 sps:$4 sm:$0xff]  }
 0x739   :  { %6079 = vmatprep.subr.bf16.mxu1 %v9722_v47  ;;  %v9777_v47 = vld [vmem:[#allocation11 + $0x70] ss:$24 sps:$4 sm:$0xff]  }
 0x73a   :  { %6047 = vmatpush2.bf16.msra.mxu0 %v9711_v27  ;;  %v9785_v27 = vld [vmem:[#allocation11 + $0x44] ss:$24 sps:$4 sm:$0xff]  }
 0x73b   :  { %6048 = vmatprep.subr.bf16.mxu0 %v9719_v61  ;;  %v9780_v61 = vld [vmem:[#allocation11 + $0x370] ss:$24 sps:$4 sm:$0xff]  }
 0x73c   :  { %6080 = vmatpush1.bf16.msra.mxu1 %v9720_v45 }
 0x73d   :  { %6081 = vmatprep.subr.bf16.mxu1 %v9728_v54  ;;  %v9788_v54 = vld [vmem:[#allocation11 + $0x344] ss:$24 sps:$4 sm:$0xff]  }
 0x73e   :  { %6049 = vmatpush2.bf16.msra.mxu0 %v9717_v48 }
 0x73f   :  { %6050 = vmatprep.subr.bf16.mxu0 %v9725_v24  ;;  %v9783_v24 = vld [vmem:[#allocation11 + $0x40] ss:$24 sps:$4 sm:$0xff]  }
 0x740   :  { %6082 = vmatpush1.bf16.msra.mxu1 %v9726_v55 }
 0x741   :  { %8588 = vmatprep.subr.msk.bf16.mxu1 %vm1413_vm1, %v9732_v60  ;;  %v9791_v60 = vld [vmem:[#allocation11 + $0x14] ss:$24 sps:$4 sm:$0xff]  }
 0x742   :  { %6051 = vmatpush2.bf16.msra.mxu0 %v9723_v1 }
 0x743   :  { %6052 = vmatprep.subr.bf16.mxu0 %v9731_v50  ;;  %v9786_v50 = vld [vmem:[#allocation11 + $0x340] ss:$24 sps:$4 sm:$0xff]  }
 0x744   :  { %6094 = vmatpush2.bf16.msra.mxu1 %v5605_v4 }
 0x745   :  { %6095 = vmatprep.subr.bf16.mxu1 %v9740_v9  ;;  %v9794_v9 = vld [vmem:[#allocation11 + $0x314] ss:$24 sps:$4 sm:$0xff]  }
 0x746   :  { %6053 = vmatpush2.bf16.msra.mxu0 %v9729_v53 }
 0x747   :  { %6054 = vmatprep.subr.bf16.mxu0 %v9737_v49  ;;  %v9789_v49 = vld [vmem:[#allocation11 + $0x10] ss:$24 sps:$4 sm:$0xff]  }
 0x748   :  { %6096 = vmatpush2.bf16.msra.mxu1 %v9738_v6 }
 0x749   :  { %6097 = vmatprep.subr.bf16.mxu1 %v9746_v34  ;;  %v9792_v34 = vld [vmem:[#allocation11 + $0x310] ss:$24 sps:$4 sm:$0xff]  }
 0x74a   :  { %6055 = vmatpush2.bf16.msra.mxu0 %v9735_v12  ;;  %v9800_v12 = vld [vmem:[#allocation11 + $0x5e4] ss:$24 sps:$4 sm:$0xff]  }
 0x74b   :  { %6056 = vmatprep.subr.bf16.mxu0 %v9743_v58  ;;  %v9795_v58 = vld [vmem:[#allocation11 + $0x2e0] ss:$24 sps:$4 sm:$0xff]  }
 0x74c   :  { %6098 = vmatpush2.bf16.msra.mxu1 %v9744_v8  ;;  %v9803_v8 = vld [vmem:[#allocation11 + $0x2b4] ss:$24 sps:$4 sm:$0xff]  }
 0x74d   :  { %6108 = vmatprep.subr.bf16.mxu1 %v9749_v62  ;;  %v9806_v62 = vld [vmem:[#allocation11 + $0x5b4] ss:$24 sps:$4 sm:$0xff]  }
 0x74e   :  { %6057 = vmatpush2.bf16.msra.mxu0 %v9741_v41  ;;  %v9801_v41 = vld [vmem:[#allocation11 + $0x2b0] ss:$24 sps:$4 sm:$0xff]  }
 0x74f   :  { %6100 = vmatmul.mubr.bf16.vlgmr.msra.gmra.mxu1 %v10981_v29  ;;  %6149 = vmatprep.subr.bf16.mxu0 %v9752_v11  ;;  %v9809_v11 = vld [vmem:[#allocation11 + $0x284] ss:$24 sps:$4 sm:$0xff]  }
 0x750   :  { %6109 = vmatpush1.bf16.msra.mxu1 %v9747_v0  ;;  %6140 = vmatprep.mubr.bf16.mxu1 %v10769_v52  ;;  %v9762_v52 = vld [vmem:[#allocation11 + $0x400] ss:$24 sps:$4 sm:$0xff]   ;;  %v9804_v0 = vld [vmem:[#allocation11 + $0x5b0] ss:$24 sps:$4 sm:$0xff]  }
 0x751   :  { %v5855_v51 = vpop.f32.mrf.mxu0  ;;  %6059 = vmatmul.mubr.bf16.vlgmr.msra.gmra.mxu0 %v10987_v14  ;;  %6110 = vmatprep.subr.bf16.mxu1 %v9755_v5  ;;  %v9812_v5 = vld [vmem:[#allocation11 + $0x584] ss:$24 sps:$4 sm:$0xff]  }
 0x752   :  { %6150 = vmatpush1.bf16.msra.mxu0 %v9750_v21  ;;  %6181 = vmatprep.mubr.bf16.mxu0 %v10774_v59  ;;  %v9768_v59 = vld [vmem:[#allocation11 + $0x3d0] ss:$24 sps:$4 sm:$0xff]   ;;  %v9807_v21 = vld [vmem:[#allocation11 + $0x280] ss:$24 sps:$4 sm:$0xff]  }
 0x753   :  { %v5857_v2 = vpop.f32.mrf.mxu0  ;;  %6151 = vmatprep.subr.bf16.mxu0 %v9758_v63  ;;  %v9815_v63 = vld [vmem:[#allocation11 + $0x254] ss:$24 sps:$4 sm:$0xff]  }
 0x754   :  { %6111 = vmatpush1.bf16.msra.mxu1 %v9753_v23  ;;  %v9810_v23 = vld [vmem:[#allocation11 + $0x580] ss:$24 sps:$4 sm:$0xff]  }
 0x755   :  { %v5859_v19 = vpop.f32.mrf.mxu0  ;;  %6112 = vmatprep.subr.bf16.mxu1 %v9761_v10  ;;  %v9813_v10 = vld [vmem:[#allocation11 + $0x250] ss:$24 sps:$4 sm:$0xff]  }
 0x756   :  { %6152 = vmatpush1.bf16.msra.mxu0 %v9756_v25  ;;  %v9821_v25 = vld [vmem:[#allocation11 + $0x224] ss:$24 sps:$4 sm:$0xff]   ;;  %v9827_v19 = vld [vmem:[#allocation11 + $0x1f4] ss:$24 sps:$4 sm:$0xff]  }
 0x757   :  { %v5860_v35 = vpop.f32.mrf.mxu0  ;;  %6153 = vmatprep.subr.bf16.mxu0 %v9764_v32  ;;  %v9824_v32 = vld [vmem:[#allocation11 + $0x524] ss:$24 sps:$4 sm:$0xff]  }
 0x758   :  { %6113 = vmatpush1.bf16.msra.mxu1 %v9759_v30  ;;  %v9819_v30 = vld [vmem:[#allocation11 + $0x220] ss:$24 sps:$4 sm:$0xff]   ;;  %v9825_v35 = vld [vmem:[#allocation11 + $0x1f0] ss:$24 sps:$4 sm:$0xff]  }
 0x759   :  { %6114 = vmatprep.subr.bf16.mxu1 %v9767_v31  ;;  %v9822_v31 = vld [vmem:[#allocation11 + $0x520] ss:$24 sps:$4 sm:$0xff]  }
 0x75a   :  { %6154 = vmatpush1.bf16.msra.mxu0 %v9762_v52  ;;  %v9830_v52 = vld [vmem:[#allocation11 + $0x4f4] ss:$24 sps:$4 sm:$0xff]  }
 0x75b   :  { %6155 = vmatprep.subr.bf16.mxu0 %v9770_v38  ;;  %v9833_v38 = vld [vmem:[#allocation11 + $0x1c4] ss:$24 sps:$4 sm:$0xff]  }
 0x75c   :  { %6115 = vmatpush1.bf16.msra.mxu1 %v9765_v46  ;;  %v9828_v46 = vld [vmem:[#allocation11 + $0x4f0] ss:$24 sps:$4 sm:$0xff]  }
 0x75d   :  { %6116 = vmatprep.subr.bf16.mxu1 %v9773_v36  ;;  %v9836_v36 = vld [vmem:[#allocation11 + $0x4c4] ss:$24 sps:$4 sm:$0xff]  }
 0x75e   :  { %6156 = vmatpush1.bf16.msra.mxu0 %v9768_v59  ;;  %v9831_v59 = vld [vmem:[#allocation11 + $0x1c0] ss:$24 sps:$4 sm:$0xff]  }
 0x75f   :  { %6157 = vmatprep.subr.bf16.mxu0 %v9776_v20  ;;  %v9839_v20 = vld [vmem:[#allocation11 + $0x194] ss:$24 sps:$4 sm:$0xff]  }
 0x760   :  { %6117 = vmatpush1.bf16.msra.mxu1 %v9771_v56  ;;  %v9834_v56 = vld [vmem:[#allocation11 + $0x4c0] ss:$24 sps:$4 sm:$0xff]  }
 0x761   :  { %6118 = vmatprep.subr.bf16.mxu1 %v9779_v42  ;;  %v9842_v42 = vld [vmem:[#allocation11 + $0x494] ss:$24 sps:$4 sm:$0xff]  }
 0x762   :  { %6158 = vmatpush1.bf16.msra.mxu0 %v9774_v26  ;;  %v9837_v26 = vld [vmem:[#allocation11 + $0x190] ss:$24 sps:$4 sm:$0xff]  }
 0x763   :  { %v5814_v45 = vpop.f32.mrf.mxu1  ;;  %6159 = vmatprep.subr.bf16.mxu0 %v9782_v22  ;;  %v9845_v22 = vld [vmem:[#allocation11 + $0x764] ss:$24 sps:$4 sm:$0xff]  }
 0x764   :  { %v5815_v48 = vadd.f32 %v5814_v45, %v11011_v15  ;;  %6119 = vmatpush1.bf16.msra.mxu1 %v9777_v47  ;;  %v9797_v15 = vld [vmem:[#allocation11 + $0x2e4] ss:$24 sps:$4 sm:$0xff]   ;;  %v9840_v47 = vld [vmem:[#allocation11 + $0x490] ss:$24 sps:$4 sm:$0xff]   ;;  %v9851_v45 = vld [vmem:[#allocation11 + $0x734] ss:$24 sps:$4 sm:$0xff]  }
 0x765   :  { %v5816_v55 = vpop.f32.mrf.mxu1  ;;  %6120 = vmatprep.subr.bf16.mxu1 %v9785_v27  ;;  %v9848_v27 = vld [vmem:[#allocation11 + $0xa64] ss:$24 sps:$4 sm:$0xff]  }
 0x766   :  { %v11023_v44 = vadd.f32 %v5855_v51, %v5815_v48  ;;  %6160 = vmatpush1.bf16.msra.mxu0 %v9780_v61  ;;  %v5817_v1 = vadd.f32 %v5816_v55, %v11014_v40  ;;  %v9798_v40 = vld [vmem:[#allocation11 + $0x5e0] ss:$24 sps:$4 sm:$0xff]   ;;  %v9818_v51 = vld [vmem:[#allocation11 + $0x554] ss:$24 sps:$4 sm:$0xff]  }
 0x767   :  { %v5818_v4 = vpop.f32.mrf.mxu1  ;;  %6161 = vmatprep.subr.bf16.mxu0 %v9788_v54  ;;  %v9843_v61 = vld [vmem:[#allocation11 + $0x760] ss:$24 sps:$4 sm:$0xff]   ;;  %v9854_v48 = vld [vmem:[#allocation11 + $0xa34] ss:$24 sps:$4 sm:$0xff]  }
 0x768   :  { %v11026_v53 = vadd.f32 %v5857_v2, %v5817_v1  ;;  %6121 = vmatpush1.bf16.msra.mxu1 %v9783_v24  ;;  %v9816_v2 = vld [vmem:[#allocation11 + $0x550] ss:$24 sps:$4 sm:$0xff]   ;;  %v9846_v54 = vld [vmem:[#allocation11 + $0xa60] ss:$24 sps:$4 sm:$0xff]   ;;  %v9860_v4 = vld [vmem:[#allocation11 + $0xa04] ss:$24 sps:$4 sm:$0xff]  }
 0x769   :  { %v5819_v6 = vpop.f32.mrf.mxu1  ;;  %6122 = vmatprep.subr.bf16.mxu1 %v9791_v60  ;;  %v9849_v24 = vld [vmem:[#allocation11 + $0x730] ss:$24 sps:$4 sm:$0xff]   ;;  %v9857_v60 = vld [vmem:[#allocation11 + $0x704] ss:$24 sps:$4 sm:$0xff]  }
 0x76a   :  { %6162 = vmatpush1.bf16.msra.mxu0 %v9786_v50  ;;  %v9852_v1 = vld [vmem:[#allocation11 + $0xa30] ss:$24 sps:$4 sm:$0xff]  }
 0x76b   :  { %6163 = vmatprep.subr.bf16.mxu0 %v9794_v9 }
 0x76c   :  { %6123 = vmatpush1.bf16.msra.mxu1 %v9789_v49  ;;  %v9863_v49 = vld [vmem:[#allocation11 + $0x6d4] ss:$24 sps:$4 sm:$0xff]  }
 0x76d   :  { %6124 = vmatprep.subr.bf16.mxu1 %v9797_v15  ;;  %v9866_v15 = vld [vmem:[#allocation11 + $0x9d4] ss:$24 sps:$4 sm:$0xff]  }
 0x76e   :  { %6164 = vmatpush1.bf16.msra.mxu0 %v9792_v34  ;;  %v9869_v34 = vld [vmem:[#allocation11 + $0x6a4] ss:$24 sps:$4 sm:$0xff]  }
 0x76f   :  { %6165 = vmatprep.subr.bf16.mxu0 %v9800_v12  ;;  %v9864_v12 = vld [vmem:[#allocation11 + $0x9d0] ss:$24 sps:$4 sm:$0xff]  }
 0x770   :  { %6125 = vmatpush2.bf16.msra.mxu1 %v9795_v58  ;;  %v9872_v58 = vld [vmem:[#allocation11 + $0x9a4] ss:$24 sps:$4 sm:$0xff]  }
 0x771   :  { %6126 = vmatprep.subr.bf16.mxu1 %v9803_v8  ;;  %v2772_v8 = vsub.s32 3, %v10673_v13 }
 0x772   :  { %6166 = vmatpush2.bf16.msra.mxu0 %v9798_v40  ;;  %v9867_v40 = vld [vmem:[#allocation11 + $0x6a0] ss:$24 sps:$4 sm:$0xff]  }
 0x773   :  { %6167 = vmatprep.subr.bf16.mxu0 %v9806_v62  ;;  %v9875_v62 = vld [vmem:[#allocation11 + $0x674] ss:$24 sps:$4 sm:$0xff]  }
 0x774   :  { %6127 = vmatpush2.bf16.msra.mxu1 %v9801_v41 }
 0x775   :  { %6128 = vmatprep.subr.bf16.mxu1 %v9809_v11  ;;  %v9870_v11 = vld [vmem:[#allocation11 + $0x9a0] ss:$24 sps:$4 sm:$0xff]  }
 0x776   :  { %6168 = vmatpush2.bf16.msra.mxu0 %v9804_v0  ;;  %v9878_v0 = vld [vmem:[#allocation11 + $0x974] ss:$24 sps:$4 sm:$0xff]  }
 0x777   :  { %6169 = vmatprep.subr.bf16.mxu0 %v9812_v5  ;;  %v2773_v5 = vrot.slane %v10993_v16, %v2772_v8  ;;  %v9935_v8 = vld [vmem:[#allocation11 + $0x794] ss:$24 sps:$4 sm:$0xff]  }
 0x778   :  { %6129 = vmatpush2.bf16.msra.mxu1 %v9807_v21  ;;  %v9873_v21 = vld [vmem:[#allocation11 + $0x670] ss:$24 sps:$4 sm:$0xff]  }
 0x779   :  { %6130 = vmatprep.subr.bf16.mxu1 %v9815_v63  ;;  %v9881_v63 = vld [vmem:[#allocation11 + $0x644] ss:$24 sps:$4 sm:$0xff]  }
 0x77a   :  { %6170 = vmatpush2.bf16.msra.mxu0 %v9810_v23 }
 0x77b   :  { %6171 = vmatprep.subr.bf16.mxu0 %v9818_v51  ;;  %v9876_v51 = vld [vmem:[#allocation11 + $0x970] ss:$24 sps:$4 sm:$0xff]  }
 0x77c   :  { %6131 = vmatpush2.bf16.msra.mxu1 %v9813_v10 }
 0x77d   :  { %6132 = vmatprep.subr.bf16.mxu1 %v9821_v25  ;;  %v9884_v25 = vld [vmem:[#allocation11 + $0x944] ss:$24 sps:$4 sm:$0xff]  }
 0x77e   :  { %6172 = vmatpush2.bf16.msra.mxu0 %v9816_v2 }
 0x77f   :  { %6173 = vmatprep.subr.bf16.mxu0 %v9824_v32 }
 0x780   :  { %6133 = vmatpush2.bf16.msra.mxu1 %v9819_v30  ;;  %v9879_v30 = vld [vmem:[#allocation11 + $0x640] ss:$24 sps:$4 sm:$0xff]  }
 0x781   :  { %6134 = vmatprep.subr.bf16.mxu1 %v9827_v19 }
 0x782   :  { %6174 = vmatpush2.bf16.msra.mxu0 %v9822_v31  ;;  %v9887_v31 = vld [vmem:[#allocation11 + $0x614] ss:$24 sps:$4 sm:$0xff]  }
 0x783   :  { %6175 = vmatprep.subr.bf16.mxu0 %v9830_v52  ;;  %v9882_v52 = vld [vmem:[#allocation11 + $0x940] ss:$24 sps:$4 sm:$0xff]  }
 0x784   :  { %6135 = vmatpush2.bf16.msra.mxu1 %v9825_v35 }
 0x785   :  { %6136 = vmatprep.subr.bf16.mxu1 %v9833_v38  ;;  %v9890_v38 = vld [vmem:[#allocation11 + $0x914] ss:$24 sps:$4 sm:$0xff]  }
 0x786   :  { %6176 = vmatpush2.bf16.msra.mxu0 %v9828_v46  ;;  %v9885_v46 = vld [vmem:[#allocation11 + $0x610] ss:$24 sps:$4 sm:$0xff]  }
 0x787   :  { %6177 = vmatprep.subr.bf16.mxu0 %v9836_v36 }
 0x788   :  { %6137 = vmatpush2.bf16.msra.mxu1 %v9831_v59  ;;  %v9893_v59 = vld [vmem:[#allocation11 + $0x8e4] ss:$24 sps:$4 sm:$0xff]  }
 0x789   :  { %6138 = vmatprep.subr.bf16.mxu1 %v9839_v20  ;;  %v9888_v20 = vld [vmem:[#allocation11 + $0x910] ss:$24 sps:$4 sm:$0xff]  }
 0x78a   :  { %6178 = vmatpush2.bf16.msra.mxu0 %v9834_v56  ;;  %v9896_v56 = vld [vmem:[#allocation11 + $0xbe4] ss:$24 sps:$4 sm:$0xff]  }
 0x78b   :  { %6179 = vmatprep.subr.bf16.mxu0 %v9842_v42  ;;  %v9891_v42 = vld [vmem:[#allocation11 + $0x8e0] ss:$24 sps:$4 sm:$0xff]  }
 0x78c   :  { %6139 = vmatpush2.bf16.msra.mxu1 %v9837_v26  ;;  %v9899_v26 = vld [vmem:[#allocation11 + $0x8b4] ss:$24 sps:$4 sm:$0xff]  }
 0x78d   :  { %6190 = vmatprep.subr.bf16.mxu1 %v9845_v22  ;;  %v9894_v22 = vld [vmem:[#allocation11 + $0xbe0] ss:$24 sps:$4 sm:$0xff]  }
 0x78e   :  { %6180 = vmatpush2.bf16.msra.mxu0 %v9840_v47  ;;  %v9902_v47 = vld [vmem:[#allocation11 + $0xbb4] ss:$24 sps:$4 sm:$0xff]  }
 0x78f   :  { %6141 = vmatmul.mubr.bf16.vlgmr.msra.gmra.mxu1 %v10772_v57  ;;  %6231 = vmatprep.subr.bf16.mxu0 %v9848_v27  ;;  %v9855_v57 = vld [vmem:[#allocation11 + $0x700] ss:$24 sps:$4 sm:$0xff]   ;;  %v9897_v27 = vld [vmem:[#allocation11 + $0x8b0] ss:$24 sps:$4 sm:$0xff]  }
 0x790   :  { %6191 = vmatpush1.bf16.msra.mxu1 %v9843_v61  ;;  %6222 = vmatprep.mubr.bf16.mxu1 %v10817_v37  ;;  %v9858_v37 = vld [vmem:[#allocation11 + $0xa00] ss:$24 sps:$4 sm:$0xff]   ;;  %v9905_v61 = vld [vmem:[#allocation11 + $0x884] ss:$24 sps:$4 sm:$0xff]  }
 0x791   :  { %v5896_v55 = vpop.f32.mrf.mxu0  ;;  %6182 = vmatmul.mubr.bf16.vlgmr.msra.gmra.mxu0 %v10783_v7  ;;  %6192 = vmatprep.subr.bf16.mxu1 %v9851_v45  ;;  %v9861_v7 = vld [vmem:[#allocation11 + $0x6d0] ss:$24 sps:$4 sm:$0xff]  }
 0x792   :  { %6232 = vmatpush1.bf16.msra.mxu0 %v9846_v54  ;;  %6263 = vmatprep.mubr.bf16.mxu0 %v10831_v3  ;;  %v2768_v3 = vsub.s32 2, %v10673_v13  ;;  %v9900_v45 = vld [vmem:[#allocation11 + $0xbb0] ss:$24 sps:$4 sm:$0xff]   ;;  %v9908_v54 = vld [vmem:[#allocation11 + $0xb84] ss:$24 sps:$4 sm:$0xff]  }
 0x793   :  { %v5898_v50 = vpop.f32.mrf.mxu0  ;;  %6233 = vmatprep.subr.bf16.mxu0 %v9854_v48  ;;  %v9903_v48 = vld [vmem:[#allocation11 + $0x880] ss:$24 sps:$4 sm:$0xff]  }
 0x794   :  { %6193 = vmatpush1.bf16.msra.mxu1 %v9849_v24  ;;  %v2769_v41 = vrot.slane %v10993_v16, %v2768_v3  ;;  %v5899_v2 = vadd.f32 %v5898_v50, %v2773_v5  ;;  %v9911_v24 = vld [vmem:[#allocation11 + $0x854] ss:$24 sps:$4 sm:$0xff]   ;;  %v9917_v50 = vld [vmem:[#allocation11 + $0x824] ss:$24 sps:$4 sm:$0xff]  }
 0x795   :  { %v5900_v9 = vpop.f32.mrf.mxu0  ;;  %6194 = vmatprep.subr.bf16.mxu1 %v9857_v60  ;;  %v9914_v60 = vld [vmem:[#allocation11 + $0xb54] ss:$24 sps:$4 sm:$0xff]   ;;  %v9944_v5 = vld [vmem:[#allocation11 + $0x1064] ss:$24 sps:$4 sm:$0xff]  }
 0x796   :  { %6234 = vmatpush1.bf16.msra.mxu0 %v9852_v1  ;;  %v5897_v23 = vadd.f32 %v5896_v55, %v2769_v41  ;;  %v9906_v55 = vld [vmem:[#allocation11 + $0xb80] ss:$24 sps:$4 sm:$0xff]   ;;  %v9909_v1 = vld [vmem:[#allocation11 + $0x850] ss:$24 sps:$4 sm:$0xff]  }
 0x797   :  { %v5901_v6 = vpop.f32.mrf.mxu0  ;;  %6235 = vmatprep.subr.bf16.mxu0 %v9860_v4  ;;  %v9912_v4 = vld [vmem:[#allocation11 + $0xb50] ss:$24 sps:$4 sm:$0xff]   ;;  %v9915_v9 = vld [vmem:[#allocation11 + $0x820] ss:$24 sps:$4 sm:$0xff]  }
 0x798   :  { %6195 = vmatpush1.bf16.msra.mxu1 %v9855_v57  ;;  %v9920_v57 = vld [vmem:[#allocation11 + $0xb24] ss:$24 sps:$4 sm:$0xff]   ;;  %v9926_v6 = vld [vmem:[#allocation11 + $0xaf4] ss:$24 sps:$4 sm:$0xff]   ;;  %v9933_v41 = vld [vmem:[#allocation11 + $0x790] ss:$24 sps:$4 sm:$0xff]  }
 0x799   :  { %6196 = vmatprep.subr.bf16.mxu1 %v9863_v49  ;;  %v9923_v49 = vld [vmem:[#allocation11 + $0x7f4] ss:$24 sps:$4 sm:$0xff]  }
 0x79a   :  { %6236 = vmatpush1.bf16.msra.mxu0 %v9858_v37  ;;  %v9918_v37 = vld [vmem:[#allocation11 + $0xb20] ss:$24 sps:$4 sm:$0xff]  }
 0x79b   :  { %6237 = vmatprep.subr.bf16.mxu0 %v9866_v15  ;;  %v9921_v15 = vld [vmem:[#allocation11 + $0x7f0] ss:$24 sps:$4 sm:$0xff]  }
 0x79c   :  { %6197 = vmatpush1.bf16.msra.mxu1 %v9861_v7  ;;  %v9929_v7 = vld [vmem:[#allocation11 + $0x7c4] ss:$24 sps:$4 sm:$0xff]  }
 0x79d   :  { %6198 = vmatprep.subr.bf16.mxu1 %v9869_v34  ;;  %v9924_v34 = vld [vmem:[#allocation11 + $0xaf0] ss:$24 sps:$4 sm:$0xff]  }
 0x79e   :  { %6238 = vmatpush1.bf16.msra.mxu0 %v9864_v12  ;;  %v9932_v12 = vld [vmem:[#allocation11 + $0xac4] ss:$24 sps:$4 sm:$0xff]  }
 0x79f   :  { %6239 = vmatprep.subr.bf16.mxu0 %v9872_v58  ;;  %v9927_v58 = vld [vmem:[#allocation11 + $0x7c0] ss:$24 sps:$4 sm:$0xff]  }
 0x7a0   :  { %6199 = vmatpush1.bf16.msra.mxu1 %v9867_v40  ;;  %v9930_v40 = vld [vmem:[#allocation11 + $0xac0] ss:$24 sps:$4 sm:$0xff]  }
 0x7a1   :  { %6200 = vmatprep.subr.bf16.mxu1 %v9875_v62  ;;  %v9938_v62 = vld [vmem:[#allocation11 + $0xa94] ss:$24 sps:$4 sm:$0xff]  }
 0x7a2   :  { %6240 = vmatpush1.bf16.msra.mxu0 %v9870_v11  ;;  %v9941_v11 = vld [vmem:[#allocation11 + $0xd64] ss:$24 sps:$4 sm:$0xff]  }
 0x7a3   :  { %v5937_v10 = vpop.f32.mrf.mxu1  ;;  %6241 = vmatprep.subr.bf16.mxu0 %v9878_v0  ;;  %v9936_v0 = vld [vmem:[#allocation11 + $0xa90] ss:$24 sps:$4 sm:$0xff]  }
 0x7a4   :  { %v11038_v32 = vadd.f32 %v5937_v10, %v5897_v23  ;;  %6201 = vmatpush1.bf16.msra.mxu1 %v9873_v21  ;;  %v9939_v21 = vld [vmem:[#allocation11 + $0xd60] ss:$24 sps:$4 sm:$0xff]   ;;  %v9945_v10 = vld [vmem:[#allocation11 + $0xd30] ss:$24 sps:$4 sm:$0xff]  }
 0x7a5   :  { %v5939_v19 = vpop.f32.mrf.mxu1  ;;  %6202 = vmatprep.subr.bf16.mxu1 %v9881_v63  ;;  %v9947_v63 = vld [vmem:[#allocation11 + $0xd34] ss:$24 sps:$4 sm:$0xff]   ;;  %v9942_v23 = vld [vmem:[#allocation11 + $0x1060] ss:$24 sps:$4 sm:$0xff]  }
 0x7a6   :  { %6242 = vmatpush1.bf16.msra.mxu0 %v9876_v51  ;;  %v11040_v16 = vadd.f32 %v5939_v19, %v5899_v2  ;;  %v9950_v51 = vld [vmem:[#allocation11 + $0x1034] ss:$24 sps:$4 sm:$0xff]   ;;  %v9953_v2 = vld [vmem:[#allocation11 + $0xd04] ss:$24 sps:$4 sm:$0xff]   ;;  %v9948_v19 = vld [vmem:[#allocation11 + $0x1030] ss:$24 sps:$4 sm:$0xff]  }
 0x7a7   :  { %v5941_v35 = vpop.f32.mrf.mxu1  ;;  %6243 = vmatprep.subr.bf16.mxu0 %v9884_v25 }
 0x7a8   :  { %6203 = vmatpush1.bf16.msra.mxu1 %v9879_v30  ;;  %v9959_v35 = vld [vmem:[#allocation11 + $0xcd4] ss:$24 sps:$4 sm:$0xff]  }
 0x7a9   :  { %v5942_v36 = vpop.f32.mrf.mxu1  ;;  %6204 = vmatprep.subr.bf16.mxu1 %v9887_v31 }
 0x7aa   :  { %6244 = vmatpush1.bf16.msra.mxu0 %v9882_v52  ;;  %v9951_v52 = vld [vmem:[#allocation11 + $0xd00] ss:$24 sps:$4 sm:$0xff]   ;;  %v9965_v36 = vld [vmem:[#allocation11 + $0xca4] ss:$24 sps:$4 sm:$0xff]  }
 0x7ab   :  { %6245 = vmatprep.subr.bf16.mxu0 %v9890_v38 }
 0x7ac   :  { %6205 = vmatpush1.bf16.msra.mxu1 %v9885_v46  ;;  %v9962_v46 = vld [vmem:[#allocation11 + $0xfd4] ss:$24 sps:$4 sm:$0xff]  }
 0x7ad   :  { %6206 = vmatprep.subr.bf16.mxu1 %v9893_v59  ;;  %v9968_v59 = vld [vmem:[#allocation11 + $0xfa4] ss:$24 sps:$4 sm:$0xff]  }
 0x7ae   :  { %6246 = vmatpush1.bf16.msra.mxu0 %v9888_v20  ;;  %v9963_v20 = vld [vmem:[#allocation11 + $0xca0] ss:$24 sps:$4 sm:$0xff]  }
 0x7af   :  { %6247 = vmatprep.subr.bf16.mxu0 %v9896_v56  ;;  %v9971_v56 = vld [vmem:[#allocation11 + $0xc74] ss:$24 sps:$4 sm:$0xff]  }
 0x7b0   :  { %6207 = vmatpush2.bf16.msra.mxu1 %v9891_v42  ;;  %v9966_v42 = vld [vmem:[#allocation11 + $0xfa0] ss:$24 sps:$4 sm:$0xff]  }
 0x7b1   :  { %6208 = vmatprep.subr.bf16.mxu1 %v9899_v26  ;;  %v9974_v26 = vld [vmem:[#allocation11 + $0xf74] ss:$24 sps:$4 sm:$0xff]  }
 0x7b2   :  { %6248 = vmatpush2.bf16.msra.mxu0 %v9894_v22  ;;  %v9969_v22 = vld [vmem:[#allocation11 + $0xc70] ss:$24 sps:$4 sm:$0xff]  }
 0x7b3   :  { %6249 = vmatprep.subr.bf16.mxu0 %v9902_v47  ;;  %v9977_v47 = vld [vmem:[#allocation11 + $0xc44] ss:$24 sps:$4 sm:$0xff]  }
 0x7b4   :  { %6209 = vmatpush2.bf16.msra.mxu1 %v9897_v27  ;;  %v9972_v27 = vld [vmem:[#allocation11 + $0xf70] ss:$24 sps:$4 sm:$0xff]  }
 0x7b5   :  { %6210 = vmatprep.subr.bf16.mxu1 %v9905_v61 }
 0x7b6   :  { %6250 = vmatpush2.bf16.msra.mxu0 %v9900_v45  ;;  %v9980_v45 = vld [vmem:[#allocation11 + $0xf44] ss:$24 sps:$4 sm:$0xff]  }
 0x7b7   :  { %6251 = vmatprep.subr.bf16.mxu0 %v9908_v54 }
 0x7b8   :  { %6211 = vmatpush2.bf16.msra.mxu1 %v9903_v48  ;;  %v9975_v48 = vld [vmem:[#allocation11 + $0xc40] ss:$24 sps:$4 sm:$0xff]  }
 0x7b9   :  { %6212 = vmatprep.subr.bf16.mxu1 %v9911_v24 }
 0x7ba   :  { %6252 = vmatpush2.bf16.msra.mxu0 %v9906_v55  ;;  %v9983_v55 = vld [vmem:[#allocation11 + $0xc14] ss:$24 sps:$4 sm:$0xff]  }
 0x7bb   :  { %6253 = vmatprep.subr.bf16.mxu0 %v9914_v60  ;;  %v9978_v60 = vld [vmem:[#allocation11 + $0xf40] ss:$24 sps:$4 sm:$0xff]  }
 0x7bc   :  { %6213 = vmatpush2.bf16.msra.mxu1 %v9909_v1 }
 0x7bd   :  { %6214 = vmatprep.subr.bf16.mxu1 %v9917_v50  ;;  %v9986_v50 = vld [vmem:[#allocation11 + $0xf14] ss:$24 sps:$4 sm:$0xff]  }
 0x7be   :  { %6254 = vmatpush2.bf16.msra.mxu0 %v9912_v4  ;;  %v9981_v4 = vld [vmem:[#allocation11 + $0xc10] ss:$24 sps:$4 sm:$0xff]  }
 0x7bf   :  { %6255 = vmatprep.subr.bf16.mxu0 %v9920_v57 }
 0x7c0   :  { %6215 = vmatpush2.bf16.msra.mxu1 %v9915_v9  ;;  %v9989_v9 = vld [vmem:[#allocation11 + $0xee4] ss:$24 sps:$4 sm:$0xff]  }
 0x7c1   :  { %6216 = vmatprep.subr.bf16.mxu1 %v9923_v49  ;;  %v9984_v49 = vld [vmem:[#allocation11 + $0xf10] ss:$24 sps:$4 sm:$0xff]  }
 0x7c2   :  { %6256 = vmatpush2.bf16.msra.mxu0 %v9918_v37  ;;  %v9990_v37 = vld [vmem:[#allocation11 + $0x10f4] ss:$24 sps:$4 sm:$0x7f]  }
 0x7c3   :  { %6257 = vmatprep.subr.bf16.mxu0 %v9926_v6  ;;  %v9992_v6 = vld [vmem:[#allocation11 + $0x10f0] ss:$24 sps:$4 sm:$0x7f]  }
 0x7c4   :  { %6217 = vmatpush2.bf16.msra.mxu1 %v9921_v15  ;;  %v9987_v15 = vld [vmem:[#allocation11 + $0xee0] ss:$24 sps:$4 sm:$0xff]  }
 0x7c5   :  { %6218 = vmatprep.subr.bf16.mxu1 %v9929_v7  ;;  %v9995_v7 = vld [vmem:[#allocation11 + $0xeb4] ss:$24 sps:$4 sm:$0xff]  }
 0x7c6   :  { %6258 = vmatpush2.bf16.msra.mxu0 %v9924_v34  ;;  %v5611_v34 = vsel %vm1413_vm1, %v9992_v6, 0 }
 0x7c7   :  { %6259 = vmatprep.subr.bf16.mxu0 %v9932_v12  ;;  %v9998_v12 = vld [vmem:[#allocation11 + $0x10c4] ss:$24 sps:$4 sm:$0xff]  }
 0x7c8   :  { %6219 = vmatpush2.bf16.msra.mxu1 %v9927_v58  ;;  %v9993_v58 = vld [vmem:[#allocation11 + $0xeb0] ss:$24 sps:$4 sm:$0xff]  }
 0x7c9   :  { %6220 = vmatprep.subr.bf16.mxu1 %v9935_v8  ;;  %v10001_v8 = vld [vmem:[#allocation11 + $0xe84] ss:$24 sps:$4 sm:$0xff]  }
 0x7ca   :  { %6260 = vmatpush2.bf16.msra.mxu0 %v9930_v40  ;;  %v9996_v40 = vld [vmem:[#allocation11 + $0x10c0] ss:$24 sps:$4 sm:$0xff]  }
 0x7cb   :  { %6261 = vmatprep.subr.bf16.mxu0 %v9938_v62  ;;  %v10004_v62 = vld [vmem:[#allocation11 + $0x1094] ss:$24 sps:$4 sm:$0xff]  }
 0x7cc   :  { %6221 = vmatpush2.bf16.msra.mxu1 %v9933_v41  ;;  %v9999_v41 = vld [vmem:[#allocation11 + $0xe80] ss:$24 sps:$4 sm:$0xff]  }
 0x7cd   :  { %6272 = vmatprep.subr.bf16.mxu1 %v9941_v11  ;;  %v10007_v11 = vld [vmem:[#allocation11 + $0xe54] ss:$24 sps:$4 sm:$0xff]  }
 0x7ce   :  { %6262 = vmatpush2.bf16.msra.mxu0 %v9936_v0  ;;  %v10002_v0 = vld [vmem:[#allocation11 + $0x1090] ss:$24 sps:$4 sm:$0xff]  }
 0x7cf   :  { %6223 = vmatmul.mubr.bf16.vlgmr.msra.gmra.mxu1 %v10960_v39  ;;  %6313 = vmatprep.subr.bf16.mxu0 %v9944_v5  ;;  %v9956_v39 = vld [vmem:[#allocation11 + $0x1004] ss:$24 sps:$4 sm:$0xff]  }
 0x7d0   :  { %6273 = vmatpush1.bf16.msra.mxu1 %v9939_v21  ;;  %6304 = vmatprep.mubr.bf16.mxu1 %v10963_v43  ;;  %v10010_v5 = vld [vmem:[#allocation14 + $0xac] ss:$12 sps:$4 sm:$0xff]   ;;  %v6355_v21 = vmax.f32 %v11026_v53, 0.0  ;;  %v10014_v53 = vld [vmem:[#allocation14 + $0x90] ss:$12 sps:$4 sm:$0xff]  }
 0x7d1   :  { %v5978_v25 = vpop.f32.mrf.mxu0  ;;  %6264 = vmatmul.mubr.bf16.vlgmr.msra.gmra.mxu0 %v10966_v28  ;;  %6274 = vmatprep.subr.bf16.mxu1 %v9947_v63  ;;  %v9954_v28 = vld [vmem:[#allocation11 + $0x1000] ss:$24 sps:$4 sm:$0xff]   ;;  %v10005_v63 = vld [vmem:[#allocation11 + $0xe50] ss:$24 sps:$4 sm:$0xff]  }
 0x7d2   :  { %v5979_v30 = vadd.f32 %v5978_v25, %v11038_v32  ;;  %6314 = vmatpush1.bf16.msra.mxu0 %v9942_v23  ;;  %8591 = vmatprep.mubr.msk.bf16.mxu0 %vm192_vm0, %v10969_v33  ;;  %v9957_v32 = vld [vmem:[#allocation11 + $0xcd0] ss:$24 sps:$4 sm:$0xff]   ;;  %v10013_v23 = vld [vmem:[#allocation11 + $0xe24] ss:$24 sps:$4 sm:$0xff]   ;;  %v11057_v25 = vpack.c.bf16 %v6355_v21, %v6355_v21  ;;  %vm10555_vm0 = vmmov 0  }
 0x7d3   :  { %v11048_v31 = vpop.f32.mrf.mxu0  ;;  %6315 = vmatprep.subr.bf16.mxu0 %v9950_v51  ;;  %v9960_v33 = vld [vmem:[#allocation11 + $0xfd0] ss:$24 sps:$4 sm:$0xff]  }
 0x7d4   :  { %6275 = vmatpush1.bf16.msra.mxu1 %v9945_v10  ;;  %v10008_v51 = vld [vmem:[#allocation14 + $0xa8] ss:$12 sps:$4 sm:$0xff]   ;;  %v10065_v21 = vld [vmem:[#allocation14 + $0x138] ss:$12 sps:$4 sm:$0xff]  }
 0x7d5   :  { %v5982_v43 = vpop.f32.mrf.mxu0  ;;  %6276 = vmatprep.subr.bf16.mxu1 %v9953_v2  ;;  %v10016_v10 = vld [vmem:[#allocation14 + $0x94] ss:$12 sps:$4 sm:$0xff]  }
 0x7d6   :  { %6316 = vmatpush1.bf16.msra.mxu0 %v9948_v19  ;;  %v10011_v2 = vld [vmem:[#allocation11 + $0xe20] ss:$24 sps:$4 sm:$0xff]  }
 0x7d7   :  { %v5983_v38 = vpop.f32.mrf.mxu0  ;;  %6317 = vmatprep.subr.bf16.mxu0 %v9956_v39  ;;  %v10022_v19 = vld [vmem:[#allocation14 + $0x7c] ss:$12 sps:$4 sm:$0xff]   ;;  %v10020_v43 = vld [vmem:[#allocation14 + $0x78] ss:$12 sps:$4 sm:$0xff]  }
 0x7d8   :  { %6277 = vmatpush1.bf16.msra.mxu1 %v9951_v52  ;;  %v10017_v39 = vld [vmem:[#allocation11 + $0xdf0] ss:$24 sps:$4 sm:$0xff]   ;;  %v10025_v52 = vld [vmem:[#allocation11 + $0xdc4] ss:$24 sps:$4 sm:$0xff]  }
 0x7d9   :  { %6278 = vmatprep.subr.bf16.mxu1 %v9959_v35  ;;  %v10028_v35 = vld [vmem:[#allocation14 + $0x64] ss:$12 sps:$4 sm:$0xff]   ;;  %v10026_v38 = vld [vmem:[#allocation14 + $0x60] ss:$12 sps:$4 sm:$0xff]  }
 0x7da   :  { %6318 = vmatpush1.bf16.msra.mxu0 %v9954_v28  ;;  %v10023_v28 = vld [vmem:[#allocation11 + $0xdc0] ss:$24 sps:$4 sm:$0xff]  }
 0x7db   :  { %6319 = vmatprep.subr.bf16.mxu0 %v9962_v46  ;;  %v10034_v46 = vld [vmem:[#allocation14 + $0x4c] ss:$12 sps:$4 sm:$0xff]  }
 0x7dc   :  { %6279 = vmatpush1.bf16.msra.mxu1 %v9957_v32  ;;  %v10029_v32 = vld [vmem:[#allocation11 + $0xd90] ss:$24 sps:$4 sm:$0xff]  }
 0x7dd   :  { %6280 = vmatprep.subr.bf16.mxu1 %v9965_v36  ;;  %v10040_v36 = vld [vmem:[#allocation14 + $0x22c] ss:$12 sps:$4 sm:$0xff]  }
 0x7de   :  { %6320 = vmatpush1.bf16.msra.mxu0 %v9960_v33  ;;  %v10032_v33 = vld [vmem:[#allocation14 + $0x48] ss:$12 sps:$4 sm:$0xff]  }
 0x7df   :  { %6321 = vmatprep.subr.bf16.mxu0 %v9968_v59  ;;  %v10037_v59 = vld [vmem:[#allocation14 + $0x34] ss:$12 sps:$4 sm:$0xff]  }
 0x7e0   :  { %6281 = vmatpush1.bf16.msra.mxu1 %v9963_v20  ;;  %v10038_v20 = vld [vmem:[#allocation14 + $0x228] ss:$12 sps:$4 sm:$0xff]  }
 0x7e1   :  { %6282 = vmatprep.subr.bf16.mxu1 %v9971_v56  ;;  %v10046_v56 = vld [vmem:[#allocation14 + $0x214] ss:$12 sps:$4 sm:$0xff]  }
 0x7e2   :  { %6322 = vmatpush1.bf16.msra.mxu0 %v9966_v42  ;;  %v10035_v42 = vld [vmem:[#allocation14 + $0x30] ss:$12 sps:$4 sm:$0xff]  }
 0x7e3   :  { %v6019_v61 = vpop.f32.mrf.mxu1  ;;  %6323 = vmatprep.subr.bf16.mxu0 %v9974_v26 }
 0x7e4   :  { %v11050_v54 = vadd.f32 %v6019_v61, %v5979_v30  ;;  %6283 = vmatpush1.bf16.msra.mxu1 %v9969_v22  ;;  %v10019_v30 = vld [vmem:[#allocation11 + $0xdf4] ss:$24 sps:$4 sm:$0xff]  }
 0x7e5   :  { %v11052_v24 = vpop.f32.mrf.mxu1  ;;  %6284 = vmatprep.subr.bf16.mxu1 %v9977_v47  ;;  %v10043_v22 = vld [vmem:[#allocation14 + $0x1c] ss:$12 sps:$4 sm:$0xff]   ;;  %v5981_v47 = vadd.f32 %v11048_v31, %v11040_v16  ;;  %v10058_v31 = vld [vmem:[#allocation14 + $0x1e4] ss:$12 sps:$4 sm:$0xff]  }
 0x7e6   :  { %6324 = vmatpush1.bf16.msra.mxu0 %v9972_v27  ;;  %v10044_v27 = vld [vmem:[#allocation14 + $0x210] ss:$12 sps:$4 sm:$0xff]  }
 0x7e7   :  { %v6023_v1 = vpop.f32.mrf.mxu1  ;;  %6325 = vmatprep.subr.bf16.mxu0 %v9980_v45 }
 0x7e8   :  { %6285 = vmatpush1.bf16.msra.mxu1 %v9975_v48  ;;  %v10052_v48 = vld [vmem:[#allocation14 + $0x1fc] ss:$12 sps:$4 sm:$0xff]  }
 0x7e9   :  { %v6024_v57 = vpop.f32.mrf.mxu1  ;;  %6286 = vmatprep.subr.bf16.mxu1 %v9983_v55  ;;  %v6022_v55 = vadd.f32 %v11052_v24, %v5981_v47  ;;  %v10148_v47 = vld [vmem:[#allocation14 + $0x3a8] ss:$12 sps:$4 sm:$0xff]  }
 0x7ea   :  { %6326 = vmatpush1.bf16.msra.mxu0 %v9978_v60  ;;  %v10041_v60 = vld [vmem:[#allocation14 + $0x18] ss:$12 sps:$4 sm:$0xff]  }
 0x7eb   :  { %6327 = vmatprep.subr.bf16.mxu0 %v9986_v50  ;;  %v10050_v57 = vld [vmem:[#allocation14 + $0x1f8] ss:$12 sps:$4 sm:$0xff]  }
 0x7ec   :  { %6287 = vmatpush1.bf16.msra.mxu1 %v9981_v4 }
 0x7ed   :  { %6288 = vmatprep.subr.bf16.mxu1 %v9989_v9 }
 0x7ee   :  { %6328 = vmatpush1.bf16.msra.mxu0 %v9984_v49 }
 0x7ef   :  { %8590 = vmatprep.subr.msk.bf16.mxu0 %vm1413_vm1, %v9990_v37  ;;  %v10047_v37 = vld [vmem:[#allocation14] ss:$12 sps:$4 sm:$0xff]   ;;  %vm7784_vm1 = vcmask 9216  }
 0x7f0   :  { %6289 = vmatpush2.bf16.msra.mxu1 %v9987_v15  ;;  %v10055_v15 = vld [vmem:[#allocation14 + $0x16c] ss:$12 sps:$4 sm:$0xff]  }
 0x7f1   :  { %6290 = vmatprep.subr.bf16.mxu1 %v9995_v7  ;;  %v10056_v7 = vld [vmem:[#allocation14 + $0x1e0] ss:$12 sps:$4 sm:$0xff]  }
 0x7f2   :  { %6340 = vmatpush2.bf16.msra.mxu0 %v5611_v34  ;;  %v10064_v34 = vld [vmem:[#allocation14 + $0x1cc] ss:$12 sps:$4 sm:$0xff]  }
 0x7f3   :  { %6341 = vmatprep.subr.bf16.mxu0 %v9998_v12 }
 0x7f4   :  { %6291 = vmatpush2.bf16.msra.mxu1 %v9993_v58  ;;  %v10053_v58 = vld [vmem:[#allocation14 + $0x168] ss:$12 sps:$4 sm:$0xff]  }
 0x7f5   :  { %6292 = vmatprep.subr.bf16.mxu1 %v10001_v8  ;;  %v10061_v8 = vld [vmem:[#allocation14 + $0x154] ss:$12 sps:$4 sm:$0xff]  }
 0x7f6   :  { %6342 = vmatpush2.bf16.msra.mxu0 %v9996_v40  ;;  %v10062_v40 = vld [vmem:[#allocation14 + $0x1c8] ss:$12 sps:$4 sm:$0xff]  }
 0x7f7   :  { %6343 = vmatprep.subr.bf16.mxu0 %v10004_v62  ;;  %v10070_v62 = vld [vmem:[#allocation14 + $0x1b4] ss:$12 sps:$4 sm:$0xff]  }
 0x7f8   :  { %6293 = vmatpush2.bf16.msra.mxu1 %v9999_v41  ;;  %v10059_v41 = vld [vmem:[#allocation14 + $0x150] ss:$12 sps:$4 sm:$0xff]  }
 0x7f9   :  { %6294 = vmatprep.subr.bf16.mxu1 %v10007_v11  ;;  %v10067_v11 = vld [vmem:[#allocation14 + $0x13c] ss:$12 sps:$4 sm:$0xff]  }
 0x7fa   :  { %6344 = vmatpush2.bf16.msra.mxu0 %v10002_v0  ;;  %v10068_v0 = vld [vmem:[#allocation14 + $0x1b0] ss:$12 sps:$4 sm:$0xff]  }
 0x7fb   :  { %7343 = vmatprep.subr.bf16.mxu0 %v10010_v5  ;;  %v10076_v5 = vld [vmem:[#allocation14 + $0x19c] ss:$12 sps:$4 sm:$0xff]  }
 0x7fc   :  { %6295 = vmatpush2.bf16.msra.mxu1 %v10005_v63  ;;  %v10073_v63 = vld [vmem:[#allocation14 + $0x124] ss:$12 sps:$4 sm:$0xff]  }
 0x7fd   :  { %6346 = vmatmul.mubr.bf16.vlgmr.msra.gmra.mxu0 %v10981_v29  ;;  %6296 = vmatprep.subr.bf16.mxu1 %v10013_v23  ;;  %v10031_v29 = vld [vmem:[#allocation11 + $0xd94] ss:$24 sps:$4 sm:$0xff]  }
 0x7fe   :  { %7344 = vmatpush1.bf16.msra.mxu0 %v10008_v51  ;;  %7375 = vmatprep.mubr.bf16.mxu0 %v11057_v25  ;;  %v10074_v23 = vld [vmem:[#allocation14 + $0x198] ss:$12 sps:$4 sm:$0xff]  }
 0x7ff   :  { %7345 = vmatprep.subr.bf16.mxu0 %v10016_v10  ;;  %v10082_v51 = vld [vmem:[#allocation14 + $0x184] ss:$12 sps:$4 sm:$0xff]   ;;  %v10071_v10 = vld [vmem:[#allocation14 + $0x120] ss:$12 sps:$4 sm:$0xff]  }
 0x800   :  { %6297 = vmatpush2.bf16.msra.mxu1 %v10011_v2  ;;  %v10079_v2 = vld [vmem:[#allocation14 + $0x10c] ss:$12 sps:$4 sm:$0xff]  }
 0x801   :  { %6298 = vmatprep.subr.bf16.mxu1 %v10019_v30  ;;  %v10080_v30 = vld [vmem:[#allocation14 + $0x180] ss:$12 sps:$4 sm:$0xff]  }
 0x802   :  { %7346 = vmatpush1.bf16.msra.mxu0 %v10014_v53  ;;  %v10088_v53 = vld [vmem:[#allocation14 + $0x2ec] ss:$12 sps:$4 sm:$0xff]  }
 0x803   :  { %7347 = vmatprep.subr.bf16.mxu0 %v10022_v19  ;;  %v10077_v19 = vld [vmem:[#allocation14 + $0x108] ss:$12 sps:$4 sm:$0xff]  }
 0x804   :  { %6299 = vmatpush2.bf16.msra.mxu1 %v10017_v39  ;;  %v10085_v39 = vld [vmem:[#allocation14 + $0xf4] ss:$12 sps:$4 sm:$0xff]  }
 0x805   :  { %6300 = vmatprep.subr.bf16.mxu1 %v10025_v52  ;;  %v10086_v52 = vld [vmem:[#allocation14 + $0x2e8] ss:$12 sps:$4 sm:$0xff]  }
 0x806   :  { %7348 = vmatpush1.bf16.msra.mxu0 %v10020_v43  ;;  %v10094_v43 = vld [vmem:[#allocation14 + $0x2d4] ss:$12 sps:$4 sm:$0xff]  }
 0x807   :  { %7349 = vmatprep.subr.bf16.mxu0 %v10028_v35  ;;  %v10083_v35 = vld [vmem:[#allocation14 + $0xf0] ss:$12 sps:$4 sm:$0xff]  }
 0x808   :  { %6301 = vmatpush2.bf16.msra.mxu1 %v10023_v28  ;;  %v10091_v28 = vld [vmem:[#allocation14 + $0xdc] ss:$12 sps:$4 sm:$0xff]  }
 0x809   :  { %6302 = vmatprep.subr.bf16.mxu1 %v10031_v29  ;;  %v10092_v29 = vld [vmem:[#allocation14 + $0x2d0] ss:$12 sps:$4 sm:$0xff]  }
 0x80a   :  { %7350 = vmatpush1.bf16.msra.mxu0 %v10026_v38  ;;  %v10100_v38 = vld [vmem:[#allocation14 + $0x2bc] ss:$12 sps:$4 sm:$0xff]  }
 0x80b   :  { %7351 = vmatprep.subr.bf16.mxu0 %v10034_v46  ;;  %v10089_v46 = vld [vmem:[#allocation14 + $0xd8] ss:$12 sps:$4 sm:$0xff]  }
 0x80c   :  { %6303 = vmatpush2.bf16.msra.mxu1 %v10029_v32  ;;  %v10097_v32 = vld [vmem:[#allocation14 + $0xc4] ss:$12 sps:$4 sm:$0xff]  }
 0x80d   :  { %7384 = vmatprep.subr.bf16.mxu1 %v10040_v36  ;;  %v10098_v36 = vld [vmem:[#allocation14 + $0x2b8] ss:$12 sps:$4 sm:$0xff]  }
 0x80e   :  { %7352 = vmatpush1.bf16.msra.mxu0 %v10032_v33  ;;  %v10103_v33 = vld [vmem:[#allocation14 + $0x2a4] ss:$12 sps:$4 sm:$0xff]  }
 0x80f   :  { %v11061_v26 = vpop.f32.mrf.mxu1  ;;  %6305 = vmatmul.mubr.bf16.vlgmr.msra.gmra.mxu1 %v10987_v14  ;;  %7353 = vmatprep.subr.bf16.mxu0 %v10037_v59  ;;  %v10049_v14 = vld [vmem:[#allocation14 + $0x4] ss:$12 sps:$4 sm:$0xff]   ;;  %v10095_v59 = vld [vmem:[#allocation14 + $0xc0] ss:$12 sps:$4 sm:$0xff]  }
 0x810   :  { %7385 = vmatpush1.bf16.msra.mxu1 %v10038_v20  ;;  %v6354_v20 = vmax.f32 %v11023_v44, 0.0  ;;  %v10151_v44 = vld [vmem:[#allocation14 + $0x390] ss:$12 sps:$4 sm:$0xff]  }
 0x811   :  { %v11066_v61 = vpop.f32.mrf.mxu0  ;;  %v6103_v45 = vpop.f32.mrf.mxu1  ;;  %7386 = vmatprep.subr.bf16.mxu1 %v10046_v56  ;;  %v10150_v56 = vld [vmem:[#allocation14 + $0x3ac] ss:$12 sps:$4 sm:$0xff]  }
 0x812   :  { %7354 = vmatpush1.bf16.msra.mxu0 %v10035_v42  ;;  %v10101_v42 = vld [vmem:[#allocation14 + $0x2a0] ss:$12 sps:$4 sm:$0xff]  }
 0x813   :  { %v6062_v1 = vpop.f32.mrf.mxu0  ;;  %v6105_v50 = vpop.f32.mrf.mxu1  ;;  %7355 = vmatprep.subr.bf16.mxu0 %v10043_v22  ;;  %v10106_v22 = vld [vmem:[#allocation14 + $0x28c] ss:$12 sps:$4 sm:$0xff]  }
 0x814   :  { %v6063_v4 = vadd.f32 %v6062_v1, %v6022_v55  ;;  %7387 = vmatpush1.bf16.msra.mxu1 %v10044_v27  ;;  %v11073_v27 = vpack.c.bf16 %v6354_v20, %v6354_v20  ;;  %v10109_v55 = vld [vmem:[#allocation14 + $0x274] ss:$12 sps:$4 sm:$0xff]   ;;  %v10107_v1 = vld [vmem:[#allocation14 + $0x270] ss:$12 sps:$4 sm:$0xff]   ;;  %v6061_v50 = vadd.f32 %v11066_v61, %v11050_v54  ;;  %v2776_v54 = vsub.s32 4, %v10673_v13 }
 0x815   :  { %v6064_v9 = vpop.f32.mrf.mxu0  ;;  %v6106_v16 = vpop.f32.mrf.mxu1  ;;  %7388 = vmatprep.subr.bf16.mxu1 %v10052_v48  ;;  %v10104_v48 = vld [vmem:[#allocation14 + $0x288] ss:$12 sps:$4 sm:$0xff]  }
 0x816   :  { %v6104_v49 = vadd.f32 %v6103_v45, %v6063_v4  ;;  %7356 = vmatpush1.bf16.msra.mxu0 %v10041_v60  ;;  %v10153_v45 = vld [vmem:[#allocation14 + $0x394] ss:$12 sps:$4 sm:$0xff]   ;;  %v10156_v60 = vld [vmem:[#allocation14 + $0x37c] ss:$12 sps:$4 sm:$0xff]   ;;  %v10154_v4 = vld [vmem:[#allocation14 + $0x378] ss:$12 sps:$4 sm:$0xff]   ;;  %v6102_v16 = vadd.f32 %v11061_v26, %v6061_v50 }
 0x817   :  { %v6065_v6 = vpop.f32.mrf.mxu0  ;;  %7357 = vmatprep.subr.bf16.mxu0 %v10049_v14  ;;  %v10112_v14 = vld [vmem:[#allocation14 + $0x25c] ss:$12 sps:$4 sm:$0xff]   ;;  %v10110_v9 = vld [vmem:[#allocation14 + $0x258] ss:$12 sps:$4 sm:$0xff]   ;;  %v10177_v20 = vld [vmem:[#allocation14 + $0x454] ss:$12 sps:$4 sm:$0xff]  }
 0x818   :  { %v6357_v24 = vmax.f32 %v6104_v49, 0.0  ;;  %7389 = vmatpush1.bf16.msra.mxu1 %v10050_v57  ;;  %v10159_v57 = vld [vmem:[#allocation14 + $0x364] ss:$12 sps:$4 sm:$0xff]   ;;  %v10157_v49 = vld [vmem:[#allocation14 + $0x360] ss:$12 sps:$4 sm:$0xff]   ;;  %v6356_v61 = vmax.f32 %v6102_v16, 0.0 }
 0x819   :  { %7390 = vmatprep.subr.bf16.mxu1 %v10058_v31  ;;  %v10115_v31 = vld [vmem:[#allocation14 + $0x244] ss:$12 sps:$4 sm:$0xff]   ;;  %v10113_v6 = vld [vmem:[#allocation14 + $0x240] ss:$12 sps:$4 sm:$0xff]   ;;  %v10280_v26 = vld [vmem:[#allocation12] sm:$0x3f] }
 0x81a   :  { %v11069_v12 = vpack.c.bf16 %v6357_v24, %v6357_v24  ;;  %7358 = vmatpush1.bf16.msra.mxu0 %v10047_v37  ;;  %v10162_v37 = vld [vmem:[#allocation14 + $0x34c] ss:$12 sps:$4 sm:$0xff]   ;;  %v2780_v24 = vsub.s32 5, %v10673_v13  ;;  %v10189_v16 = vld [vmem:[#allocation14 + $0x3f4] ss:$12 sps:$4 sm:$0xff]  }
 0x81b   :  { %7359 = vmatprep.subr.bf16.mxu0 %v10055_v15  ;;  %v10116_v15 = vld [vmem:[#allocation14 + $0x170] ss:$12 sps:$4 sm:$0xff]   ;;  %v10181_v50 = vld [vmem:[#allocation14 + $0x420] ss:$12 sps:$4 sm:$0xff]  }
 0x81c   :  { %7416 = vmatprep.mubr.bf16.mxu1 %v11069_v12  ;;  %7391 = vmatpush1.bf16.msra.mxu1 %v10056_v7  ;;  %v10160_v7 = vld [vmem:[#allocation14 + $0x348] ss:$12 sps:$4 sm:$0xff]  }
 0x81d   :  { %7392 = vmatprep.subr.bf16.mxu1 %v10064_v34  ;;  %v10165_v34 = vld [vmem:[#allocation14 + $0x334] ss:$12 sps:$4 sm:$0xff]  }
 0x81e   :  { %7360 = vmatpush2.bf16.msra.mxu0 %v10053_v58  ;;  %v2777_v58 = vrot.slane %v10280_v26, %v2776_v54  ;;  %v10135_v54 = vld [vmem:[#allocation14 + $0x218] ss:$12 sps:$4 sm:$0xff]  }
 0x81f   :  { %7361 = vmatprep.subr.bf16.mxu0 %v10061_v8  ;;  %v10117_v8 = vld [vmem:[#allocation14 + $0xb0] ss:$12 sps:$4 sm:$0xff]  }
 0x820   :  { %7393 = vmatpush1.bf16.msra.mxu1 %v10062_v40  ;;  %v11081_v40 = vpack.c.bf16 %v6356_v61, %v6356_v61  ;;  %v10136_v61 = vld [vmem:[#allocation14 + $0x2c0] ss:$12 sps:$4 sm:$0xff]  }
 0x821   :  { %7394 = vmatprep.subr.bf16.mxu1 %v10070_v62  ;;  %v10118_v62 = vld [vmem:[#allocation14 + $0x158] ss:$12 sps:$4 sm:$0xff]  }
 0x822   :  { %7362 = vmatpush2.bf16.msra.mxu0 %v10059_v41  ;;  %v2781_v41 = vrot.slane %v10280_v26, %v2780_v24  ;;  %v10195_v24 = vld [vmem:[#allocation14 + $0x3c4] ss:$12 sps:$4 sm:$0xff]   ;;  %v10193_v26 = vld [vmem:[#allocation14 + $0x3c0] ss:$12 sps:$4 sm:$0xff]  }
 0x823   :  { %7363 = vmatprep.subr.bf16.mxu0 %v10067_v11  ;;  %v10163_v11 = vld [vmem:[#allocation14 + $0x330] ss:$12 sps:$4 sm:$0xff]  }
 0x824   :  { %7395 = vmatpush1.bf16.msra.mxu1 %v10068_v0 }
 0x825   :  { %7396 = vmatprep.subr.bf16.mxu1 %v10076_v5  ;;  %v10168_v5 = vld [vmem:[#allocation14 + $0x31c] ss:$12 sps:$4 sm:$0xff]  }
 0x826   :  { %7364 = vmatpush2.bf16.msra.mxu0 %v10065_v21 }
 0x827   :  { %7365 = vmatprep.subr.bf16.mxu0 %v10073_v63  ;;  %v10119_v63 = vld [vmem:[#allocation14 + $0x98] ss:$12 sps:$4 sm:$0xff]  }
 0x828   :  { %7397 = vmatpush1.bf16.msra.mxu1 %v10074_v23 }
 0x829   :  { %7398 = vmatprep.subr.bf16.mxu1 %v10082_v51 }
 0x82a   :  { %7366 = vmatpush2.bf16.msra.mxu0 %v10071_v10  ;;  %v10120_v10 = vld [vmem:[#allocation14 + $0x140] ss:$12 sps:$4 sm:$0xff]  }
 0x82b   :  { %7367 = vmatprep.subr.bf16.mxu0 %v10079_v2 }
 0x82c   :  { %7399 = vmatpush1.bf16.msra.mxu1 %v10080_v30 }
 0x82d   :  { %7400 = vmatprep.subr.bf16.mxu1 %v10088_v53  ;;  %v10166_v53 = vld [vmem:[#allocation14 + $0x318] ss:$12 sps:$4 sm:$0xff]  }
 0x82e   :  { %7368 = vmatpush2.bf16.msra.mxu0 %v10077_v19 }
 0x82f   :  { %7369 = vmatprep.subr.bf16.mxu0 %v10085_v39 }
 0x830   :  { %7401 = vmatpush2.bf16.msra.mxu1 %v10086_v52  ;;  %v10171_v52 = vld [vmem:[#allocation14 + $0x304] ss:$12 sps:$4 sm:$0xff]  }
 0x831   :  { %7402 = vmatprep.subr.bf16.mxu1 %v10094_v43 }
 0x832   :  { %7370 = vmatpush2.bf16.msra.mxu0 %v10083_v35  ;;  %v10121_v35 = vld [vmem:[#allocation14 + $0x80] ss:$12 sps:$4 sm:$0xff]  }
 0x833   :  { %7371 = vmatprep.subr.bf16.mxu0 %v10091_v28 }
 0x834   :  { %7403 = vmatpush2.bf16.msra.mxu1 %v10092_v29  ;;  %v10122_v29 = vld [vmem:[#allocation14 + $0x128] ss:$12 sps:$4 sm:$0xff]  }
 0x835   :  { %7404 = vmatprep.subr.bf16.mxu1 %v10100_v38  ;;  %v10169_v38 = vld [vmem:[#allocation14 + $0x300] ss:$12 sps:$4 sm:$0xff]  }
 0x836   :  { %7372 = vmatpush2.bf16.msra.mxu0 %v10089_v46 }
 0x837   :  { %7373 = vmatprep.subr.bf16.mxu0 %v10097_v32  ;;  %v10174_v32 = vld [vmem:[#allocation14 + $0x46c] ss:$12 sps:$4 sm:$0xff]  }
 0x838   :  { %7405 = vmatpush2.bf16.msra.mxu1 %v10098_v36  ;;  %v10123_v36 = vld [vmem:[#allocation14 + $0x68] ss:$12 sps:$4 sm:$0xff]  }
 0x839   :  { %7406 = vmatprep.subr.bf16.mxu1 %v10103_v33  ;;  %v10124_v33 = vld [vmem:[#allocation14 + $0x110] ss:$12 sps:$4 sm:$0xff]  }
 0x83a   :  { %7374 = vmatpush2.bf16.msra.mxu0 %v10095_v59  ;;  %v10172_v59 = vld [vmem:[#allocation14 + $0x468] ss:$12 sps:$4 sm:$0xff]  }
 0x83b   :  { %7425 = vmatprep.subr.bf16.mxu0 %v10150_v56  ;;  %v10125_v56 = vld [vmem:[#allocation14 + $0x50] ss:$12 sps:$4 sm:$0xff]  }
 0x83c   :  { %7407 = vmatpush2.bf16.msra.mxu1 %v10101_v42  ;;  %v10126_v42 = vld [vmem:[#allocation14 + $0xf8] ss:$12 sps:$4 sm:$0xff]  }
 0x83d   :  { %7376 = vmatmul.mubr.bf16.vlgmr.msra.gmra.mxu0 %v11073_v27  ;;  %7408 = vmatprep.subr.bf16.mxu1 %v10106_v22  ;;  %v10175_v22 = vld [vmem:[#allocation14 + $0x450] ss:$12 sps:$4 sm:$0xff]  }
 0x83e   :  { %7426 = vmatpush1.bf16.msra.mxu0 %v10148_v47  ;;  %v10180_v47 = vld [vmem:[#allocation14 + $0x43c] ss:$12 sps:$4 sm:$0xff]  }
 0x83f   :  { %7427 = vmatprep.subr.bf16.mxu0 %v10153_v45  ;;  %v10127_v45 = vld [vmem:[#allocation14 + $0x38] ss:$12 sps:$4 sm:$0xff]  }
 0x840   :  { %7409 = vmatpush2.bf16.msra.mxu1 %v10104_v48  ;;  %v10128_v48 = vld [vmem:[#allocation14 + $0xe0] ss:$12 sps:$4 sm:$0xff]  }
 0x841   :  { %7410 = vmatprep.subr.bf16.mxu1 %v10109_v55  ;;  %v10178_v55 = vld [vmem:[#allocation14 + $0x438] ss:$12 sps:$4 sm:$0xff]  }
 0x842   :  { %7428 = vmatpush1.bf16.msra.mxu0 %v10151_v44  ;;  %v10183_v44 = vld [vmem:[#allocation14 + $0x424] ss:$12 sps:$4 sm:$0xff]  }
 0x843   :  { %7429 = vmatprep.subr.bf16.mxu0 %v10156_v60  ;;  %v10129_v60 = vld [vmem:[#allocation14 + $0x20] ss:$12 sps:$4 sm:$0xff]  }
 0x844   :  { %7411 = vmatpush2.bf16.msra.mxu1 %v10107_v1  ;;  %v10130_v1 = vld [vmem:[#allocation14 + $0xc8] ss:$12 sps:$4 sm:$0xff]  }
 0x845   :  { %7412 = vmatprep.subr.bf16.mxu1 %v10112_v14  ;;  %v10186_v14 = vld [vmem:[#allocation14 + $0x40c] ss:$12 sps:$4 sm:$0xff]  }
 0x846   :  { %7430 = vmatpush1.bf16.msra.mxu0 %v10154_v4  ;;  %v10131_v4 = vld [vmem:[#allocation14 + $0x8] ss:$12 sps:$4 sm:$0xff]  }
 0x847   :  { %7431 = vmatprep.subr.bf16.mxu0 %v10159_v57  ;;  %v10132_v57 = vld [vmem:[#allocation14 + $0x2f0] ss:$12 sps:$4 sm:$0xff]  }
 0x848   :  { %7413 = vmatpush2.bf16.msra.mxu1 %v10110_v9  ;;  %v10184_v9 = vld [vmem:[#allocation14 + $0x408] ss:$12 sps:$4 sm:$0xff]  }
 0x849   :  { %7414 = vmatprep.subr.bf16.mxu1 %v10115_v31  ;;  %v10133_v31 = vld [vmem:[#allocation14 + $0x230] ss:$12 sps:$4 sm:$0xff]  }
 0x84a   :  { %7432 = vmatpush1.bf16.msra.mxu0 %v10157_v49  ;;  %v10134_v49 = vld [vmem:[#allocation14 + $0x2d8] ss:$12 sps:$4 sm:$0xff]  }
 0x84b   :  { %7433 = vmatprep.subr.bf16.mxu0 %v10162_v37  ;;  %v10187_v37 = vld [vmem:[#allocation14 + $0x3f0] ss:$12 sps:$4 sm:$0xff]  }
 0x84c   :  { %7415 = vmatpush2.bf16.msra.mxu1 %v10113_v6  ;;  %v10192_v6 = vld [vmem:[#allocation14 + $0x3dc] ss:$12 sps:$4 sm:$0xff]  }
 0x84d   :  { %8749 = vmatprep.subr.bf16.mxu1 %v10116_v15  ;;  %v10190_v15 = vld [vmem:[#allocation14 + $0x3d8] ss:$12 sps:$4 sm:$0xff]  }
 0x84e   :  { %7434 = vmatpush1.bf16.msra.mxu0 %v10160_v7  ;;  %v10137_v7 = vld [vmem:[#allocation14 + $0x200] ss:$12 sps:$4 sm:$0xff]  }
 0x84f   :  { %v6142_v0 = vpop.f32.mrf.mxu1  ;;  %7417 = vmatmul.mubr.bf16.vlgmr.msra.gmra.mxu1 %v11081_v40  ;;  %7435 = vmatprep.subr.bf16.mxu0 %v10165_v34  ;;  %v10138_v34 = vld [vmem:[#allocation14 + $0x2a8] ss:$12 sps:$4 sm:$0xff]  }
 0x850   :  { %v6143_v21 = vadd.f32 %v6142_v0, %v2777_v58  ;;  %8750 = vmatpush3.bf16.msra.mxu1 %v10117_v8  ;;  %7498 = vmatprep.mubr.bf16.mxu1 %v11057_v25  ;;  %v10139_v58 = vld [vmem:[#allocation14 + $0x1e8] ss:$12 sps:$4 sm:$0xff]   ;;  %v10140_v8 = vld [vmem:[#allocation14 + $0x290] ss:$12 sps:$4 sm:$0xff]   ;;  %v10145_v0 = vld [vmem:[#allocation14 + $0x1a0] ss:$12 sps:$4 sm:$0xff]  }
 0x851   :  { %v6183_v23 = vpop.f32.mrf.mxu0  ;;  %v6144_v51 = vpop.f32.mrf.mxu1  ;;  %8751 = vmatprep.subr.bf16.mxu1 %v10118_v62  ;;  %v10142_v62 = vld [vmem:[#allocation14 + $0x278] ss:$12 sps:$4 sm:$0xff]  }
 0x852   :  { %v11085_v2 = vadd.f32 %v6183_v23, %v6143_v21  ;;  %v6145_v30 = vadd.f32 %v6144_v51, %v2781_v41  ;;  %7436 = vmatpush1.bf16.msra.mxu0 %v10163_v11  ;;  %v10143_v41 = vld [vmem:[#allocation14 + $0x1b8] ss:$12 sps:$4 sm:$0xff]   ;;  %v10144_v11 = vld [vmem:[#allocation14 + $0x260] ss:$12 sps:$4 sm:$0xff]   ;;  %v10147_v21 = vld [vmem:[#allocation14 + $0x188] ss:$12 sps:$4 sm:$0xff]  }
 0x853   :  { %v6185_v19 = vpop.f32.mrf.mxu0  ;;  %v6146_v39 = vpop.f32.mrf.mxu1  ;;  %7437 = vmatprep.subr.bf16.mxu0 %v10168_v5  ;;  %v10146_v5 = vld [vmem:[#allocation14 + $0x248] ss:$12 sps:$4 sm:$0xff]  }
 0x854   :  { %v11087_v43 = vadd.f32 %v6185_v19, %v6145_v30  ;;  %8752 = vmatpush3.bf16.msra.mxu1 %v10119_v63 }
 0x855   :  { %v6187_v28 = vpop.f32.mrf.mxu0  ;;  %v6147_v25 = vpop.f32.mrf.mxu1  ;;  %8753 = vmatprep.subr.bf16.mxu1 %v10120_v10 }
 0x856   :  { %7438 = vmatpush1.bf16.msra.mxu0 %v10166_v53 }
 0x857   :  { %v6188_v46 = vpop.f32.mrf.mxu0  ;;  %7439 = vmatprep.subr.bf16.mxu0 %v10171_v52 }
 0x858   :  { %8754 = vmatpush3.bf16.msra.mxu1 %v10121_v35 }
 0x859   :  { %8755 = vmatprep.subr.bf16.mxu1 %v10122_v29 }
 0x85a   :  { %7440 = vmatpush1.bf16.msra.mxu0 %v10169_v38 }
 0x85b   :  { %7441 = vmatprep.subr.bf16.mxu0 %v10174_v32 }
 0x85c   :  { %8756 = vmatpush3.bf16.msra.mxu1 %v10123_v36 }
 0x85d   :  { %8757 = vmatprep.subr.bf16.mxu1 %v10124_v33 }
 0x85e   :  { %7442 = vmatpush2.bf16.msra.mxu0 %v10172_v59 }
 0x85f   :  { %7443 = vmatprep.subr.bf16.mxu0 %v10177_v20 }
 0x860   :  { %8758 = vmatpush3.bf16.msra.mxu1 %v10125_v56 }
 0x861   :  { %8759 = vmatprep.subr.bf16.mxu1 %v10126_v42 }
 0x862   :  { %7444 = vmatpush2.bf16.msra.mxu0 %v10175_v22 }
 0x863   :  { %7445 = vmatprep.subr.bf16.mxu0 %v10180_v47 }
 0x864   :  { %8760 = vmatpush3.bf16.msra.mxu1 %v10127_v45  ;;  %v7620_v45 = vld [vmem:[%s11278_s9 + $0xf8] sm:$0xff] }
 0x865   :  { %8761 = vmatprep.subr.bf16.mxu1 %v10128_v48 }
 0x866   :  { %7446 = vmatpush2.bf16.msra.mxu0 %v10178_v55  ;;  %v7603_v55 = vld [vmem:[%s11278_s9 + $0x70] sm:$0xff] }
 0x867   :  { %7447 = vmatprep.subr.bf16.mxu0 %v10183_v44  ;;  %v7618_v44 = vld [vmem:[%s11278_s9 + $0xe8] sm:$0xff] }
 0x868   :  { %8762 = vmatpush3.bf16.msra.mxu1 %v10129_v60 }
 0x869   :  { %8763 = vmatprep.subr.bf16.mxu1 %v10130_v1  ;;  %v10197_v1 = vld [vmem:[#allocation14 + $0x3b0] ss:$12 sps:$4 sm:$0xff]  }
 0x86a   :  { %7448 = vmatpush2.bf16.msra.mxu0 %v10181_v50  ;;  %v7602_v50 = vld [vmem:[%s11278_s9 + $0x68] sm:$0xff] }
 0x86b   :  { %7449 = vmatprep.subr.bf16.mxu0 %v10186_v14 }
 0x86c   :  { %8764 = vmatpush3.bf16.msra.mxu1 %v10131_v4  ;;  %v10198_v4 = vld [vmem:[#allocation14 + $0x458] ss:$12 sps:$4 sm:$0xff]  }
 0x86d   :  { %8771 = vmatprep.subr.bf16.mxu1 %v10132_v57  ;;  %v7617_v57 = vld [vmem:[%s11278_s9 + $0xe0] sm:$0xff] }
 0x86e   :  { %7450 = vmatpush2.bf16.msra.mxu0 %v10184_v9  ;;  %v7601_v9 = vld [vmem:[%s11278_s9 + $0x60] sm:$0xff] }
 0x86f   :  { %7499 = vmatmul.mubr.bf16.vlgmr.msra.gmra.mxu1 %v11073_v27  ;;  %7451 = vmatprep.subr.bf16.mxu0 %v10189_v16  ;;  %v10196_v27 = vld [vmem:[#allocation14 + $0x470] ss:$12 sps:$4 sm:$0xff]   ;;  %v10199_v16 = vld [vmem:[#allocation14 + $0x398] ss:$12 sps:$4 sm:$0xff]  }
 0x870   :  { %8772 = vmatpush3.bf16.msra.mxu1 %v10133_v31  ;;  %7538 = vmatprep.mubr.bf16.mxu1 %v11069_v12  ;;  %v10141_v12 = vld [vmem:[#allocation14 + $0x1d0] ss:$12 sps:$4 sm:$0xff]  }
 0x871   :  { %8773 = vmatprep.subr.bf16.mxu1 %v10134_v49  ;;  %v7616_v31 = vld [vmem:[%s11278_s9 + $0xd8] sm:$0xff] }
 0x872   :  { %7452 = vmatpush2.bf16.msra.mxu0 %v10187_v37  ;;  %v10200_v49 = vld [vmem:[#allocation14 + $0x440] ss:$12 sps:$4 sm:$0xff]  }
 0x873   :  { %7453 = vmatprep.subr.bf16.mxu0 %v10192_v6  ;;  %v7600_v37 = vld [vmem:[%s11278_s9 + $0x58] sm:$0xff]  ;;  %v7615_v6 = vld [vmem:[%s11278_s9 + $0xd0] sm:$0xff] }
 0x874   :  { %8774 = vmatpush3.bf16.msra.mxu1 %v10135_v54  ;;  %v7599_v54 = vld [vmem:[%s11278_s9 + $0x50] sm:$0xff] }
 0x875   :  { %8775 = vmatprep.subr.bf16.mxu1 %v10136_v61  ;;  %v10201_v61 = vld [vmem:[#allocation14 + $0x380] ss:$12 sps:$4 sm:$0xff]  }
 0x876   :  { %7454 = vmatpush2.bf16.msra.mxu0 %v10190_v15  ;;  %v7614_v15 = vld [vmem:[%s11278_s9 + $0xc8] sm:$0xff] }
 0x877   :  { %7455 = vmatprep.subr.bf16.mxu0 %v10195_v24  ;;  %v10202_v24 = vld [vmem:[#allocation14 + $0x428] ss:$12 sps:$4 sm:$0xff]  }
 0x878   :  { %8776 = vmatpush3.bf16.msra.mxu1 %v10137_v7  ;;  %v7598_v7 = vld [vmem:[%s11278_s9 + $0x48] sm:$0xff] }
 0x879   :  { %8777 = vmatprep.subr.bf16.mxu1 %v10138_v34  ;;  %v7613_v34 = vld [vmem:[%s11278_s9 + $0xc0] sm:$0xff] }
 0x87a   :  { %7456 = vmatpush2.bf16.msra.mxu0 %v10193_v26  ;;  %v7597_v26 = vld [vmem:[%s11278_s9 + $0x40] sm:$0xff] }
 0x87b   :  { %8793 = vmatprep.subr.bf16.mxu0 %v10196_v27  ;;  %v10203_v27 = vld [vmem:[#allocation14 + $0x368] ss:$12 sps:$4 sm:$0xff]  }
 0x87c   :  { %8778 = vmatpush3.bf16.msra.mxu1 %v10139_v58  ;;  %v7612_v58 = vld [vmem:[%s11278_s9 + $0xb8] sm:$0xff] }
 0x87d   :  { %8779 = vmatprep.subr.bf16.mxu1 %v10140_v8  ;;  %v10204_v8 = vld [vmem:[#allocation14 + $0x410] ss:$12 sps:$4 sm:$0xff]  }
 0x880   :  { %8780 = vmatpush3.bf16.msra.mxu1 %v10141_v12  ;;  %v7596_v12 = vld [vmem:[%s11278_s9 + $0x38] sm:$0xff] }
 0x881   :  { %8781 = vmatprep.subr.bf16.mxu1 %v10142_v62  ;;  %v7611_v62 = vld [vmem:[%s11278_s9 + $0xb0] sm:$0xff] }
 0x884   :  { %8782 = vmatpush3.bf16.msra.mxu1 %v10143_v41  ;;  %v7595_v41 = vld [vmem:[%s11278_s9 + $0x30] sm:$0xff] }
 0x885   :  { %8783 = vmatprep.subr.bf16.mxu1 %v10144_v11  ;;  %v10205_v11 = vld [vmem:[#allocation14 + $0x350] ss:$12 sps:$4 sm:$0xff]  }
 0x888   :  { %8784 = vmatpush3.bf16.msra.mxu1 %v10145_v0  ;;  %v7610_v0 = vld [vmem:[%s11278_s9 + $0xa8] sm:$0xff] }
 0x889   :  { %8785 = vmatprep.subr.bf16.mxu1 %v10146_v5  ;;  %v10206_v5 = vld [vmem:[#allocation14 + $0x3f8] ss:$12 sps:$4 sm:$0xff]  }
 0x88c   :  { %8786 = vmatpush3.bf16.msra.mxu1 %v10147_v21  ;;  %v7594_v21 = vld [vmem:[%s11278_s9 + $0x28] sm:$0xff] }
 0x88d   :  { %8815 = vmatprep.subr.mxu1 %v7620_v45  ;;  %v7590_v45 = vld [vmem:[%s11278_s9 + $0x8] sm:$0xff] }
 0x88f   :  { %v6224_v63 = vpop.f32.mrf.mxu1  ;;  %7539 = vmatmul.mubr.bf16.vlgmr.msra.gmra.mxu1 %v11081_v40 }
 0x890   :  { %v6225_v29 = vadd.f32 %v6224_v63, %v11085_v2  ;;  %v7604_v2 = vld [vmem:[%s11278_s9 + $0x78] sm:$0xff]  ;;  %v7609_v63 = vld [vmem:[%s11278_s9 + $0xa0] sm:$0xff] }
 0x891   :  { %v6265_v23 = vpop.f32.mrf.mxu0  ;;  %v6226_v51 = vpop.f32.mrf.mxu1  ;;  %8816 = vmatpush3.msra.mxu1 %v7604_v2  ;;  %v7605_v2 = vld [vmem:[%s11278_s9 + $0x80] sm:$0xff] }
 0x892   :  { %v6227_v38 = vadd.f32 %v6226_v51, %v11087_v43  ;;  %v6266_v46 = vadd.f32 %v6265_v23, %v6225_v29  ;;  %v7619_v43 = vld [vmem:[%s11278_s9 + $0xf0] sm:$0xff]  ;;  %v7593_v23 = vld [vmem:[%s11278_s9 + $0x20] sm:$0xff] }
 0x893   :  { %v6267_v10 = vpop.f32.mrf.mxu0  ;;  %v6228_v30 = vpop.f32.mrf.mxu1  ;;  %8817 = vmatprep.subr.mxu1 %v7619_v43  ;;  %v10207_v51 = vld [vmem:[#allocation14 + $0x338] ss:$12 sps:$4 sm:$0xff]  }
 0x894   :  { %v6268_v36 = vadd.f32 %v6267_v10, %v6227_v38  ;;  %8818 = vmatpush3.msra.mxu1 %v7603_v55  ;;  %v10208_v10 = vld [vmem:[#allocation14 + $0x3e0] ss:$12 sps:$4 sm:$0xff]   ;;  %v7589_v43 = vld [vmem:[%s11278_s9] sm:$0xff]  ;;  %v10554_v55 = vmov 0.0  }
 0x895   :  { %v6269_v53 = vpop.f32.mrf.mxu0  ;;  %v6229_v19 = vpop.f32.mrf.mxu1  ;;  %8819 = vmatprep.subr.mxu1 %v7618_v44  ;;  %v10209_v30 = vld [vmem:[#allocation14 + $0x320] ss:$12 sps:$4 sm:$0xff]  }
 0x896   :  { %8820 = vmatpush3.msra.mxu1 %v7602_v50  ;;  %v10210_v53 = vld [vmem:[#allocation14 + $0x3c8] ss:$12 sps:$4 sm:$0xff]  }
 0x897   :  { %v6270_v39 = vpop.f32.mrf.mxu0  ;;  %8821 = vmatprep.subr.mxu1 %v7617_v57  ;;  %v10211_v19 = vld [vmem:[#allocation14 + $0x308] ss:$12 sps:$4 sm:$0xff]  }
 0x898   :  { %8822 = vmatpush3.msra.mxu1 %v7601_v9  ;;  %v7635_v44 = vld [vmem:[%s11278_s9 + $0x170] sm:$0xff]  ;;  %v7632_v50 = vld [vmem:[%s11278_s9 + $0x158] sm:$0xff]  ;;  %v7629_v9 = vld [vmem:[%s11278_s9 + $0x140] sm:$0xff] }
 0x899   :  { %8823 = vmatprep.subr.mxu1 %v7616_v31 }
 0x89a   :  { %8824 = vmatpush3.msra.mxu1 %v7600_v37 }
 0x89b   :  { %8825 = vmatprep.subr.mxu1 %v7615_v6  ;;  %v7627_v6 = vld [vmem:[%s11278_s9 + $0x130] sm:$0xff] }
 0x89c   :  { %8826 = vmatpush3.msra.mxu1 %v7599_v54 }
 0x89d   :  { %8827 = vmatprep.subr.mxu1 %v7614_v15  ;;  %v7625_v15 = vld [vmem:[%s11278_s9 + $0x120] sm:$0xff] }
 0x89e   :  { %8828 = vmatpush3.msra.mxu1 %v7598_v7  ;;  %v7623_v7 = vld [vmem:[%s11278_s9 + $0x110] sm:$0xff] }
 0x89f   :  { %8829 = vmatprep.subr.mxu1 %v7613_v34  ;;  %v7622_v34 = vld [vmem:[%s11278_s9 + $0x108] sm:$0xff] }
 0x8a0   :  { %8830 = vmatpush3.msra.mxu1 %v7597_v26  ;;  %v7621_v26 = vld [vmem:[%s11278_s9 + $0x100] sm:$0xff] }
 0x8a1   :  { %8831 = vmatprep.subr.mxu1 %v7612_v58 }
 0x8a2   :  { %8832 = vmatpush3.msra.mxu1 %v7596_v12 }
 0x8a3   :  { %8833 = vmatprep.subr.mxu1 %v7611_v62 }
 0x8a4   :  { %8834 = vmatpush3.msra.mxu1 %v7595_v41 }
 0x8a5   :  { %8835 = vmatprep.subr.mxu1 %v7610_v0 }
 0x8a6   :  { %8836 = vmatpush3.msra.mxu1 %v7594_v21 }
 0x8a7   :  { %8837 = vmatprep.subr.mxu1 %v7609_v63 }
 0x8a8   :  { %8838 = vmatpush3.msra.mxu1 %v7593_v23 }
 0x8bd   :  { %v6347_v52 = vpop.f32.mrf.mxu0 }
 0x8bf   :  { %v6349_v35 = vpop.f32.mrf.mxu0 }
 0x8c1   :  { %v6351_v28 = vpop.f32.mrf.mxu0 }
 0x8c3   :  { %v6352_v25 = vpop.f32.mrf.mxu0 }
 0x8c4   :  { %v11170_v25 = vld [vmem:[#allocation15] sm:$0x7] }
 0x8c5   :  { %v6563_v29 = vrot.slane %v11170_v25, %v10676_v17  ;;  %v6567_v38 = vrot.slane %v11170_v25, %v10679_v18  ;;  %v7592_v17 = vld [vmem:[%s11278_s9 + $0x18] sm:$0xff]  ;;  %v7607_v18 = vld [vmem:[%s11278_s9 + $0x90] sm:$0xff] }
 0x8cf   :  { %v6306_v32 = vpop.f32.mrf.mxu1 }
 0x8d0   :  { %v6307_v33 = vadd.f32 %v6306_v32, %v6266_v46 }
 0x8d1   :  { %v6308_v40 = vpop.f32.mrf.mxu1 }
 0x8d2   :  { %v6348_v59 = vadd.f32 %v6347_v52, %v6307_v33  ;;  %v6309_v20 = vadd.f32 %v6308_v40, %v6268_v36 }
 0x8d3   :  { %v6310_v56 = vpop.f32.mrf.mxu1 }
 0x8d4   :  { %v6350_v42 = vadd.f32 %v6349_v35, %v6309_v20  ;;  %v6358_v22 = vmax.f32 %v6348_v59, 0.0 }
 0x8d5   :  { %v6311_v47 = vpop.f32.mrf.mxu1 }
 0x8d6   :  { %v6359_v48 = vmax.f32 %v6350_v42, 0.0  ;;  %v11112_v14 = vpack.c.bf16 %v6358_v22, %v6358_v22  ;;  %v7608_v42 = vld [vmem:[%s11278_s9 + $0x98] sm:$0xff]  ;;  %v7591_v22 = vld [vmem:[%s11278_s9 + $0x10] sm:$0xff]  ;;  %v7606_v47 = vld [vmem:[%s11278_s9 + $0x88] sm:$0xff] }
 0x8d7   :  { %8839 = vmatprep.subr.mxu1 %v7608_v42 }
 0x8d8   :  { %v6365_v60 = vpack.c.bf16 %v6359_v48, %v6359_v48  ;;  %8840 = vmatpush3.msra.mxu1 %v7592_v17  ;;  %v7636_v48 = vld [vmem:[%s11278_s9 + $0x178] sm:$0xff] }
 0x8d9   :  { %8841 = vmatprep.subr.mxu1 %v7607_v18 }
 0x8da   :  { %7457 = vmatprep.mubr.bf16.mxu0 %v6365_v60  ;;  %8842 = vmatpush3.msra.mxu1 %v7591_v22 }
 0x8db   :  { %7458 = vmatmul.mubr.bf16.vlgmr.msra.gmra.mxu0 %v11112_v14  ;;  %8843 = vmatprep.subr.mxu1 %v7606_v47 }
 0x8dc   :  { %8794 = vmatpush3.bf16.msra.mxu0 %v10197_v1  ;;  %7578 = vmatprep.mubr.bf16.mxu0 %v6365_v60  ;;  %v7634_v60 = vld [vmem:[%s11278_s9 + $0x168] sm:$0xff]  ;;  %v7633_v1 = vld [vmem:[%s11278_s9 + $0x160] sm:$0xff] }
 0x8dd   :  { %8795 = vmatprep.subr.bf16.mxu0 %v10198_v4  ;;  %8844 = vmatpush3.msra.mxu1 %v7590_v45  ;;  %v7630_v4 = vld [vmem:[%s11278_s9 + $0x148] sm:$0xff] }
 0x8de   :  { %8845 = vmatprep.subr.mxu1 %v7605_v2 }
 0x8df   :  { %8846 = vmatpush3.msra.mxu1 %v7589_v43 }
 0x8e0   :  { %8796 = vmatpush3.bf16.msra.mxu0 %v10199_v16 }
 0x8e1   :  { %8797 = vmatprep.subr.bf16.mxu0 %v10200_v49  ;;  %v7628_v49 = vld [vmem:[%s11278_s9 + $0x138] sm:$0xff] }
 0x8e4   :  { %8798 = vmatpush3.bf16.msra.mxu0 %v10201_v61  ;;  %v7626_v61 = vld [vmem:[%s11278_s9 + $0x128] sm:$0xff] }
 0x8e5   :  { %8799 = vmatprep.subr.bf16.mxu0 %v10202_v24  ;;  %v7624_v24 = vld [vmem:[%s11278_s9 + $0x118] sm:$0xff] }
 0x8e8   :  { %8800 = vmatpush3.bf16.msra.mxu0 %v10203_v27  ;;  %v6571_v27 = vrot.slane %v11170_v25, %v2768_v3 }
 0x8e9   :  { %8801 = vmatprep.subr.bf16.mxu0 %v10204_v8 }
 0x8ec   :  { %8802 = vmatpush3.bf16.msra.mxu0 %v10205_v11 }
 0x8ed   :  { %8803 = vmatprep.subr.bf16.mxu0 %v10206_v5 }
 0x8f0   :  { %8804 = vmatpush3.bf16.msra.mxu0 %v10207_v51 }
 0x8f1   :  { %8805 = vmatprep.subr.bf16.mxu0 %v10208_v10 }
 0x8f4   :  { %8806 = vmatpush3.bf16.msra.mxu0 %v10209_v30 }
 0x8f5   :  { %8807 = vmatprep.subr.bf16.mxu0 %v10210_v53 }
 0x8f8   :  { %8808 = vmatpush3.bf16.msra.mxu0 %v10211_v19 }
 0x8f9   :  { %8867 = vmatprep.subr.mxu0 %v10554_v55 }
 0x8fb   :  { %7579 = vmatmul.mubr.bf16.vlgmr.msra.gmra.mxu0 %v11112_v14  ;;  %v7631_v14 = vld [vmem:[%s11278_s9 + $0x150] sm:$0xff]  ;;  %s10556_s9 = smov [#allocation19]  }
 0x8fc   :  { %8868 = vmatpush3.msra.mxu0 %v7636_v48  ;;  %8899 = vmatprep.mubr.msk.f32.mxu0 %vm10555_vm0, %v10554_v55  ;;  %s7813_s28 = sshll.u32 %s10556_s9, 4  ;;  %s7814_s28 = int_to_ptr.vmem [resolvable:$true] %s7813_s28 }
 0x8fd   :  { %v7377_v39 = vpop.f32.mrf.mxu0  ;;  %8869 = vmatprep.subr.mxu0 %v10554_v55  ;;  %s10461_s3 = scalar_lea.vmem %s7814_s28, 32  ;;  %p10466_p4 = scmp.lt.s32.totalorder %s7814_s28, %s7814_s28 }
 0x8fe   :  { %v7378_v46 = vadd.f32 %v7377_v39, %v6563_v29  ;;  %8870 = vmatpush3.msra.mxu0 %v7635_v44  ;;  %p10462_p3 = scmp.ne.s32.totalorder %s7814_s28, %s10461_s3  ;;  %p10467_p5 = scmp.lt.s32.totalorder %s10461_s3, %s10461_s3 }
 0x8ff   :  { %v7379_v52 = vpop.f32.mrf.mxu0  ;;  %8871 = vmatprep.subr.mxu0 %v10554_v55 }
 0x900   :  { %v7380_v36 = vadd.f32 %v7379_v52, %v6567_v38  ;;  %8872 = vmatpush3.msra.mxu0 %v7634_v60  ;;  %p10468_p6 = por %p10467_p5, %p10466_p4 }
 0x901   :  { %v7381_v35 = vpop.f32.mrf.mxu0  ;;  %8873 = vmatprep.subr.mxu0 %v10554_v55 }
 0x902   :  { %8874 = vmatpush3.msra.mxu0 %v7633_v1  ;;  %p10469_p7 = pnand %p10468_p6, %p10462_p3 }
 0x903   :  { %v7382_v28 = vpop.f32.mrf.mxu0  ;;  %8875 = vmatprep.subr.mxu0 %v10554_v55 }
 0x904   :  { %8876 = vmatpush3.msra.mxu0 %v7632_v50 }
 0x905   :  { %8877 = vmatprep.subr.mxu0 %v10554_v55 }
 0x906   :  { %8878 = vmatpush3.msra.mxu0 %v7631_v14 }
 0x907   :  { %8879 = vmatprep.subr.mxu0 %v10554_v55 }
 0x908   :  { %8880 = vmatpush3.msra.mxu0 %v7630_v4 }
 0x909   :  { %8881 = vmatprep.subr.mxu0 %v10554_v55 }
 0x90a   :  { %8882 = vmatpush3.msra.mxu0 %v7629_v9 }
 0x90b   :  { %8883 = vmatprep.subr.mxu0 %v10554_v55 }
 0x90c   :  { %8884 = vmatpush3.msra.mxu0 %v7628_v49 }
 0x90d   :  { %8885 = vmatprep.subr.mxu0 %v10554_v55 }
 0x90e   :  { %8886 = vmatpush3.msra.mxu0 %v7627_v6 }
 0x90f   :  { %v7418_v32 = vpop.f32.mrf.mxu1  ;;  %8887 = vmatprep.subr.mxu0 %v10554_v55 }
 0x910   :  { %v11176_v33 = vadd.f32 %v7418_v32, %v7378_v46  ;;  %8888 = vmatpush3.msra.mxu0 %v7626_v61  ;;  %v8736_v46 = vld [vmem:[#allocation17] ss:$0 sm:$0xff] }
 0x911   :  { %v7420_v40 = vpop.f32.mrf.mxu1  ;;  %8889 = vmatprep.subr.mxu0 %v10554_v55 }
 0x912   :  { %v11178_v59 = vadd.f32 %v7420_v40, %v7380_v36  ;;  %8890 = vmatpush3.msra.mxu0 %v7625_v15 }
 0x913   :  { %v7422_v20 = vpop.f32.mrf.mxu1  ;;  %8891 = vmatprep.subr.mxu0 %v10554_v55 }
 0x914   :  { %8892 = vmatpush3.msra.mxu0 %v7624_v24 }
 0x915   :  { %v7423_v56 = vpop.f32.mrf.mxu1  ;;  %8893 = vmatprep.subr.mxu0 %v10554_v55 }
 0x916   :  { %8894 = vmatpush3.msra.mxu0 %v7623_v7 }
 0x917   :  { %8895 = vmatprep.subr.mxu0 %v10554_v55 }
 0x918   :  { %8896 = vmatpush3.msra.mxu0 %v7622_v34 }
 0x919   :  { %8897 = vmatprep.subr.mxu0 %v10554_v55 }
 0x91a   :  { %8898 = vmatpush3.msra.mxu0 %v7621_v26 }
 0x92f   :  { %v8765_v57 = vpop.f32.mrf.mxu1 }
 0x931   :  { %v8766_v16 = vpop.f32.mrf.mxu1 }
 0x932   :  { %v8767_v31 = vadd.f32 %v8766_v16, %v8765_v57 }
 0x933   :  { %v8768_v37 = vpop.f32.mrf.mxu1 }
 0x934   :  { %v7501_v12 = vadd.f32 %v8767_v31, %v6571_v27 }
 0x935   :  { %v8769_v54 = vpop.f32.mrf.mxu1 }
 0x94f   :  { %v8787_v58 = vpop.f32.mrf.mxu1 }
 0x951   :  { %v8788_v8 = vpop.f32.mrf.mxu1 }
 0x952   :  { %v8789_v62 = vadd.f32 %v8788_v8, %v8787_v58 }
 0x953   :  { %v8790_v41 = vpop.f32.mrf.mxu1 }
 0x954   :  { %v7541_v11 = vadd.f32 %v8789_v62, %v7501_v12 }
 0x955   :  { %v8791_v0 = vpop.f32.mrf.mxu1 }
 0x99b   :  { %v7459_v5 = vpop.f32.mrf.mxu0 }
 0x99c   :  { %v7460_v21 = vadd.f32 %v7459_v5, %v11176_v33 }
 0x99d   :  { %v7461_v63 = vpop.f32.mrf.mxu0 }
 0x99e   :  { %v7462_v23 = vadd.f32 %v7461_v63, %v11178_v59  ;;  %v7586_v30 = vmax.f32 %v7460_v21, 0.0 }
 0x99f   :  { %v7463_v51 = vpop.f32.mrf.mxu0 }
 0x9a0   :  { %v7587_v10 = vmax.f32 %v7462_v23, 0.0 }
 0x9a1   :  { %v7464_v53 = vpop.f32.mrf.mxu0 }
 0x9a2   :  { %7708 = vmatprep.mubr.f32.mxu1 %v7587_v10 }
 0x9a3   :  { %7709 = vmatmul.mubr.f32.vlgmr.msra.gmra.mxu1 %v7586_v30 }
 0x9bb   :  { %v8809_v13 = vpop.f32.mrf.mxu0 }
 0x9bd   :  { %v8810_v3 = vpop.f32.mrf.mxu0 }
 0x9be   :  { %v8811_v19 = vadd.f32 %v8810_v3, %v8809_v13 }
 0x9bf   :  { %v8812_v39 = vpop.f32.mrf.mxu0 }
 0x9c0   :  { %v7581_v52 = vadd.f32 %v8811_v19, %v7541_v11 }
 0x9c1   :  { %v8813_v35 = vpop.f32.mrf.mxu0 }
 0x9c2   :  { %v7588_v28 = vmax.f32 %v7581_v52, 0.0 }
 0x9c4   :  { %8900 = vmatmul.mubr.f32.vlgmr.msra.gmra.mxu0 %v7588_v28 }
 0xa63   :  { %v8847_v25 = vpop.f32.mrf.mxu1 }
 0xa65   :  { %v8848_v29 = vpop.f32.mrf.mxu1 }
 0xa66   :  { %v8849_v38 = vadd.f32 %v8848_v29, %v8847_v25 }
 0xa68   :  { %v7711_v32 = vadd.f32 %v8849_v38, %v8736_v46 }
 0xa84   :  { %v7780_v36 = vpop.f32.mrf.mxu0 }
 0xa85   :  { %v7781_v33 = vadd.f32 %v7780_v36, %v7711_v32 }
 0xa86   :  { %v8901_v40 = vpop.f32.mrf.mxu0 }
 0xa87   :  { %v7785_v59 = vsel %vm7784_vm1, %v7781_v33, -inf }
 0xa88   :  { %7786 = vmax.xlane.f32.xlu1 %v7785_v59 }
 0xb11   :  { %v7787_v20 = vpop.xlane.xlu1 %7786 }
 0xb12   :  { %v7788_v56 = vsub.f32 %v7781_v33, %v7787_v20 }
 0xb14   :  { %v7789_v42 = vmul.f32 1.442695, %v7788_v56 }
 0xb16   :  { %10232 = vpow2.f32 %v7789_v42 }
 0xb23   :  { %v10233_v17 = vpop.eup %10232 }
 0xb24   :  { %v7791_v18 = vsel %vm7784_vm1, %v10233_v17, 0.0 }
 0xb25   :  { %7792 = vadd.xlane.f32.xlu0 %v7791_v18 }
 0xb26   :  { %10472 = shalt.err (!%p10469_p7)
}
 0xb27   :  { %7816 = dma.vmem_to_hbm [thread:$0]  %s7814_s28, 32, %s11281_s12, [#allocation20]  }
 0xb28   :  { %s10481_s14 = scalar_lea.vmem %s7804_s2, 384  ;;  %p10486_p9 = scmp.lt.s32.totalorder %s7804_s2, %s7804_s2 }
 0xb29   :  { %p10482_p8 = scmp.ne.s32.totalorder %s7804_s2, %s10481_s14  ;;  %p10487_p10 = scmp.lt.s32.totalorder %s10481_s14, %s10481_s14 }
 0xb2b   :  { %p10488_p11 = por %p10487_p10, %p10486_p9 }
 0xb2d   :  { %p10489_p12 = pnand %p10488_p11, %p10482_p8 }
 0xb2f   :  { %10492 = shalt.err (!%p10489_p12)
}
 0xb30   :  { %7806 = dma.vmem_to_hbm [thread:$0]  %s7804_s2, 384, %s11280_s11, [#allocation5]  }
 0xb31   :  { %s10558_s15 = smov [#allocation21]  }
 0xb32   :  { %s7823_s16 = sshll.u32 %s10558_s15, 4  ;;  %s7824_s16 = int_to_ptr.vmem [resolvable:$true] %s7823_s16 }
 0xb33   :  { %s10501_s12 = scalar_lea.vmem %s7824_s16, 32  ;;  %p10506_p0 = scmp.lt.s32.totalorder %s7824_s16, %s7824_s16 }
 0xb34   :  { %p10502_p13 = scmp.ne.s32.totalorder %s7824_s16, %s10501_s12  ;;  %p10507_p1 = scmp.lt.s32.totalorder %s10501_s12, %s10501_s12 }
 0xb36   :  { %p10508_p2 = por %p10507_p1, %p10506_p0 }
 0xb38   :  { %p10509_p3 = pnand %p10508_p2, %p10502_p13 }
 0xbae   :  { %v7793_v22 = vpop.xlane.xlu0 %7792 }
 0xbaf   :  { %10234 = vrcp.f32 %v7793_v22 }
 0xbbc   :  { %v10235_v47 = vpop.eup %10234 }
 0xbbd   :  { %v7795_v45 = vmul.f32 %v10235_v47, %v10233_v17 }
 0xbbf   :  { %7796 = vst.msk [vmem:[#allocation21] sm:$0x3] %vm7784_vm1, %v7795_v45 }
 0xbc0   :  { %10512 = shalt.err (!%p10509_p3)
}
 0xbc1   :  { %7826 = dma.vmem_to_hbm [thread:$0]  %s7824_s16, 32, %s11282_s13, [#allocation20]  }
 0xbc2   :  { %10531 = dma.done.wait [#allocation5], 384  }
 0xbc3   :  { %10532 = vsyncadd [#allocation5], 4294966912 }
 0xbc4   :  { %10533 = dma.done.wait [#allocation20], 64  }
 0xbc5   :  { %10534 = vsyncadd [#allocation20], 4294967232 }
 0xbc6   :  { %7836 = vsyncpa [#allocation4], 1 }
 0xbc7   :  { %7837 = vsyncpa [#allocation7], 1 }
 0xbc8   :  { %7838 = vsyncpa [#allocation10], 1 }
 0xbc9   :  { %7839 = vsyncpa [#allocation13], 1 }
 0xbca   :  { %7840 = vsyncpa [#allocation16], 1 }
 0xbcb   :  { %7841 = vsyncpa [#allocation5], 1 }
 0xbcc   :  { %7842 = vsyncpa [#allocation20], 1 }

</bundles_post_ra>
